<compile_context>
chip_gen: v7x
topology: tpu7x:2x2x1
jax: 0.10.0
libtpu: 0.0.40
codegen_flags: <defaults>
</compile_context>

<pallas_src>
import math

import jax
import jax.numpy as jnp
from jax.experimental import pallas as pl
from jax.experimental.pallas import tpu as pltpu


def _layer_norm(x, gamma, beta, eps=1e-5):
    """f32 LayerNorm over the last dim."""
    mu = jnp.mean(x, axis=-1, keepdims=True)
    var = jnp.mean((x - mu) ** 2, axis=-1, keepdims=True)
    return (x - mu) * jax.lax.rsqrt(var + eps) * gamma + beta


def _attention_block(xq_bf, residual_f32, k_heads, v_heads, mask,
                     wq, bq, wo_heads, bo, gamma, beta, num_head, dk, scale):
    """One MHA sublayer (+ residual + LayerNorm) for a query tile.

    xq_bf:     (Sq, D)     bf16 query-side activations
    k/v_heads: (H, Sk, dk) bf16 precomputed key/value heads
    mask:      (Sq, Sk) bool (True = attend) or None (attend everywhere)
    wq: (D, D) bf16, bq: (1, D) f32
    wo_heads: (H, dk, D) bf16 (output-projection rows split per head)
    """
    sq, d_model = xq_bf.shape
    # Fused full-width Q projection; 1/sqrt(dk) folded in before the bf16 cast.
    q_all = ((jnp.dot(xq_bf, wq, preferred_element_type=jnp.float32) + bq)
             * scale).astype(jnp.bfloat16)                         # (Sq, D)
    acc = jnp.zeros((sq, d_model), dtype=jnp.float32)
    neg_big = jnp.float32(-1e9)
    for h in range(num_head):
        q_h = q_all[:, h * dk:(h + 1) * dk]                        # (Sq, dk)
        k_h = k_heads[h]                                           # (Sk, dk)
        v_h = v_heads[h]                                           # (Sk, dk)
        # scores = q_h @ k_h^T (contract last dims; no explicit transpose)
        s = jax.lax.dot_general(q_h, k_h, (((1,), (1,)), ((), ())),
                                preferred_element_type=jnp.float32)
        if mask is not None:
            s = jnp.where(mask, s, neg_big)
        m = jnp.max(s, axis=-1, keepdims=True)
        p = jnp.exp(s - m)
        inv = pl.reciprocal(jnp.sum(p, axis=-1, keepdims=True), approx=True)
        p = (p * inv).astype(jnp.bfloat16)                         # (Sq, Sk)
        ctx = jnp.dot(p, v_h, preferred_element_type=jnp.float32)  # (Sq, dk)
        # concat(ctx_h) @ Wo == sum_h ctx_h @ Wo[h*dk:(h+1)*dk, :]
        acc = acc + jnp.dot(ctx.astype(jnp.bfloat16), wo_heads[h],
                            preferred_element_type=jnp.float32)    # (Sq, D)
    out = acc + bo
    return _layer_norm(residual_f32 + out, gamma, beta)


def _ffn_block(x_f32, w1, b1, w2, b2, gamma, beta):
    xb = x_f32.astype(jnp.bfloat16)
    h = jnp.dot(xb, w1, preferred_element_type=jnp.float32) + b1
    h = jnp.maximum(h, 0.0).astype(jnp.bfloat16)
    o = jnp.dot(h, w2, preferred_element_type=jnp.float32) + b2
    return _layer_norm(x_f32 + o, gamma, beta)


def decoder_layer_pallas(dec_input, enc_output, slf_attn_mask, dec_enc_attn_mask,
                         params, num_head, q_tile=None, causal_self=False,
                         out_dtype=None):
    """Fused decoder layer. Grid = (batch, query tiles)."""
    B, S, D = dec_input.shape
    _, S_enc, _ = enc_output.shape
    assert D % num_head == 0
    dk = D // num_head
    scale = 1.0 / math.sqrt(dk)
    if causal_self:
        assert slf_attn_mask is None, "causal_self generates the mask in-kernel"
    out_dtype = dec_input.dtype if out_dtype is None else out_dtype

    if q_tile is None:
        q_tile = next((c for c in (256, 128, 64, 32) if S % c == 0), S)
    assert S % q_tile == 0
    n_q = S // q_tile

    (wq1, bq1, wk1, bk1, wv1, bv1, wo1, bo1, g1, be1,
     wq2, bq2, wk2, bk2, wv2, bv2, wo2, bo2, g2, be2,
     wf1, bf1, wf2, bf2, g3, be3) = params

    # ---- host-side prolog: K/V projections + layout/dtype prep. Runs once
    # per call (plain XLA), amortized over all (batch, query-tile) grid steps.
    def proj_heads(x, w, b):
        bx, sx, _ = x.shape
        y = jnp.einsum("bsd,de->bse", x.astype(jnp.bfloat16),
                       w.astype(jnp.bfloat16),
                       preferred_element_type=jnp.float32) + b
        return (y.reshape(bx, sx, num_head, dk)
                 .transpose(0, 2, 1, 3).astype(jnp.bfloat16))      # (B,H,S,dk)

    k1h = proj_heads(dec_input, wk1, bk1)       # self-attn K
    v1h = proj_heads(dec_input, wv1, bv1)       # self-attn V
    k2h = proj_heads(enc_output, wk2, bk2)      # cross-attn K
    v2h = proj_heads(enc_output, wv2, bv2)      # cross-attn V

    def split_out(w):   # (D, D) -> (H, dk, D): per-head output-projection rows
        return w.astype(jnp.bfloat16).reshape(num_head, dk, D)

    kernel_weights = [
        wq1.astype(jnp.bfloat16), bq1, split_out(wo1), bo1, g1, be1,
        wq2.astype(jnp.bfloat16), bq2, split_out(wo2), bo2, g2, be2,
        wf1.astype(jnp.bfloat16), bf1, wf2.astype(jnp.bfloat16), bf2, g3, be3,
    ]

    has_smask = (slf_attn_mask is not None) and (not causal_self)
    has_emask = dec_enc_attn_mask is not None

    inputs = [dec_input, k1h, v1h, k2h, v2h]
    in_specs = [
        pl.BlockSpec((1, q_tile, D), lambda b, qi: (b, qi, 0)),           # q tile
        pl.BlockSpec((1, num_head, S, dk), lambda b, qi: (b, 0, 0, 0)),   # K self
        pl.BlockSpec((1, num_head, S, dk), lambda b, qi: (b, 0, 0, 0)),   # V self
        pl.BlockSpec((1, num_head, S_enc, dk), lambda b, qi: (b, 0, 0, 0)),  # K x
        pl.BlockSpec((1, num_head, S_enc, dk), lambda b, qi: (b, 0, 0, 0)),  # V x
    ]
    if has_smask:
        inputs.append((slf_attn_mask != 0).astype(jnp.int8))
        in_specs.append(pl.BlockSpec((1, q_tile, S), lambda b, qi: (b, qi, 0)))
    if has_emask:
        inputs.append((dec_enc_attn_mask != 0).astype(jnp.int8))
        in_specs.append(pl.BlockSpec((1, q_tile, S_enc), lambda b, qi: (b, qi, 0)))

    def const_spec(arr):
        zeros = (0,) * arr.ndim
        return pl.BlockSpec(arr.shape, lambda b, qi, _z=zeros: _z)

    inputs += kernel_weights
    in_specs += [const_spec(p) for p in kernel_weights]

    out_spec = pl.BlockSpec((1, q_tile, D), lambda b, qi: (b, qi, 0))

    def kernel(*refs):
        xq_ref, k1_ref, v1_ref, k2_ref, v2_ref = refs[:5]
        rest = refs[5:]
        i = 0
        smask_ref = emask_ref = None
        if has_smask:
            smask_ref = rest[i]; i += 1
        if has_emask:
            emask_ref = rest[i]; i += 1
        (wq1r, bq1r, wo1r, bo1r, g1r, be1r,
         wq2r, bq2r, wo2r, bo2r, g2r, be2r,
         wf1r, bf1r, wf2r, bf2r, g3r, be3r) = rest[i:i + 18]
        out_ref = rest[i + 18]

        xq = xq_ref[0]                             # (TQ, D)     caller dtype
        res0 = xq.astype(jnp.float32)
        xq_bf = xq.astype(jnp.bfloat16)
        k1 = k1_ref[0]; v1 = v1_ref[0]             # (H, S, dk)     bf16
        k2 = k2_ref[0]; v2 = v2_ref[0]             # (H, S_enc, dk) bf16

        if causal_self:
            # In-kernel causal mask: no O(S^2) mask HBM traffic.
            q0 = pl.program_id(1) * q_tile
            rows = q0 + jax.lax.broadcasted_iota(jnp.int32, (q_tile, S), 0)
            cols = jax.lax.broadcasted_iota(jnp.int32, (q_tile, S), 1)
            smask = cols <= rows
        elif smask_ref is not None:
            smask = smask_ref[0].astype(jnp.int32) != 0     # integer compare
        else:
            smask = None
        emask = (emask_ref[0].astype(jnp.int32) != 0) if emask_ref is not None else None

        # self-attention + residual + LN
        y1 = _attention_block(xq_bf, res0, k1, v1, smask,
                              wq1r[...], bq1r[...], wo1r[...], bo1r[...],
                              g1r[...], be1r[...], num_head, dk, scale)
        # cross-attention + residual + LN
        y2 = _attention_block(y1.astype(jnp.bfloat16), y1, k2, v2, emask,
                              wq2r[...], bq2r[...], wo2r[...], bo2r[...],
                              g2r[...], be2r[...], num_head, dk, scale)
        # position-wise feed-forward + residual + LN
        y3 = _ffn_block(y2, wf1r[...], bf1r[...], wf2r[...], bf2r[...],
                        g3r[...], be3r[...])
        out_ref[0] = y3.astype(out_ref.dtype)

    # Raise the scoped-VMEM limit (defaults: 16 MiB v5e / 32 MiB v6e,v7x),
    # scaled to the chip so the weight-resident layout has headroom.
    vmem_limit = 64 * 1024 * 1024
    try:
        cap = int(pltpu.get_tpu_info().vmem_capacity_bytes)
        vmem_limit = min(cap * 3 // 4, 100 * 1024 * 1024)
    except Exception:
        pass

    return pl.pallas_call(
        kernel,
        out_shape=jax.ShapeDtypeStruct((B, S, D), out_dtype),
        grid=(B, n_q),
        in_specs=in_specs,
        out_specs=out_spec,
        compiler_params=pltpu.CompilerParams(
            # Split cores over batch (K/V slab loaded once per core); the
            # query-tile axis revisits the same K/V blocks, keep it arbitrary.
            dimension_semantics=("parallel", "arbitrary"),
            vmem_limit_bytes=vmem_limit),
    )(*inputs)


def make_params(key, model_dim, ff_dim):
    """Deterministic synthetic parameters.

    Weight matrices are [in_dim, out_dim] in bf16 (MXU dtype); biases and
    LayerNorm affine params stay f32.
    """
    ks = iter(jax.random.split(key, 32))
    wscale, bscale = 0.05, 0.02

    def w(shape):
        return (wscale * jax.random.normal(next(ks), shape,
                                           dtype=jnp.float32)).astype(jnp.bfloat16)

    def b(shape):
        return bscale * jax.random.normal(next(ks), shape, dtype=jnp.float32)

    params = []
    # two attention sublayers: Wq,bq, Wk,bk, Wv,bv, Wo,bo, ln_gamma, ln_beta
    for _ in range(2):
        params += [
            w((model_dim, model_dim)), b((1, model_dim)),
            w((model_dim, model_dim)), b((1, model_dim)),
            w((model_dim, model_dim)), b((1, model_dim)),
            w((model_dim, model_dim)), b((1, model_dim)),
            1.0 + b((1, model_dim)), b((1, model_dim)),
        ]
    # feed-forward: W1,b1, W2,b2, ln_gamma, ln_beta
    params += [
        w((model_dim, ff_dim)), b((1, ff_dim)),
        w((ff_dim, model_dim)), b((1, model_dim)),
        1.0 + b((1, model_dim)), b((1, model_dim)),
    ]
    return tuple(params)


def reference(dec, enc, smask, emask, params, num_head):
    """Pure-JAX f32 reference (same math, no Pallas)."""
    p = [x.astype(jnp.float32) for x in params]
    (wq1, bq1, wk1, bk1, wv1, bv1, wo1, bo1, g1, be1,
     wq2, bq2, wk2, bk2, wv2, bv2, wo2, bo2, g2, be2,
     wf1, bf1, wf2, bf2, g3, be3) = p
    dec = dec.astype(jnp.float32)
    enc = enc.astype(jnp.float32)

    def mha(q_in, kv_in, mask, wq, bq, wk, bk, wv, bv, wo, bo, g, be):
        B, Sq, Dm = q_in.shape
        Sk = kv_in.shape[1]
        dkk = Dm // num_head
        q = (q_in @ wq + bq).reshape(B, Sq, num_head, dkk)
        k = (kv_in @ wk + bk).reshape(B, Sk, num_head, dkk)
        v = (kv_in @ wv + bv).reshape(B, Sk, num_head, dkk)
        s = jnp.einsum("bqhd,bkhd->bhqk", q, k) / math.sqrt(dkk)
        if mask is not None:
            s = jnp.where(mask[:, None, :, :] > 0, s, -1e9)
        pr = jax.nn.softmax(s, axis=-1)
        ctx = jnp.einsum("bhqk,bkhd->bqhd", pr, v).reshape(B, Sq, Dm)
        out = ctx @ wo + bo
        return _layer_norm(q_in + out, g, be)

    x = mha(dec, dec, smask, wq1, bq1, wk1, bk1, wv1, bv1, wo1, bo1, g1, be1)
    x = mha(x, enc, emask, wq2, bq2, wk2, bk2, wv2, bv2, wo2, bo2, g2, be2)
    h = jnp.maximum(x @ wf1 + bf1, 0.0)
    return _layer_norm(x + (h @ wf2 + bf2), g3, be3)


if __name__ == "__main__":
    B, S, D, H, F = 2, 16, 128, 4, 256

    key = jax.random.PRNGKey(0)
    k_dec, k_enc, k_par = jax.random.split(key, 3)

    dec_input = jax.random.normal(k_dec, (B, S, D), jnp.float32).astype(jnp.bfloat16)
    enc_output = jax.random.normal(k_enc, (B, S, D), jnp.float32).astype(jnp.bfloat16)
    params = make_params(k_par, D, F)

    # causal self-attention; full visibility for decoder-encoder attention
    causal = jnp.tril(jnp.ones((S, S), jnp.int8))
    slf_mask = jnp.broadcast_to(causal, (B, S, S))
    enc_mask = jnp.ones((B, S, S), jnp.int8)

    ref = reference(dec_input, enc_output, slf_mask, None, params, H)

    # Fast path: causal mask generated in-kernel, cross-attention unmasked
    # (no O(S^2) mask traffic).
    out1 = decoder_layer_pallas(dec_input, enc_output, None, None, params,
                                num_head=H, causal_self=True)
    out1 = jax.block_until_ready(out1)
    assert out1.shape == (B, S, D)
    assert jnp.allclose(out1.astype(jnp.float32), ref, rtol=5e-2, atol=5e-2), \
        "causal-path mismatch vs reference"

    # General path: explicit int8 masks (same semantics here).
    out2 = decoder_layer_pallas(dec_input, enc_output, slf_mask, enc_mask,
                                params, num_head=H)
    out2 = jax.block_until_ready(out2)
    assert jnp.allclose(out2.astype(jnp.float32), ref, rtol=5e-2, atol=5e-2), \
        "explicit-mask-path mismatch vs reference"

    print("KERNEL_OK")
</pallas_src>

<mosaic_0001>
module attributes {stable_mosaic.version = 11 : i64} {
  func.func @kernel(%arg0: i32, %arg1: i32, %arg2: memref<1x16x128xbf16, #tpu.memory_space<vmem>>, %arg3: memref<1x4x16x32xbf16, #tpu.memory_space<vmem>>, %arg4: memref<1x4x16x32xbf16, #tpu.memory_space<vmem>>, %arg5: memref<1x4x16x32xbf16, #tpu.memory_space<vmem>>, %arg6: memref<1x4x16x32xbf16, #tpu.memory_space<vmem>>, %arg7: memref<128x128xbf16, #tpu.memory_space<vmem>>, %arg8: memref<1x128xf32, #tpu.memory_space<vmem>>, %arg9: memref<4x32x128xbf16, #tpu.memory_space<vmem>>, %arg10: memref<1x128xf32, #tpu.memory_space<vmem>>, %arg11: memref<1x128xf32, #tpu.memory_space<vmem>>, %arg12: memref<1x128xf32, #tpu.memory_space<vmem>>, %arg13: memref<128x128xbf16, #tpu.memory_space<vmem>>, %arg14: memref<1x128xf32, #tpu.memory_space<vmem>>, %arg15: memref<4x32x128xbf16, #tpu.memory_space<vmem>>, %arg16: memref<1x128xf32, #tpu.memory_space<vmem>>, %arg17: memref<1x128xf32, #tpu.memory_space<vmem>>, %arg18: memref<1x128xf32, #tpu.memory_space<vmem>>, %arg19: memref<128x256xbf16, #tpu.memory_space<vmem>>, %arg20: memref<1x256xf32, #tpu.memory_space<vmem>>, %arg21: memref<256x128xbf16, #tpu.memory_space<vmem>>, %arg22: memref<1x128xf32, #tpu.memory_space<vmem>>, %arg23: memref<1x128xf32, #tpu.memory_space<vmem>>, %arg24: memref<1x128xf32, #tpu.memory_space<vmem>>, %arg25: memref<1x16x128xbf16, #tpu.memory_space<vmem>>) attributes {dimension_semantics = [#tpu.dimension_semantics<parallel>, #tpu.dimension_semantics<arbitrary>], iteration_bounds = array<i64: 2, 1>, scalar_prefetch = 0 : i64, scratch_operands = 0 : i64, tpu.core_type = #tpu.core_type<tc>, window_params = [{transform_indices = @transform_0, window_bounds = array<i64: 1, 16, 128>}, {transform_indices = @transform_1, window_bounds = array<i64: 1, 4, 16, 32>}, {transform_indices = @transform_2, window_bounds = array<i64: 1, 4, 16, 32>}, {transform_indices = @transform_3, window_bounds = array<i64: 1, 4, 16, 32>}, {transform_indices = @transform_4, window_bounds = array<i64: 1, 4, 16, 32>}, {pipeline_mode = #tpu.pipeline_mode<synchronous>, transform_indices = @transform_5, window_bounds = array<i64: 128, 128>}, {pipeline_mode = #tpu.pipeline_mode<synchronous>, transform_indices = @transform_6, window_bounds = array<i64: 1, 128>}, {pipeline_mode = #tpu.pipeline_mode<synchronous>, transform_indices = @transform_7, window_bounds = array<i64: 4, 32, 128>}, {pipeline_mode = #tpu.pipeline_mode<synchronous>, transform_indices = @transform_8, window_bounds = array<i64: 1, 128>}, {pipeline_mode = #tpu.pipeline_mode<synchronous>, transform_indices = @transform_9, window_bounds = array<i64: 1, 128>}, {pipeline_mode = #tpu.pipeline_mode<synchronous>, transform_indices = @transform_10, window_bounds = array<i64: 1, 128>}, {pipeline_mode = #tpu.pipeline_mode<synchronous>, transform_indices = @transform_11, window_bounds = array<i64: 128, 128>}, {pipeline_mode = #tpu.pipeline_mode<synchronous>, transform_indices = @transform_12, window_bounds = array<i64: 1, 128>}, {pipeline_mode = #tpu.pipeline_mode<synchronous>, transform_indices = @transform_13, window_bounds = array<i64: 4, 32, 128>}, {pipeline_mode = #tpu.pipeline_mode<synchronous>, transform_indices = @transform_14, window_bounds = array<i64: 1, 128>}, {pipeline_mode = #tpu.pipeline_mode<synchronous>, transform_indices = @transform_15, window_bounds = array<i64: 1, 128>}, {pipeline_mode = #tpu.pipeline_mode<synchronous>, transform_indices = @transform_16, window_bounds = array<i64: 1, 128>}, {pipeline_mode = #tpu.pipeline_mode<synchronous>, transform_indices = @transform_17, window_bounds = array<i64: 128, 256>}, {pipeline_mode = #tpu.pipeline_mode<synchronous>, transform_indices = @transform_18, window_bounds = array<i64: 1, 256>}, {pipeline_mode = #tpu.pipeline_mode<synchronous>, transform_indices = @transform_19, window_bounds = array<i64: 256, 128>}, {pipeline_mode = #tpu.pipeline_mode<synchronous>, transform_indices = @transform_20, window_bounds = array<i64: 1, 128>}, {pipeline_mode = #tpu.pipeline_mode<synchronous>, transform_indices = @transform_21, window_bounds = array<i64: 1, 128>}, {pipeline_mode = #tpu.pipeline_mode<synchronous>, transform_indices = @transform_22, window_bounds = array<i64: 1, 128>}, {transform_indices = @transform_23, window_bounds = array<i64: 1, 16, 128>}]} {
    %c0 = arith.constant 0 : index
    %c0_0 = arith.constant 0 : index
    %c0_1 = arith.constant 0 : index
    %0 = vector.load %arg2[%c0, %c0_0, %c0_1] : memref<1x16x128xbf16, #tpu.memory_space<vmem>>, vector<1x16x128xbf16>
    %1 = vector.shape_cast %0 : vector<1x16x128xbf16> to vector<16x128xbf16>
    %2 = arith.extf %1 : vector<16x128xbf16> to vector<16x128xf32>
    %c0_2 = arith.constant 0 : index
    %c0_3 = arith.constant 0 : index
    %c0_4 = arith.constant 0 : index
    %c0_5 = arith.constant 0 : index
    %3 = vector.load %arg3[%c0_2, %c0_3, %c0_4, %c0_5] : memref<1x4x16x32xbf16, #tpu.memory_space<vmem>>, vector<1x4x16x32xbf16>
    %4 = vector.shape_cast %3 : vector<1x4x16x32xbf16> to vector<4x16x32xbf16>
    %c0_6 = arith.constant 0 : index
    %c0_7 = arith.constant 0 : index
    %c0_8 = arith.constant 0 : index
    %c0_9 = arith.constant 0 : index
    %5 = vector.load %arg4[%c0_6, %c0_7, %c0_8, %c0_9] : memref<1x4x16x32xbf16, #tpu.memory_space<vmem>>, vector<1x4x16x32xbf16>
    %6 = vector.shape_cast %5 : vector<1x4x16x32xbf16> to vector<4x16x32xbf16>
    %c0_10 = arith.constant 0 : index
    %c0_11 = arith.constant 0 : index
    %c0_12 = arith.constant 0 : index
    %c0_13 = arith.constant 0 : index
    %7 = vector.load %arg5[%c0_10, %c0_11, %c0_12, %c0_13] : memref<1x4x16x32xbf16, #tpu.memory_space<vmem>>, vector<1x4x16x32xbf16>
    %8 = vector.shape_cast %7 : vector<1x4x16x32xbf16> to vector<4x16x32xbf16>
    %c0_14 = arith.constant 0 : index
    %c0_15 = arith.constant 0 : index
    %c0_16 = arith.constant 0 : index
    %c0_17 = arith.constant 0 : index
    %9 = vector.load %arg6[%c0_14, %c0_15, %c0_16, %c0_17] : memref<1x4x16x32xbf16, #tpu.memory_space<vmem>>, vector<1x4x16x32xbf16>
    %10 = vector.shape_cast %9 : vector<1x4x16x32xbf16> to vector<4x16x32xbf16>
    %c16_i32 = arith.constant 16 : i32
    %11 = arith.muli %arg1, %c16_i32 : i32
    %12 = tpu.iota {dimensions = array<i32: 0>} : vector<16x16xi32>
    %13 = vector.broadcast %11 : i32 to vector<16x16xi32>
    %14 = arith.addi %13, %12 : vector<16x16xi32>
    %15 = tpu.iota {dimensions = array<i32: 1>} : vector<16x16xi32>
    %16 = arith.cmpi sle, %15, %14 : vector<16x16xi32>
    %c0_18 = arith.constant 0 : index
    %c0_19 = arith.constant 0 : index
    %17 = vector.load %arg7[%c0_18, %c0_19] : memref<128x128xbf16, #tpu.memory_space<vmem>>, vector<128x128xbf16>
    %c0_20 = arith.constant 0 : index
    %c0_21 = arith.constant 0 : index
    %18 = vector.load %arg8[%c0_20, %c0_21] : memref<1x128xf32, #tpu.memory_space<vmem>>, vector<1x128xf32>
    %c0_22 = arith.constant 0 : index
    %c0_23 = arith.constant 0 : index
    %c0_24 = arith.constant 0 : index
    %19 = vector.load %arg9[%c0_22, %c0_23, %c0_24] : memref<4x32x128xbf16, #tpu.memory_space<vmem>>, vector<4x32x128xbf16>
    %c0_25 = arith.constant 0 : index
    %c0_26 = arith.constant 0 : index
    %20 = vector.load %arg10[%c0_25, %c0_26] : memref<1x128xf32, #tpu.memory_space<vmem>>, vector<1x128xf32>
    %c0_27 = arith.constant 0 : index
    %c0_28 = arith.constant 0 : index
    %21 = vector.load %arg11[%c0_27, %c0_28] : memref<1x128xf32, #tpu.memory_space<vmem>>, vector<1x128xf32>
    %c0_29 = arith.constant 0 : index
    %c0_30 = arith.constant 0 : index
    %22 = vector.load %arg12[%c0_29, %c0_30] : memref<1x128xf32, #tpu.memory_space<vmem>>, vector<1x128xf32>
    %cst = arith.constant dense<0.000000e+00> : vector<16x128xf32>
    %23 = tpu.matmul %1, %17, %cst {dimension_numbers = #tpu.dot_dimension_numbers<[1], [0], [0], [1], [0, 0, 1, 1], [], []>} : vector<16x128xbf16>, vector<128x128xbf16>, vector<16x128xf32> -> vector<16x128xf32>
    %24 = vector.broadcast %18 : vector<1x128xf32> to vector<16x128xf32>
    %25 = arith.addf %23, %24 : vector<16x128xf32>
    %cst_31 = arith.constant 0.176776692 : f32
    %26 = vector.broadcast %cst_31 : f32 to vector<16x128xf32>
    %27 = arith.mulf %25, %26 : vector<16x128xf32>
    %28 = arith.truncf %27 : vector<16x128xf32> to vector<16x128xbf16>
    %cst_32 = arith.constant 0.000000e+00 : f32
    %29 = vector.broadcast %cst_32 : f32 to vector<16x128xf32>
    %30 = vector.extract_strided_slice %28 {offsets = [0, 0], sizes = [16, 32], strides = [1, 1]} : vector<16x128xbf16> to vector<16x32xbf16>
    %31 = vector.extract_strided_slice %4 {offsets = [0, 0, 0], sizes = [1, 16, 32], strides = [1, 1, 1]} : vector<4x16x32xbf16> to vector<1x16x32xbf16>
    %32 = vector.shape_cast %31 : vector<1x16x32xbf16> to vector<16x32xbf16>
    %33 = vector.extract_strided_slice %6 {offsets = [0, 0, 0], sizes = [1, 16, 32], strides = [1, 1, 1]} : vector<4x16x32xbf16> to vector<1x16x32xbf16>
    %34 = vector.shape_cast %33 : vector<1x16x32xbf16> to vector<16x32xbf16>
    %cst_33 = arith.constant dense<0.000000e+00> : vector<16x16xf32>
    %35 = tpu.matmul %30, %32, %cst_33 {dimension_numbers = #tpu.dot_dimension_numbers<[1], [1], [0], [0], [0, 0, 1, 0], [], []>} : vector<16x32xbf16>, vector<16x32xbf16>, vector<16x16xf32> -> vector<16x16xf32>
    %cst_34 = arith.constant -1.000000e+09 : f32
    %36 = vector.broadcast %cst_34 : f32 to vector<16x16xf32>
    %37 = arith.select %16, %35, %36 : vector<16x16xi1>, vector<16x16xf32>
    %cst_35 = arith.constant dense<0xFF800000> : vector<16xf32>
    %38 = vector.multi_reduction <maximumf>, %37, %cst_35 [1] : vector<16x16xf32> to vector<16xf32>
    %39 = vector.shape_cast %38 : vector<16xf32> to vector<16x1xf32>
    %40 = vector.broadcast %39 : vector<16x1xf32> to vector<16x16xf32>
    %41 = arith.subf %37, %40 : vector<16x16xf32>
    %42 = math.exp %41 : vector<16x16xf32>
    %cst_36 = arith.constant dense<0.000000e+00> : vector<16xf32>
    %43 = vector.multi_reduction <add>, %42, %cst_36 [1] : vector<16x16xf32> to vector<16xf32>
    %44 = vector.shape_cast %43 : vector<16xf32> to vector<16x1xf32>
    %45 = tpu.reciprocal %44 {approx = true} : vector<16x1xf32> -> vector<16x1xf32>
    %46 = vector.broadcast %45 : vector<16x1xf32> to vector<16x16xf32>
    %47 = arith.mulf %42, %46 : vector<16x16xf32>
    %48 = arith.truncf %47 : vector<16x16xf32> to vector<16x16xbf16>
    %cst_37 = arith.constant dense<0.000000e+00> : vector<16x32xf32>
    %49 = tpu.matmul %48, %34, %cst_37 {dimension_numbers = #tpu.dot_dimension_numbers<[1], [0], [0], [1], [0, 0, 1, 1], [], []>} : vector<16x16xbf16>, vector<16x32xbf16>, vector<16x32xf32> -> vector<16x32xf32>
    %50 = arith.truncf %49 : vector<16x32xf32> to vector<16x32xbf16>
    %51 = vector.extract_strided_slice %19 {offsets = [0, 0, 0], sizes = [1, 32, 128], strides = [1, 1, 1]} : vector<4x32x128xbf16> to vector<1x32x128xbf16>
    %52 = vector.shape_cast %51 : vector<1x32x128xbf16> to vector<32x128xbf16>
    %cst_38 = arith.constant dense<0.000000e+00> : vector<16x128xf32>
    %53 = tpu.matmul %50, %52, %cst_38 {dimension_numbers = #tpu.dot_dimension_numbers<[1], [0], [0], [1], [0, 0, 1, 1], [], []>} : vector<16x32xbf16>, vector<32x128xbf16>, vector<16x128xf32> -> vector<16x128xf32>
    %54 = arith.addf %29, %53 : vector<16x128xf32>
    %55 = vector.extract_strided_slice %28 {offsets = [0, 32], sizes = [16, 32], strides = [1, 1]} : vector<16x128xbf16> to vector<16x32xbf16>
    %56 = vector.extract_strided_slice %4 {offsets = [1, 0, 0], sizes = [1, 16, 32], strides = [1, 1, 1]} : vector<4x16x32xbf16> to vector<1x16x32xbf16>
    %57 = vector.shape_cast %56 : vector<1x16x32xbf16> to vector<16x32xbf16>
    %58 = vector.extract_strided_slice %6 {offsets = [1, 0, 0], sizes = [1, 16, 32], strides = [1, 1, 1]} : vector<4x16x32xbf16> to vector<1x16x32xbf16>
    %59 = vector.shape_cast %58 : vector<1x16x32xbf16> to vector<16x32xbf16>
    %cst_39 = arith.constant dense<0.000000e+00> : vector<16x16xf32>
    %60 = tpu.matmul %55, %57, %cst_39 {dimension_numbers = #tpu.dot_dimension_numbers<[1], [1], [0], [0], [0, 0, 1, 0], [], []>} : vector<16x32xbf16>, vector<16x32xbf16>, vector<16x16xf32> -> vector<16x16xf32>
    %cst_40 = arith.constant -1.000000e+09 : f32
    %61 = vector.broadcast %cst_40 : f32 to vector<16x16xf32>
    %62 = arith.select %16, %60, %61 : vector<16x16xi1>, vector<16x16xf32>
    %cst_41 = arith.constant dense<0xFF800000> : vector<16xf32>
    %63 = vector.multi_reduction <maximumf>, %62, %cst_41 [1] : vector<16x16xf32> to vector<16xf32>
    %64 = vector.shape_cast %63 : vector<16xf32> to vector<16x1xf32>
    %65 = vector.broadcast %64 : vector<16x1xf32> to vector<16x16xf32>
    %66 = arith.subf %62, %65 : vector<16x16xf32>
    %67 = math.exp %66 : vector<16x16xf32>
    %cst_42 = arith.constant dense<0.000000e+00> : vector<16xf32>
    %68 = vector.multi_reduction <add>, %67, %cst_42 [1] : vector<16x16xf32> to vector<16xf32>
    %69 = vector.shape_cast %68 : vector<16xf32> to vector<16x1xf32>
    %70 = tpu.reciprocal %69 {approx = true} : vector<16x1xf32> -> vector<16x1xf32>
    %71 = vector.broadcast %70 : vector<16x1xf32> to vector<16x16xf32>
    %72 = arith.mulf %67, %71 : vector<16x16xf32>
    %73 = arith.truncf %72 : vector<16x16xf32> to vector<16x16xbf16>
    %cst_43 = arith.constant dense<0.000000e+00> : vector<16x32xf32>
    %74 = tpu.matmul %73, %59, %cst_43 {dimension_numbers = #tpu.dot_dimension_numbers<[1], [0], [0], [1], [0, 0, 1, 1], [], []>} : vector<16x16xbf16>, vector<16x32xbf16>, vector<16x32xf32> -> vector<16x32xf32>
    %75 = arith.truncf %74 : vector<16x32xf32> to vector<16x32xbf16>
    %76 = vector.extract_strided_slice %19 {offsets = [1, 0, 0], sizes = [1, 32, 128], strides = [1, 1, 1]} : vector<4x32x128xbf16> to vector<1x32x128xbf16>
    %77 = vector.shape_cast %76 : vector<1x32x128xbf16> to vector<32x128xbf16>
    %cst_44 = arith.constant dense<0.000000e+00> : vector<16x128xf32>
    %78 = tpu.matmul %75, %77, %cst_44 {dimension_numbers = #tpu.dot_dimension_numbers<[1], [0], [0], [1], [0, 0, 1, 1], [], []>} : vector<16x32xbf16>, vector<32x128xbf16>, vector<16x128xf32> -> vector<16x128xf32>
    %79 = arith.addf %54, %78 : vector<16x128xf32>
    %80 = vector.extract_strided_slice %28 {offsets = [0, 64], sizes = [16, 32], strides = [1, 1]} : vector<16x128xbf16> to vector<16x32xbf16>
    %81 = vector.extract_strided_slice %4 {offsets = [2, 0, 0], sizes = [1, 16, 32], strides = [1, 1, 1]} : vector<4x16x32xbf16> to vector<1x16x32xbf16>
    %82 = vector.shape_cast %81 : vector<1x16x32xbf16> to vector<16x32xbf16>
    %83 = vector.extract_strided_slice %6 {offsets = [2, 0, 0], sizes = [1, 16, 32], strides = [1, 1, 1]} : vector<4x16x32xbf16> to vector<1x16x32xbf16>
    %84 = vector.shape_cast %83 : vector<1x16x32xbf16> to vector<16x32xbf16>
    %cst_45 = arith.constant dense<0.000000e+00> : vector<16x16xf32>
    %85 = tpu.matmul %80, %82, %cst_45 {dimension_numbers = #tpu.dot_dimension_numbers<[1], [1], [0], [0], [0, 0, 1, 0], [], []>} : vector<16x32xbf16>, vector<16x32xbf16>, vector<16x16xf32> -> vector<16x16xf32>
    %cst_46 = arith.constant -1.000000e+09 : f32
    %86 = vector.broadcast %cst_46 : f32 to vector<16x16xf32>
    %87 = arith.select %16, %85, %86 : vector<16x16xi1>, vector<16x16xf32>
    %cst_47 = arith.constant dense<0xFF800000> : vector<16xf32>
    %88 = vector.multi_reduction <maximumf>, %87, %cst_47 [1] : vector<16x16xf32> to vector<16xf32>
    %89 = vector.shape_cast %88 : vector<16xf32> to vector<16x1xf32>
    %90 = vector.broadcast %89 : vector<16x1xf32> to vector<16x16xf32>
    %91 = arith.subf %87, %90 : vector<16x16xf32>
    %92 = math.exp %91 : vector<16x16xf32>
    %cst_48 = arith.constant dense<0.000000e+00> : vector<16xf32>
    %93 = vector.multi_reduction <add>, %92, %cst_48 [1] : vector<16x16xf32> to vector<16xf32>
    %94 = vector.shape_cast %93 : vector<16xf32> to vector<16x1xf32>
    %95 = tpu.reciprocal %94 {approx = true} : vector<16x1xf32> -> vector<16x1xf32>
    %96 = vector.broadcast %95 : vector<16x1xf32> to vector<16x16xf32>
    %97 = arith.mulf %92, %96 : vector<16x16xf32>
    %98 = arith.truncf %97 : vector<16x16xf32> to vector<16x16xbf16>
    %cst_49 = arith.constant dense<0.000000e+00> : vector<16x32xf32>
    %99 = tpu.matmul %98, %84, %cst_49 {dimension_numbers = #tpu.dot_dimension_numbers<[1], [0], [0], [1], [0, 0, 1, 1], [], []>} : vector<16x16xbf16>, vector<16x32xbf16>, vector<16x32xf32> -> vector<16x32xf32>
    %100 = arith.truncf %99 : vector<16x32xf32> to vector<16x32xbf16>
    %101 = vector.extract_strided_slice %19 {offsets = [2, 0, 0], sizes = [1, 32, 128], strides = [1, 1, 1]} : vector<4x32x128xbf16> to vector<1x32x128xbf16>
    %102 = vector.shape_cast %101 : vector<1x32x128xbf16> to vector<32x128xbf16>
    %cst_50 = arith.constant dense<0.000000e+00> : vector<16x128xf32>
    %103 = tpu.matmul %100, %102, %cst_50 {dimension_numbers = #tpu.dot_dimension_numbers<[1], [0], [0], [1], [0, 0, 1, 1], [], []>} : vector<16x32xbf16>, vector<32x128xbf16>, vector<16x128xf32> -> vector<16x128xf32>
    %104 = arith.addf %79, %103 : vector<16x128xf32>
    %105 = vector.extract_strided_slice %28 {offsets = [0, 96], sizes = [16, 32], strides = [1, 1]} : vector<16x128xbf16> to vector<16x32xbf16>
    %106 = vector.extract_strided_slice %4 {offsets = [3, 0, 0], sizes = [1, 16, 32], strides = [1, 1, 1]} : vector<4x16x32xbf16> to vector<1x16x32xbf16>
    %107 = vector.shape_cast %106 : vector<1x16x32xbf16> to vector<16x32xbf16>
    %108 = vector.extract_strided_slice %6 {offsets = [3, 0, 0], sizes = [1, 16, 32], strides = [1, 1, 1]} : vector<4x16x32xbf16> to vector<1x16x32xbf16>
    %109 = vector.shape_cast %108 : vector<1x16x32xbf16> to vector<16x32xbf16>
    %cst_51 = arith.constant dense<0.000000e+00> : vector<16x16xf32>
    %110 = tpu.matmul %105, %107, %cst_51 {dimension_numbers = #tpu.dot_dimension_numbers<[1], [1], [0], [0], [0, 0, 1, 0], [], []>} : vector<16x32xbf16>, vector<16x32xbf16>, vector<16x16xf32> -> vector<16x16xf32>
    %cst_52 = arith.constant -1.000000e+09 : f32
    %111 = vector.broadcast %cst_52 : f32 to vector<16x16xf32>
    %112 = arith.select %16, %110, %111 : vector<16x16xi1>, vector<16x16xf32>
    %cst_53 = arith.constant dense<0xFF800000> : vector<16xf32>
    %113 = vector.multi_reduction <maximumf>, %112, %cst_53 [1] : vector<16x16xf32> to vector<16xf32>
    %114 = vector.shape_cast %113 : vector<16xf32> to vector<16x1xf32>
    %115 = vector.broadcast %114 : vector<16x1xf32> to vector<16x16xf32>
    %116 = arith.subf %112, %115 : vector<16x16xf32>
    %117 = math.exp %116 : vector<16x16xf32>
    %cst_54 = arith.constant dense<0.000000e+00> : vector<16xf32>
    %118 = vector.multi_reduction <add>, %117, %cst_54 [1] : vector<16x16xf32> to vector<16xf32>
    %119 = vector.shape_cast %118 : vector<16xf32> to vector<16x1xf32>
    %120 = tpu.reciprocal %119 {approx = true} : vector<16x1xf32> -> vector<16x1xf32>
    %121 = vector.broadcast %120 : vector<16x1xf32> to vector<16x16xf32>
    %122 = arith.mulf %117, %121 : vector<16x16xf32>
    %123 = arith.truncf %122 : vector<16x16xf32> to vector<16x16xbf16>
    %cst_55 = arith.constant dense<0.000000e+00> : vector<16x32xf32>
    %124 = tpu.matmul %123, %109, %cst_55 {dimension_numbers = #tpu.dot_dimension_numbers<[1], [0], [0], [1], [0, 0, 1, 1], [], []>} : vector<16x16xbf16>, vector<16x32xbf16>, vector<16x32xf32> -> vector<16x32xf32>
    %125 = arith.truncf %124 : vector<16x32xf32> to vector<16x32xbf16>
    %126 = vector.extract_strided_slice %19 {offsets = [3, 0, 0], sizes = [1, 32, 128], strides = [1, 1, 1]} : vector<4x32x128xbf16> to vector<1x32x128xbf16>
    %127 = vector.shape_cast %126 : vector<1x32x128xbf16> to vector<32x128xbf16>
    %cst_56 = arith.constant dense<0.000000e+00> : vector<16x128xf32>
    %128 = tpu.matmul %125, %127, %cst_56 {dimension_numbers = #tpu.dot_dimension_numbers<[1], [0], [0], [1], [0, 0, 1, 1], [], []>} : vector<16x32xbf16>, vector<32x128xbf16>, vector<16x128xf32> -> vector<16x128xf32>
    %129 = arith.addf %104, %128 : vector<16x128xf32>
    %130 = vector.broadcast %20 : vector<1x128xf32> to vector<16x128xf32>
    %131 = arith.addf %129, %130 : vector<16x128xf32>
    %132 = arith.addf %2, %131 : vector<16x128xf32>
    %cst_57 = arith.constant dense<0.000000e+00> : vector<16xf32>
    %133 = vector.multi_reduction <add>, %132, %cst_57 [1] : vector<16x128xf32> to vector<16xf32>
    %134 = vector.shape_cast %133 : vector<16xf32> to vector<16x1xf32>
    %cst_58 = arith.constant 1.280000e+02 : f32
    %135 = vector.broadcast %cst_58 : f32 to vector<16x1xf32>
    %136 = arith.divf %134, %135 : vector<16x1xf32>
    %137 = vector.broadcast %136 : vector<16x1xf32> to vector<16x128xf32>
    %138 = arith.subf %132, %137 : vector<16x128xf32>
    %139 = arith.mulf %138, %138 : vector<16x128xf32>
    %cst_59 = arith.constant dense<0.000000e+00> : vector<16xf32>
    %140 = vector.multi_reduction <add>, %139, %cst_59 [1] : vector<16x128xf32> to vector<16xf32>
    %141 = vector.shape_cast %140 : vector<16xf32> to vector<16x1xf32>
    %cst_60 = arith.constant 1.280000e+02 : f32
    %142 = vector.broadcast %cst_60 : f32 to vector<16x1xf32>
    %143 = arith.divf %141, %142 : vector<16x1xf32>
    %144 = vector.broadcast %136 : vector<16x1xf32> to vector<16x128xf32>
    %145 = arith.subf %132, %144 : vector<16x128xf32>
    %cst_61 = arith.constant 9.99999974E-6 : f32
    %146 = vector.broadcast %cst_61 : f32 to vector<16x1xf32>
    %147 = arith.addf %143, %146 : vector<16x1xf32>
    %148 = math.rsqrt %147 : vector<16x1xf32>
    %149 = vector.broadcast %148 : vector<16x1xf32> to vector<16x128xf32>
    %150 = arith.mulf %145, %149 : vector<16x128xf32>
    %151 = vector.broadcast %21 : vector<1x128xf32> to vector<16x128xf32>
    %152 = arith.mulf %150, %151 : vector<16x128xf32>
    %153 = vector.broadcast %22 : vector<1x128xf32> to vector<16x128xf32>
    %154 = arith.addf %152, %153 : vector<16x128xf32>
    %155 = arith.truncf %154 : vector<16x128xf32> to vector<16x128xbf16>
    %c0_62 = arith.constant 0 : index
    %c0_63 = arith.constant 0 : index
    %156 = vector.load %arg13[%c0_62, %c0_63] : memref<128x128xbf16, #tpu.memory_space<vmem>>, vector<128x128xbf16>
    %c0_64 = arith.constant 0 : index
    %c0_65 = arith.constant 0 : index
    %157 = vector.load %arg14[%c0_64, %c0_65] : memref<1x128xf32, #tpu.memory_space<vmem>>, vector<1x128xf32>
    %c0_66 = arith.constant 0 : index
    %c0_67 = arith.constant 0 : index
    %c0_68 = arith.constant 0 : index
    %158 = vector.load %arg15[%c0_66, %c0_67, %c0_68] : memref<4x32x128xbf16, #tpu.memory_space<vmem>>, vector<4x32x128xbf16>
    %c0_69 = arith.constant 0 : index
    %c0_70 = arith.constant 0 : index
    %159 = vector.load %arg16[%c0_69, %c0_70] : memref<1x128xf32, #tpu.memory_space<vmem>>, vector<1x128xf32>
    %c0_71 = arith.constant 0 : index
    %c0_72 = arith.constant 0 : index
    %160 = vector.load %arg17[%c0_71, %c0_72] : memref<1x128xf32, #tpu.memory_space<vmem>>, vector<1x128xf32>
    %c0_73 = arith.constant 0 : index
    %c0_74 = arith.constant 0 : index
    %161 = vector.load %arg18[%c0_73, %c0_74] : memref<1x128xf32, #tpu.memory_space<vmem>>, vector<1x128xf32>
    %cst_75 = arith.constant dense<0.000000e+00> : vector<16x128xf32>
    %162 = tpu.matmul %155, %156, %cst_75 {dimension_numbers = #tpu.dot_dimension_numbers<[1], [0], [0], [1], [0, 0, 1, 1], [], []>} : vector<16x128xbf16>, vector<128x128xbf16>, vector<16x128xf32> -> vector<16x128xf32>
    %163 = vector.broadcast %157 : vector<1x128xf32> to vector<16x128xf32>
    %164 = arith.addf %162, %163 : vector<16x128xf32>
    %cst_76 = arith.constant 0.176776692 : f32
    %165 = vector.broadcast %cst_76 : f32 to vector<16x128xf32>
    %166 = arith.mulf %164, %165 : vector<16x128xf32>
    %167 = arith.truncf %166 : vector<16x128xf32> to vector<16x128xbf16>
    %cst_77 = arith.constant 0.000000e+00 : f32
    %168 = vector.broadcast %cst_77 : f32 to vector<16x128xf32>
    %169 = vector.extract_strided_slice %167 {offsets = [0, 0], sizes = [16, 32], strides = [1, 1]} : vector<16x128xbf16> to vector<16x32xbf16>
    %170 = vector.extract_strided_slice %8 {offsets = [0, 0, 0], sizes = [1, 16, 32], strides = [1, 1, 1]} : vector<4x16x32xbf16> to vector<1x16x32xbf16>
    %171 = vector.shape_cast %170 : vector<1x16x32xbf16> to vector<16x32xbf16>
    %172 = vector.extract_strided_slice %10 {offsets = [0, 0, 0], sizes = [1, 16, 32], strides = [1, 1, 1]} : vector<4x16x32xbf16> to vector<1x16x32xbf16>
    %173 = vector.shape_cast %172 : vector<1x16x32xbf16> to vector<16x32xbf16>
    %cst_78 = arith.constant dense<0.000000e+00> : vector<16x16xf32>
    %174 = tpu.matmul %169, %171, %cst_78 {dimension_numbers = #tpu.dot_dimension_numbers<[1], [1], [0], [0], [0, 0, 1, 0], [], []>} : vector<16x32xbf16>, vector<16x32xbf16>, vector<16x16xf32> -> vector<16x16xf32>
    %cst_79 = arith.constant dense<0xFF800000> : vector<16xf32>
    %175 = vector.multi_reduction <maximumf>, %174, %cst_79 [1] : vector<16x16xf32> to vector<16xf32>
    %176 = vector.shape_cast %175 : vector<16xf32> to vector<16x1xf32>
    %177 = vector.broadcast %176 : vector<16x1xf32> to vector<16x16xf32>
    %178 = arith.subf %174, %177 : vector<16x16xf32>
    %179 = math.exp %178 : vector<16x16xf32>
    %cst_80 = arith.constant dense<0.000000e+00> : vector<16xf32>
    %180 = vector.multi_reduction <add>, %179, %cst_80 [1] : vector<16x16xf32> to vector<16xf32>
    %181 = vector.shape_cast %180 : vector<16xf32> to vector<16x1xf32>
    %182 = tpu.reciprocal %181 {approx = true} : vector<16x1xf32> -> vector<16x1xf32>
    %183 = vector.broadcast %182 : vector<16x1xf32> to vector<16x16xf32>
    %184 = arith.mulf %179, %183 : vector<16x16xf32>
    %185 = arith.truncf %184 : vector<16x16xf32> to vector<16x16xbf16>
    %cst_81 = arith.constant dense<0.000000e+00> : vector<16x32xf32>
    %186 = tpu.matmul %185, %173, %cst_81 {dimension_numbers = #tpu.dot_dimension_numbers<[1], [0], [0], [1], [0, 0, 1, 1], [], []>} : vector<16x16xbf16>, vector<16x32xbf16>, vector<16x32xf32> -> vector<16x32xf32>
    %187 = arith.truncf %186 : vector<16x32xf32> to vector<16x32xbf16>
    %188 = vector.extract_strided_slice %158 {offsets = [0, 0, 0], sizes = [1, 32, 128], strides = [1, 1, 1]} : vector<4x32x128xbf16> to vector<1x32x128xbf16>
    %189 = vector.shape_cast %188 : vector<1x32x128xbf16> to vector<32x128xbf16>
    %cst_82 = arith.constant dense<0.000000e+00> : vector<16x128xf32>
    %190 = tpu.matmul %187, %189, %cst_82 {dimension_numbers = #tpu.dot_dimension_numbers<[1], [0], [0], [1], [0, 0, 1, 1], [], []>} : vector<16x32xbf16>, vector<32x128xbf16>, vector<16x128xf32> -> vector<16x128xf32>
    %191 = arith.addf %168, %190 : vector<16x128xf32>
    %192 = vector.extract_strided_slice %167 {offsets = [0, 32], sizes = [16, 32], strides = [1, 1]} : vector<16x128xbf16> to vector<16x32xbf16>
    %193 = vector.extract_strided_slice %8 {offsets = [1, 0, 0], sizes = [1, 16, 32], strides = [1, 1, 1]} : vector<4x16x32xbf16> to vector<1x16x32xbf16>
    %194 = vector.shape_cast %193 : vector<1x16x32xbf16> to vector<16x32xbf16>
    %195 = vector.extract_strided_slice %10 {offsets = [1, 0, 0], sizes = [1, 16, 32], strides = [1, 1, 1]} : vector<4x16x32xbf16> to vector<1x16x32xbf16>
    %196 = vector.shape_cast %195 : vector<1x16x32xbf16> to vector<16x32xbf16>
    %cst_83 = arith.constant dense<0.000000e+00> : vector<16x16xf32>
    %197 = tpu.matmul %192, %194, %cst_83 {dimension_numbers = #tpu.dot_dimension_numbers<[1], [1], [0], [0], [0, 0, 1, 0], [], []>} : vector<16x32xbf16>, vector<16x32xbf16>, vector<16x16xf32> -> vector<16x16xf32>
    %cst_84 = arith.constant dense<0xFF800000> : vector<16xf32>
    %198 = vector.multi_reduction <maximumf>, %197, %cst_84 [1] : vector<16x16xf32> to vector<16xf32>
    %199 = vector.shape_cast %198 : vector<16xf32> to vector<16x1xf32>
    %200 = vector.broadcast %199 : vector<16x1xf32> to vector<16x16xf32>
    %201 = arith.subf %197, %200 : vector<16x16xf32>
    %202 = math.exp %201 : vector<16x16xf32>
    %cst_85 = arith.constant dense<0.000000e+00> : vector<16xf32>
    %203 = vector.multi_reduction <add>, %202, %cst_85 [1] : vector<16x16xf32> to vector<16xf32>
    %204 = vector.shape_cast %203 : vector<16xf32> to vector<16x1xf32>
    %205 = tpu.reciprocal %204 {approx = true} : vector<16x1xf32> -> vector<16x1xf32>
    %206 = vector.broadcast %205 : vector<16x1xf32> to vector<16x16xf32>
    %207 = arith.mulf %202, %206 : vector<16x16xf32>
    %208 = arith.truncf %207 : vector<16x16xf32> to vector<16x16xbf16>
    %cst_86 = arith.constant dense<0.000000e+00> : vector<16x32xf32>
    %209 = tpu.matmul %208, %196, %cst_86 {dimension_numbers = #tpu.dot_dimension_numbers<[1], [0], [0], [1], [0, 0, 1, 1], [], []>} : vector<16x16xbf16>, vector<16x32xbf16>, vector<16x32xf32> -> vector<16x32xf32>
    %210 = arith.truncf %209 : vector<16x32xf32> to vector<16x32xbf16>
    %211 = vector.extract_strided_slice %158 {offsets = [1, 0, 0], sizes = [1, 32, 128], strides = [1, 1, 1]} : vector<4x32x128xbf16> to vector<1x32x128xbf16>
    %212 = vector.shape_cast %211 : vector<1x32x128xbf16> to vector<32x128xbf16>
    %cst_87 = arith.constant dense<0.000000e+00> : vector<16x128xf32>
    %213 = tpu.matmul %210, %212, %cst_87 {dimension_numbers = #tpu.dot_dimension_numbers<[1], [0], [0], [1], [0, 0, 1, 1], [], []>} : vector<16x32xbf16>, vector<32x128xbf16>, vector<16x128xf32> -> vector<16x128xf32>
    %214 = arith.addf %191, %213 : vector<16x128xf32>
    %215 = vector.extract_strided_slice %167 {offsets = [0, 64], sizes = [16, 32], strides = [1, 1]} : vector<16x128xbf16> to vector<16x32xbf16>
    %216 = vector.extract_strided_slice %8 {offsets = [2, 0, 0], sizes = [1, 16, 32], strides = [1, 1, 1]} : vector<4x16x32xbf16> to vector<1x16x32xbf16>
    %217 = vector.shape_cast %216 : vector<1x16x32xbf16> to vector<16x32xbf16>
    %218 = vector.extract_strided_slice %10 {offsets = [2, 0, 0], sizes = [1, 16, 32], strides = [1, 1, 1]} : vector<4x16x32xbf16> to vector<1x16x32xbf16>
    %219 = vector.shape_cast %218 : vector<1x16x32xbf16> to vector<16x32xbf16>
    %cst_88 = arith.constant dense<0.000000e+00> : vector<16x16xf32>
    %220 = tpu.matmul %215, %217, %cst_88 {dimension_numbers = #tpu.dot_dimension_numbers<[1], [1], [0], [0], [0, 0, 1, 0], [], []>} : vector<16x32xbf16>, vector<16x32xbf16>, vector<16x16xf32> -> vector<16x16xf32>
    %cst_89 = arith.constant dense<0xFF800000> : vector<16xf32>
    %221 = vector.multi_reduction <maximumf>, %220, %cst_89 [1] : vector<16x16xf32> to vector<16xf32>
    %222 = vector.shape_cast %221 : vector<16xf32> to vector<16x1xf32>
    %223 = vector.broadcast %222 : vector<16x1xf32> to vector<16x16xf32>
    %224 = arith.subf %220, %223 : vector<16x16xf32>
    %225 = math.exp %224 : vector<16x16xf32>
    %cst_90 = arith.constant dense<0.000000e+00> : vector<16xf32>
    %226 = vector.multi_reduction <add>, %225, %cst_90 [1] : vector<16x16xf32> to vector<16xf32>
    %227 = vector.shape_cast %226 : vector<16xf32> to vector<16x1xf32>
    %228 = tpu.reciprocal %227 {approx = true} : vector<16x1xf32> -> vector<16x1xf32>
    %229 = vector.broadcast %228 : vector<16x1xf32> to vector<16x16xf32>
    %230 = arith.mulf %225, %229 : vector<16x16xf32>
    %231 = arith.truncf %230 : vector<16x16xf32> to vector<16x16xbf16>
    %cst_91 = arith.constant dense<0.000000e+00> : vector<16x32xf32>
    %232 = tpu.matmul %231, %219, %cst_91 {dimension_numbers = #tpu.dot_dimension_numbers<[1], [0], [0], [1], [0, 0, 1, 1], [], []>} : vector<16x16xbf16>, vector<16x32xbf16>, vector<16x32xf32> -> vector<16x32xf32>
    %233 = arith.truncf %232 : vector<16x32xf32> to vector<16x32xbf16>
    %234 = vector.extract_strided_slice %158 {offsets = [2, 0, 0], sizes = [1, 32, 128], strides = [1, 1, 1]} : vector<4x32x128xbf16> to vector<1x32x128xbf16>
    %235 = vector.shape_cast %234 : vector<1x32x128xbf16> to vector<32x128xbf16>
    %cst_92 = arith.constant dense<0.000000e+00> : vector<16x128xf32>
    %236 = tpu.matmul %233, %235, %cst_92 {dimension_numbers = #tpu.dot_dimension_numbers<[1], [0], [0], [1], [0, 0, 1, 1], [], []>} : vector<16x32xbf16>, vector<32x128xbf16>, vector<16x128xf32> -> vector<16x128xf32>
    %237 = arith.addf %214, %236 : vector<16x128xf32>
    %238 = vector.extract_strided_slice %167 {offsets = [0, 96], sizes = [16, 32], strides = [1, 1]} : vector<16x128xbf16> to vector<16x32xbf16>
    %239 = vector.extract_strided_slice %8 {offsets = [3, 0, 0], sizes = [1, 16, 32], strides = [1, 1, 1]} : vector<4x16x32xbf16> to vector<1x16x32xbf16>
    %240 = vector.shape_cast %239 : vector<1x16x32xbf16> to vector<16x32xbf16>
    %241 = vector.extract_strided_slice %10 {offsets = [3, 0, 0], sizes = [1, 16, 32], strides = [1, 1, 1]} : vector<4x16x32xbf16> to vector<1x16x32xbf16>
    %242 = vector.shape_cast %241 : vector<1x16x32xbf16> to vector<16x32xbf16>
    %cst_93 = arith.constant dense<0.000000e+00> : vector<16x16xf32>
    %243 = tpu.matmul %238, %240, %cst_93 {dimension_numbers = #tpu.dot_dimension_numbers<[1], [1], [0], [0], [0, 0, 1, 0], [], []>} : vector<16x32xbf16>, vector<16x32xbf16>, vector<16x16xf32> -> vector<16x16xf32>
    %cst_94 = arith.constant dense<0xFF800000> : vector<16xf32>
    %244 = vector.multi_reduction <maximumf>, %243, %cst_94 [1] : vector<16x16xf32> to vector<16xf32>
    %245 = vector.shape_cast %244 : vector<16xf32> to vector<16x1xf32>
    %246 = vector.broadcast %245 : vector<16x1xf32> to vector<16x16xf32>
    %247 = arith.subf %243, %246 : vector<16x16xf32>
    %248 = math.exp %247 : vector<16x16xf32>
    %cst_95 = arith.constant dense<0.000000e+00> : vector<16xf32>
    %249 = vector.multi_reduction <add>, %248, %cst_95 [1] : vector<16x16xf32> to vector<16xf32>
    %250 = vector.shape_cast %249 : vector<16xf32> to vector<16x1xf32>
    %251 = tpu.reciprocal %250 {approx = true} : vector<16x1xf32> -> vector<16x1xf32>
    %252 = vector.broadcast %251 : vector<16x1xf32> to vector<16x16xf32>
    %253 = arith.mulf %248, %252 : vector<16x16xf32>
    %254 = arith.truncf %253 : vector<16x16xf32> to vector<16x16xbf16>
    %cst_96 = arith.constant dense<0.000000e+00> : vector<16x32xf32>
    %255 = tpu.matmul %254, %242, %cst_96 {dimension_numbers = #tpu.dot_dimension_numbers<[1], [0], [0], [1], [0, 0, 1, 1], [], []>} : vector<16x16xbf16>, vector<16x32xbf16>, vector<16x32xf32> -> vector<16x32xf32>
    %256 = arith.truncf %255 : vector<16x32xf32> to vector<16x32xbf16>
    %257 = vector.extract_strided_slice %158 {offsets = [3, 0, 0], sizes = [1, 32, 128], strides = [1, 1, 1]} : vector<4x32x128xbf16> to vector<1x32x128xbf16>
    %258 = vector.shape_cast %257 : vector<1x32x128xbf16> to vector<32x128xbf16>
    %cst_97 = arith.constant dense<0.000000e+00> : vector<16x128xf32>
    %259 = tpu.matmul %256, %258, %cst_97 {dimension_numbers = #tpu.dot_dimension_numbers<[1], [0], [0], [1], [0, 0, 1, 1], [], []>} : vector<16x32xbf16>, vector<32x128xbf16>, vector<16x128xf32> -> vector<16x128xf32>
    %260 = arith.addf %237, %259 : vector<16x128xf32>
    %261 = vector.broadcast %159 : vector<1x128xf32> to vector<16x128xf32>
    %262 = arith.addf %260, %261 : vector<16x128xf32>
    %263 = arith.addf %154, %262 : vector<16x128xf32>
    %cst_98 = arith.constant dense<0.000000e+00> : vector<16xf32>
    %264 = vector.multi_reduction <add>, %263, %cst_98 [1] : vector<16x128xf32> to vector<16xf32>
    %265 = vector.shape_cast %264 : vector<16xf32> to vector<16x1xf32>
    %cst_99 = arith.constant 1.280000e+02 : f32
    %266 = vector.broadcast %cst_99 : f32 to vector<16x1xf32>
    %267 = arith.divf %265, %266 : vector<16x1xf32>
    %268 = vector.broadcast %267 : vector<16x1xf32> to vector<16x128xf32>
    %269 = arith.subf %263, %268 : vector<16x128xf32>
    %270 = arith.mulf %269, %269 : vector<16x128xf32>
    %cst_100 = arith.constant dense<0.000000e+00> : vector<16xf32>
    %271 = vector.multi_reduction <add>, %270, %cst_100 [1] : vector<16x128xf32> to vector<16xf32>
    %272 = vector.shape_cast %271 : vector<16xf32> to vector<16x1xf32>
    %cst_101 = arith.constant 1.280000e+02 : f32
    %273 = vector.broadcast %cst_101 : f32 to vector<16x1xf32>
    %274 = arith.divf %272, %273 : vector<16x1xf32>
    %275 = vector.broadcast %267 : vector<16x1xf32> to vector<16x128xf32>
    %276 = arith.subf %263, %275 : vector<16x128xf32>
    %cst_102 = arith.constant 9.99999974E-6 : f32
    %277 = vector.broadcast %cst_102 : f32 to vector<16x1xf32>
    %278 = arith.addf %274, %277 : vector<16x1xf32>
    %279 = math.rsqrt %278 : vector<16x1xf32>
    %280 = vector.broadcast %279 : vector<16x1xf32> to vector<16x128xf32>
    %281 = arith.mulf %276, %280 : vector<16x128xf32>
    %282 = vector.broadcast %160 : vector<1x128xf32> to vector<16x128xf32>
    %283 = arith.mulf %281, %282 : vector<16x128xf32>
    %284 = vector.broadcast %161 : vector<1x128xf32> to vector<16x128xf32>
    %285 = arith.addf %283, %284 : vector<16x128xf32>
    %c0_103 = arith.constant 0 : index
    %c0_104 = arith.constant 0 : index
    %286 = vector.load %arg19[%c0_103, %c0_104] : memref<128x256xbf16, #tpu.memory_space<vmem>>, vector<128x256xbf16>
    %c0_105 = arith.constant 0 : index
    %c0_106 = arith.constant 0 : index
    %287 = vector.load %arg20[%c0_105, %c0_106] : memref<1x256xf32, #tpu.memory_space<vmem>>, vector<1x256xf32>
    %c0_107 = arith.constant 0 : index
    %c0_108 = arith.constant 0 : index
    %288 = vector.load %arg21[%c0_107, %c0_108] : memref<256x128xbf16, #tpu.memory_space<vmem>>, vector<256x128xbf16>
    %c0_109 = arith.constant 0 : index
    %c0_110 = arith.constant 0 : index
    %289 = vector.load %arg22[%c0_109, %c0_110] : memref<1x128xf32, #tpu.memory_space<vmem>>, vector<1x128xf32>
    %c0_111 = arith.constant 0 : index
    %c0_112 = arith.constant 0 : index
    %290 = vector.load %arg23[%c0_111, %c0_112] : memref<1x128xf32, #tpu.memory_space<vmem>>, vector<1x128xf32>
    %c0_113 = arith.constant 0 : index
    %c0_114 = arith.constant 0 : index
    %291 = vector.load %arg24[%c0_113, %c0_114] : memref<1x128xf32, #tpu.memory_space<vmem>>, vector<1x128xf32>
    %292 = arith.truncf %285 : vector<16x128xf32> to vector<16x128xbf16>
    %cst_115 = arith.constant dense<0.000000e+00> : vector<16x256xf32>
    %293 = tpu.matmul %292, %286, %cst_115 {dimension_numbers = #tpu.dot_dimension_numbers<[1], [0], [0], [1], [0, 0, 1, 1], [], []>} : vector<16x128xbf16>, vector<128x256xbf16>, vector<16x256xf32> -> vector<16x256xf32>
    %294 = vector.broadcast %287 : vector<1x256xf32> to vector<16x256xf32>
    %295 = arith.addf %293, %294 : vector<16x256xf32>
    %cst_116 = arith.constant 0.000000e+00 : f32
    %296 = vector.broadcast %cst_116 : f32 to vector<16x256xf32>
    %297 = arith.maximumf %295, %296 : vector<16x256xf32>
    %298 = arith.truncf %297 : vector<16x256xf32> to vector<16x256xbf16>
    %cst_117 = arith.constant dense<0.000000e+00> : vector<16x128xf32>
    %299 = tpu.matmul %298, %288, %cst_117 {dimension_numbers = #tpu.dot_dimension_numbers<[1], [0], [0], [1], [0, 0, 1, 1], [], []>} : vector<16x256xbf16>, vector<256x128xbf16>, vector<16x128xf32> -> vector<16x128xf32>
    %300 = vector.broadcast %289 : vector<1x128xf32> to vector<16x128xf32>
    %301 = arith.addf %299, %300 : vector<16x128xf32>
    %302 = arith.addf %285, %301 : vector<16x128xf32>
    %cst_118 = arith.constant dense<0.000000e+00> : vector<16xf32>
    %303 = vector.multi_reduction <add>, %302, %cst_118 [1] : vector<16x128xf32> to vector<16xf32>
    %304 = vector.shape_cast %303 : vector<16xf32> to vector<16x1xf32>
    %cst_119 = arith.constant 1.280000e+02 : f32
    %305 = vector.broadcast %cst_119 : f32 to vector<16x1xf32>
    %306 = arith.divf %304, %305 : vector<16x1xf32>
    %307 = vector.broadcast %306 : vector<16x1xf32> to vector<16x128xf32>
    %308 = arith.subf %302, %307 : vector<16x128xf32>
    %309 = arith.mulf %308, %308 : vector<16x128xf32>
    %cst_120 = arith.constant dense<0.000000e+00> : vector<16xf32>
    %310 = vector.multi_reduction <add>, %309, %cst_120 [1] : vector<16x128xf32> to vector<16xf32>
    %311 = vector.shape_cast %310 : vector<16xf32> to vector<16x1xf32>
    %cst_121 = arith.constant 1.280000e+02 : f32
    %312 = vector.broadcast %cst_121 : f32 to vector<16x1xf32>
    %313 = arith.divf %311, %312 : vector<16x1xf32>
    %314 = vector.broadcast %306 : vector<16x1xf32> to vector<16x128xf32>
    %315 = arith.subf %302, %314 : vector<16x128xf32>
    %cst_122 = arith.constant 9.99999974E-6 : f32
    %316 = vector.broadcast %cst_122 : f32 to vector<16x1xf32>
    %317 = arith.addf %313, %316 : vector<16x1xf32>
    %318 = math.rsqrt %317 : vector<16x1xf32>
    %319 = vector.broadcast %318 : vector<16x1xf32> to vector<16x128xf32>
    %320 = arith.mulf %315, %319 : vector<16x128xf32>
    %321 = vector.broadcast %290 : vector<1x128xf32> to vector<16x128xf32>
    %322 = arith.mulf %320, %321 : vector<16x128xf32>
    %323 = vector.broadcast %291 : vector<1x128xf32> to vector<16x128xf32>
    %324 = arith.addf %322, %323 : vector<16x128xf32>
    %325 = arith.truncf %324 : vector<16x128xf32> to vector<16x128xbf16>
    %c0_123 = arith.constant 0 : index
    %c0_124 = arith.constant 0 : index
    %c0_125 = arith.constant 0 : index
    %326 = vector.load %arg25[%c0_123, %c0_124, %c0_125] : memref<1x16x128xbf16, #tpu.memory_space<vmem>>, vector<1x16x128xbf16>
    %327 = vector.shape_cast %326 : vector<1x16x128xbf16> to vector<16x128xbf16>
    %328 = vector.shape_cast %325 : vector<16x128xbf16> to vector<1x16x128xbf16>
    tpu.vector_store %arg25[%c0_123, %c0_124, %c0_125], %328 {strides = array<i32>} : memref<1x16x128xbf16, #tpu.memory_space<vmem>>, vector<1x16x128xbf16>,
    return
  }
  func.func @transform_0(%arg0: i32, %arg1: i32) -> (i32, i32, i32) {
    %c0_i32 = arith.constant 0 : i32
    %c0_i32_0 = arith.constant 0 : i32
    return %arg0, %arg1, %c0_i32 : i32, i32, i32
  }
  func.func @transform_1(%arg0: i32, %arg1: i32) -> (i32, i32, i32, i32) {
    %c0_i32 = arith.constant 0 : i32
    %c0_i32_0 = arith.constant 0 : i32
    %c0_i32_1 = arith.constant 0 : i32
    %c0_i32_2 = arith.constant 0 : i32
    return %arg0, %c0_i32, %c0_i32_0, %c0_i32_1 : i32, i32, i32, i32
  }
  func.func @transform_2(%arg0: i32, %arg1: i32) -> (i32, i32, i32, i32) {
    %c0_i32 = arith.constant 0 : i32
    %c0_i32_0 = arith.constant 0 : i32
    %c0_i32_1 = arith.constant 0 : i32
    %c0_i32_2 = arith.constant 0 : i32
    return %arg0, %c0_i32, %c0_i32_0, %c0_i32_1 : i32, i32, i32, i32
  }
  func.func @transform_3(%arg0: i32, %arg1: i32) -> (i32, i32, i32, i32) {
    %c0_i32 = arith.constant 0 : i32
    %c0_i32_0 = arith.constant 0 : i32
    %c0_i32_1 = arith.constant 0 : i32
    %c0_i32_2 = arith.constant 0 : i32
    return %arg0, %c0_i32, %c0_i32_0, %c0_i32_1 : i32, i32, i32, i32
  }
  func.func @transform_4(%arg0: i32, %arg1: i32) -> (i32, i32, i32, i32) {
    %c0_i32 = arith.constant 0 : i32
    %c0_i32_0 = arith.constant 0 : i32
    %c0_i32_1 = arith.constant 0 : i32
    %c0_i32_2 = arith.constant 0 : i32
    return %arg0, %c0_i32, %c0_i32_0, %c0_i32_1 : i32, i32, i32, i32
  }
  func.func @transform_5(%arg0: i32, %arg1: i32) -> (i32, i32) {
    %c0_i32 = arith.constant 0 : i32
    %c0_i32_0 = arith.constant 0 : i32
    %c0_i32_1 = arith.constant 0 : i32
    return %c0_i32, %c0_i32_0 : i32, i32
  }
  func.func @transform_6(%arg0: i32, %arg1: i32) -> (i32, i32) {
    %c0_i32 = arith.constant 0 : i32
    %c0_i32_0 = arith.constant 0 : i32
    %c0_i32_1 = arith.constant 0 : i32
    return %c0_i32, %c0_i32_0 : i32, i32
  }
  func.func @transform_7(%arg0: i32, %arg1: i32) -> (i32, i32, i32) {
    %c0_i32 = arith.constant 0 : i32
    %c0_i32_0 = arith.constant 0 : i32
    %c0_i32_1 = arith.constant 0 : i32
    %c0_i32_2 = arith.constant 0 : i32
    return %c0_i32, %c0_i32_0, %c0_i32_1 : i32, i32, i32
  }
  func.func @transform_8(%arg0: i32, %arg1: i32) -> (i32, i32) {
    %c0_i32 = arith.constant 0 : i32
    %c0_i32_0 = arith.constant 0 : i32
    %c0_i32_1 = arith.constant 0 : i32
    return %c0_i32, %c0_i32_0 : i32, i32
  }
  func.func @transform_9(%arg0: i32, %arg1: i32) -> (i32, i32) {
    %c0_i32 = arith.constant 0 : i32
    %c0_i32_0 = arith.constant 0 : i32
    %c0_i32_1 = arith.constant 0 : i32
    return %c0_i32, %c0_i32_0 : i32, i32
  }
  func.func @transform_10(%arg0: i32, %arg1: i32) -> (i32, i32) {
    %c0_i32 = arith.constant 0 : i32
    %c0_i32_0 = arith.constant 0 : i32
    %c0_i32_1 = arith.constant 0 : i32
    return %c0_i32, %c0_i32_0 : i32, i32
  }
  func.func @transform_11(%arg0: i32, %arg1: i32) -> (i32, i32) {
    %c0_i32 = arith.constant 0 : i32
    %c0_i32_0 = arith.constant 0 : i32
    %c0_i32_1 = arith.constant 0 : i32
    return %c0_i32, %c0_i32_0 : i32, i32
  }
  func.func @transform_12(%arg0: i32, %arg1: i32) -> (i32, i32) {
    %c0_i32 = arith.constant 0 : i32
    %c0_i32_0 = arith.constant 0 : i32
    %c0_i32_1 = arith.constant 0 : i32
    return %c0_i32, %c0_i32_0 : i32, i32
  }
  func.func @transform_13(%arg0: i32, %arg1: i32) -> (i32, i32, i32) {
    %c0_i32 = arith.constant 0 : i32
    %c0_i32_0 = arith.constant 0 : i32
    %c0_i32_1 = arith.constant 0 : i32
    %c0_i32_2 = arith.constant 0 : i32
    return %c0_i32, %c0_i32_0, %c0_i32_1 : i32, i32, i32
  }
  func.func @transform_14(%arg0: i32, %arg1: i32) -> (i32, i32) {
    %c0_i32 = arith.constant 0 : i32
    %c0_i32_0 = arith.constant 0 : i32
    %c0_i32_1 = arith.constant 0 : i32
    return %c0_i32, %c0_i32_0 : i32, i32
  }
  func.func @transform_15(%arg0: i32, %arg1: i32) -> (i32, i32) {
    %c0_i32 = arith.constant 0 : i32
    %c0_i32_0 = arith.constant 0 : i32
    %c0_i32_1 = arith.constant 0 : i32
    return %c0_i32, %c0_i32_0 : i32, i32
  }
  func.func @transform_16(%arg0: i32, %arg1: i32) -> (i32, i32) {
    %c0_i32 = arith.constant 0 : i32
    %c0_i32_0 = arith.constant 0 : i32
    %c0_i32_1 = arith.constant 0 : i32
    return %c0_i32, %c0_i32_0 : i32, i32
  }
  func.func @transform_17(%arg0: i32, %arg1: i32) -> (i32, i32) {
    %c0_i32 = arith.constant 0 : i32
    %c0_i32_0 = arith.constant 0 : i32
    %c0_i32_1 = arith.constant 0 : i32
    return %c0_i32, %c0_i32_0 : i32, i32
  }
  func.func @transform_18(%arg0: i32, %arg1: i32) -> (i32, i32) {
    %c0_i32 = arith.constant 0 : i32
    %c0_i32_0 = arith.constant 0 : i32
    %c0_i32_1 = arith.constant 0 : i32
    return %c0_i32, %c0_i32_0 : i32, i32
  }
  func.func @transform_19(%arg0: i32, %arg1: i32) -> (i32, i32) {
    %c0_i32 = arith.constant 0 : i32
    %c0_i32_0 = arith.constant 0 : i32
    %c0_i32_1 = arith.constant 0 : i32
    return %c0_i32, %c0_i32_0 : i32, i32
  }
  func.func @transform_20(%arg0: i32, %arg1: i32) -> (i32, i32) {
    %c0_i32 = arith.constant 0 : i32
    %c0_i32_0 = arith.constant 0 : i32
    %c0_i32_1 = arith.constant 0 : i32
    return %c0_i32, %c0_i32_0 : i32, i32
  }
  func.func @transform_21(%arg0: i32, %arg1: i32) -> (i32, i32) {
    %c0_i32 = arith.constant 0 : i32
    %c0_i32_0 = arith.constant 0 : i32
    %c0_i32_1 = arith.constant 0 : i32
    return %c0_i32, %c0_i32_0 : i32, i32
  }
  func.func @transform_22(%arg0: i32, %arg1: i32) -> (i32, i32) {
    %c0_i32 = arith.constant 0 : i32
    %c0_i32_0 = arith.constant 0 : i32
    %c0_i32_1 = arith.constant 0 : i32
    return %c0_i32, %c0_i32_0 : i32, i32
  }
  func.func @transform_23(%arg0: i32, %arg1: i32) -> (i32, i32, i32) {
    %c0_i32 = arith.constant 0 : i32
    %c0_i32_0 = arith.constant 0 : i32
    return %arg0, %arg1, %c0_i32 : i32, i32, i32
  }
}

</mosaic_0001>

<bundles_post_ra>
// kernel: tpu_custom_call.1
= control target key start
LH: loop header
LB: loop body
LE: loop exit
PB: predicated region body
PF: predicated region fallthrough
CT: control target
= control target key end

     0   :  { %s6706_s0 = inlined_call_operand.hbm [shape: bf16[2,16,128], index: 0, kind: input, shape index: {}]   ;;  %s6707_s1 = inlined_call_operand.hbm [shape: bf16[2,4,16,32], index: 1, kind: input, shape index: {}]   ;;  %s6708_s2 = inlined_call_operand.hbm [shape: bf16[2,4,16,32], index: 2, kind: input, shape index: {}]   ;;  %s6709_s3 = inlined_call_operand.hbm [shape: bf16[2,4,16,32], index: 3, kind: input, shape index: {}]   ;;  %s6710_s4 = inlined_call_operand.hbm [shape: bf16[2,4,16,32], index: 4, kind: input, shape index: {}]   ;;  %s6711_s5 = inlined_call_operand.hbm [shape: bf16[128,128], index: 5, kind: input, shape index: {}]   ;;  %s6712_s6 = inlined_call_operand.hbm [shape: f32[1,128], index: 6, kind: input, shape index: {}]   ;;  %s6713_s7 = inlined_call_operand.hbm [shape: bf16[4,32,128], index: 7, kind: input, shape index: {}]   ;;  %s6714_s8 = inlined_call_operand.hbm [shape: f32[1,128], index: 8, kind: input, shape index: {}]   ;;  %s6715_s9 = inlined_call_operand.hbm [shape: f32[1,128], index: 9, kind: input, shape index: {}]   ;;  %s6716_s10 = inlined_call_operand.hbm [shape: f32[1,128], index: 10, kind: input, shape index: {}]   ;;  %s6717_s11 = inlined_call_operand.hbm [shape: bf16[128,128], index: 11, kind: input, shape index: {}]   ;;  %s6718_s12 = inlined_call_operand.hbm [shape: f32[1,128], index: 12, kind: input, shape index: {}]   ;;  %s6719_s13 = inlined_call_operand.hbm [shape: bf16[4,32,128], index: 13, kind: input, shape index: {}]   ;;  %s6720_s14 = inlined_call_operand.hbm [shape: f32[1,128], index: 14, kind: input, shape index: {}]   ;;  %s6721_s15 = inlined_call_operand.hbm [shape: f32[1,128], index: 15, kind: input, shape index: {}]   ;;  %s6722_s16 = inlined_call_operand.hbm [shape: f32[1,128], index: 16, kind: input, shape index: {}]   ;;  %s6723_s17 = inlined_call_operand.hbm [shape: bf16[128,256], index: 17, kind: input, shape index: {}]   ;;  %s6724_s18 = inlined_call_operand.hbm [shape: f32[1,256], index: 18, kind: input, shape index: {}]   ;;  %s6725_s19 = inlined_call_operand.hbm [shape: bf16[256,128], index: 19, kind: input, shape index: {}]   ;;  %s6726_s20 = inlined_call_operand.hbm [shape: f32[1,128], index: 20, kind: input, shape index: {}]   ;;  %s6727_s21 = inlined_call_operand.hbm [shape: f32[1,128], index: 21, kind: input, shape index: {}]   ;;  %s6728_s22 = inlined_call_operand.hbm [shape: f32[1,128], index: 22, kind: input, shape index: {}]   ;;  %s6729_s23 = inlined_call_operand.hbm [shape: bf16[2,16,128], index: 23, kind: output, shape index: {}]  }
   0x1   :  { %6782 = sst [smem:[#allocation60_spill]] %s6706_s0 }
   0x2   :  { %6783 = sst [smem:[#allocation61_spill]] %s6707_s1 }
   0x3   :  { %6784 = sst [smem:[#allocation62_spill]] %s6708_s2 }
   0x4   :  { %6785 = sst [smem:[#allocation63_spill]] %s6709_s3 }
   0x5   :  { %6786 = sst [smem:[#allocation64_spill]] %s6710_s4 }
   0x6   :  { %6787 = sst [smem:[#allocation65_spill]] %s6711_s5 }
   0x7   :  { %6788 = sst [smem:[#allocation66_spill]] %s6712_s6 }
   0x8   :  { %6789 = sst [smem:[#allocation67_spill]] %s6713_s7 }
   0x9   :  { %6790 = sst [smem:[#allocation68_spill]] %s6714_s8 }
   0xa   :  { %6791 = sst [smem:[#allocation69_spill]] %s6715_s9 }
   0xb   :  { %6792 = sst [smem:[#allocation70_spill]] %s6716_s10 }
   0xc   :  { %6793 = sst [smem:[#allocation71_spill]] %s6717_s11 }
   0xd   :  { %6794 = sst [smem:[#allocation72_spill]] %s6718_s12 }
   0xe   :  { %6795 = sst [smem:[#allocation73_spill]] %s6719_s13 }
   0xf   :  { %6796 = sst [smem:[#allocation74_spill]] %s6720_s14 }
  0x10   :  { %6797 = sst [smem:[#allocation75_spill]] %s6721_s15 }
  0x11   :  { %6798 = sst [smem:[#allocation76_spill]] %s6722_s16 }
  0x12   :  { %6799 = sst [smem:[#allocation77_spill]] %s6723_s17 }
  0x13   :  { %6800 = sst [smem:[#allocation78_spill]] %s6724_s18 }
  0x14   :  { %6801 = sst [smem:[#allocation79_spill]] %s6725_s19 }
  0x15   :  { %6802 = sst [smem:[#allocation80_spill]] %s6726_s20 }
  0x16   :  { %6803 = sst [smem:[#allocation81_spill]] %s6727_s21 }
  0x17   :  { %6804 = sst [smem:[#allocation82_spill]] %s6728_s22 }
  0x18   :  { %6805 = sst [smem:[#allocation83_spill]] %s6729_s23 }
  0x19   :  { %28 = vsyncpa [#allocation3], 0 }
  0x1a   :  { %30 = vsyncpa [#allocation3 + $0x1], 0 }
  0x1b   :  { %31 = vsyncpa [#allocation6], 0 }
  0x1c   :  { %33 = vsyncpa [#allocation6 + $0x1], 0 }
  0x1d   :  { %34 = vsyncpa [#allocation9], 0 }
  0x1e   :  { %36 = vsyncpa [#allocation9 + $0x1], 0 }
  0x1f   :  { %37 = vsyncpa [#allocation12], 0 }
  0x20   :  { %38 = vsyncpa [#allocation15], 0 }
  0x21   :  { %39 = vsyncpa [#allocation18], 0 }
  0x22   :  { %40 = vsyncpa [#allocation21], 0 }
  0x23   :  { %41 = vsyncpa [#allocation24], 0 }
  0x24   :  { %42 = vsyncpa [#allocation27], 0 }
  0x25   :  { %43 = vsyncpa [#allocation30], 0 }
  0x26   :  { %44 = vsyncpa [#allocation33], 0 }
  0x27   :  { %45 = vsyncpa [#allocation36], 0 }
  0x28   :  { %46 = vsyncpa [#allocation4], 0 }
  0x29   :  { %48 = vsyncpa [#allocation4 + $0x1], 0  ;;  %s5665_s4 = smov 0   ;;  %s5667_s30 = smov 0  }
  0x2a   :  { %s5669_s24 = smov 0   ;;  %s5671_s25 = smov 0  }
  0x2b   :  { %s5673_s5 = smov 0   ;;  %s5675_s1 = smov 0  }
  0x2c LB: > { %6806 = sst [smem:[#allocation52_spill]] %s5488_s4  ;;  %s5696_s26 = sadd.s32 4294967295, %s5508_s1   ;;  %s5508_s1 = sphi %s5675_s1, %s54_s1   ;;  %s5504_s5 = sphi %s5673_s5, %s6891_s5   ;;  %s5500_s25 = sphi %s5671_s25, %s6890_s25   ;;  %s5496_s24 = sphi %s5669_s24, %s6886_s24   ;;  %s5492_s30 = sphi %s5667_s30, %s6889_s30   ;;  %s5488_s4 = sphi %s5665_s4, %s6888_s4  }
  0x2d   : > { %6807 = sst [smem:[#allocation53_spill]] %s5496_s24  ;;  %p3796_p0 = scmp.ge.s32.totalorder %s5508_s1, 1 }
  0x2e   : > { %6808 = sst [smem:[#allocation54_spill]] %s5500_s25  ;;  %p6748_p1 = scmp.eq.s32.totalorder %s5696_s26, 0 }
  0x2f   : > { %6809 = sst [smem:[#allocation55_spill]] %s5508_s1  ;;  %p609_p2 = scmp.lt.s32.totalorder %s5508_s1, 3 }
  0x30   : > { %s5510_s6 = smov [#allocation11]   ;;  %s5511_s28 = smov [#allocation14]  }
  0x31   : > { %p5701_p3 = pnand %p3796_p0, %p609_p2  ;;  %s621_s27 = sshll.u32 %s5510_s6, 4  ;;  %s5705_s27 = int_to_ptr.vmem [resolvable:$true] %s621_s27 }
  0x32   : > { %s645_s29 = sshll.u32 %s5511_s28, 4  ;;  %s5512_s3 = smov [#allocation17]   ;;  %s5716_s29 = int_to_ptr.vmem [resolvable:$true] %s645_s29 }
  0x33   : > { %s6810_s2 = scalar_select %p5701_p3, 1, 0 }
  0x34   : > { %p4372_p4 = pneg %p5701_p3  ;;  %s5718_s0 = sshll.u32 %s5512_s3, 4  ;;  %s671_s0 = int_to_ptr.vmem [resolvable:$true] %s5718_s0 }
  0x35   : > { %6811 = sst [smem:[#allocation56_spill]] %s6810_s2  ;;  %s6813_s25 = sld [smem:[#allocation65_spill]] }
  0x36   : > { %p5712_p6 = pnand %p4372_p4, %p6748_p1 }
  0x38   : > { %s6812_s7 = scalar_select %p5712_p6, 1, 0 }
  0x39   : > { %p5728_p8 = pneg %p5712_p6 }
  0x3b   : > { %s6814_s22 = smov %s6813_s25  ;;  %s4728_s20 = scalar_lea.hbm %s6813_s25, 1024 }
  0x3c   : > { %p4729_p7 = scmp.ne.s32.totalorder %s6814_s22, %s4728_s20  ;;  %p4735_p11 = scmp.lt.u32.totalorder %s4728_s20, %s6814_s22 }
  0x3d   : > { %s6815_s16 = scalar_select %p5728_p8, 1, 0 }
  0x3e   : > { %p4731_p9 = pnand %p5728_p8, %p4729_p7 }
  0x40   : > { %p4732_p10 = pneg %p4731_p9 }
  0x42   : > { %p4737_p12 = pnand %p4735_p11, %p4732_p10 }
  0x44   : > { %4740 = shalt.err (!%p4737_p12)
}
  0x45   : > { %s4741_s18 = scalar_lea.vmem %s5705_s27, 1024  ;;  %p4749_p4 = scmp.lt.s32.totalorder %s5705_s27, %s5705_s27 }
  0x46   : > { %p4742_p13 = scmp.ne.s32.totalorder %s5705_s27, %s4741_s18  ;;  %p4750_p5 = scmp.lt.s32.totalorder %s4741_s18, %s4741_s18 }
  0x48   : > { %p4744_p0 = pnand %p4742_p13, %p5728_p8  ;;  %p4751_p7 = por %p4750_p5, %p4749_p4 }
  0x4a   : > { %p4745_p2 = pneg %p4744_p0 }
  0x4c   : > { %p4752_p9 = pnand %p4751_p7, %p4745_p2 }
  0x4e   : > { %4755 = shalt.err (!%p4752_p9)
}
  0x4f   : > { %s6750_s23 = smov 64   ;;  %s6753_s20 = smov 4  }
  0x50   : > { %4375 = dma.hbm_to_vmem [thread:$0]  (!%p5712_p6), %s6814_s22, 1024, %s5705_s27, [#allocation12], %s6750_s23, %s6750_s23, %s6753_s20  }
  0x51   : > { %s6816_s3 = sld [smem:[#allocation67_spill]] }
  0x57   : > { %s4756_s18 = scalar_lea.hbm %s6816_s3, 1024 }
  0x58   : > { %p4757_p5 = scmp.ne.s32.totalorder %s6816_s3, %s4756_s18  ;;  %p4763_p12 = scmp.lt.u32.totalorder %s4756_s18, %s6816_s3 }
  0x5a   : > { %p4759_p10 = pnand %p4757_p5, %p5728_p8 }
  0x5c   : > { %p4760_p11 = pneg %p4759_p10 }
  0x5e   : > { %p4765_p13 = pnand %p4763_p12, %p4760_p11 }
  0x60   : > { %4768 = shalt.err (!%p4765_p13)
}
  0x61   : > { %s4769_s27 = scalar_lea.vmem %s5716_s29, 1024  ;;  %p4777_p7 = scmp.lt.s32.totalorder %s5716_s29, %s5716_s29 }
  0x62   : > { %p4770_p0 = scmp.ne.s32.totalorder %s5716_s29, %s4769_s27  ;;  %p4778_p9 = scmp.lt.s32.totalorder %s4769_s27, %s4769_s27 }
  0x64   : > { %p4772_p2 = pnand %p4770_p0, %p5728_p8  ;;  %p4779_p5 = por %p4778_p9, %p4777_p7 }
  0x66   : > { %p4773_p4 = pneg %p4772_p2 }
  0x68   : > { %p4780_p10 = pnand %p4779_p5, %p4773_p4 }
  0x6a   : > { %4783 = shalt.err (!%p4780_p10)
}
  0x6b   : > { %4381 = dma.hbm_to_vmem [thread:$0]  (!%p5712_p6), %s6816_s3, 1024, %s5716_s29, [#allocation15], %s6750_s23, %s6750_s23, %s6753_s20  }
  0x6c   : > { %s6817_s9 = sld [smem:[#allocation69_spill]] }
  0x72   : > { %s4784_s25 = scalar_lea.hbm %s6817_s9, 16 }
  0x73   : > { %p4785_p11 = scmp.ne.s32.totalorder %s6817_s9, %s4784_s25  ;;  %p4791_p0 = scmp.lt.u32.totalorder %s4784_s25, %s6817_s9 }
  0x75   : > { %p4787_p12 = pnand %p4785_p11, %p5728_p8 }
  0x77   : > { %p4788_p13 = pneg %p4787_p12 }
  0x79   : > { %p4793_p2 = pnand %p4791_p0, %p4788_p13 }
  0x7b   : > { %4796 = shalt.err (!%p4793_p2)
}
  0x7c   : > { %s4797_s27 = scalar_lea.vmem %s671_s0, 16  ;;  %s4804_s29 = scalar_lea.vmem %s671_s0, 32 }
  0x7d   : > { %p4798_p4 = scmp.ne.s32.totalorder %s671_s0, %s4797_s27  ;;  %p4805_p5 = scmp.lt.s32.totalorder %s671_s0, %s671_s0 }
  0x7e   : > { %p4806_p10 = scmp.lt.s32.totalorder %s4804_s29, %s4797_s27 }
  0x7f   : > { %p4800_p7 = pnand %p4798_p4, %p5728_p8 }
  0x80   : > { %p4807_p1 = por %p4806_p10, %p4805_p5 }
  0x81   : > { %p4801_p9 = pneg %p4800_p7 }
  0x83   : > { %p4808_p3 = pnand %p4807_p1, %p4801_p9 }
  0x85   : > { %4811 = shalt.err (!%p4808_p3)
}
  0x86   : > { %4387 = dma.hbm_to_vmem [thread:$0]  (!%p5712_p6), %s6817_s9, 16, %s671_s0, [#allocation18]  }
  0x87   : > { %s5515_s12 = smov [#allocation20]   ;;  %s5516_s25 = smov [#allocation23]  }
  0x88   : > { %s691_s14 = sshll.u32 %s5515_s12, 4  ;;  %s715_s2 = sshll.u32 %s5516_s25, 4  ;;  %s692_s14 = int_to_ptr.vmem [resolvable:$true] %s691_s14  ;;  %s716_s2 = int_to_ptr.vmem [resolvable:$true] %s715_s2 }
  0x89   : > { %s6818_s11 = sld [smem:[#allocation71_spill]] }
  0x8f   : > { %s4812_s18 = scalar_lea.hbm %s6818_s11, 1024 }
  0x90   : > { %p4813_p1 = scmp.ne.s32.totalorder %s6818_s11, %s4812_s18  ;;  %p4819_p12 = scmp.lt.u32.totalorder %s4812_s18, %s6818_s11 }
  0x92   : > { %p4815_p3 = pnand %p4813_p1, %p5728_p8 }
  0x94   : > { %p4816_p11 = pneg %p4815_p3 }
  0x96   : > { %p4821_p13 = pnand %p4819_p12, %p4816_p11 }
  0x98   : > { %4824 = shalt.err (!%p4821_p13)
}
  0x99   : > { %s4825_s0 = scalar_lea.vmem %s692_s14, 1024  ;;  %p4833_p7 = scmp.lt.s32.totalorder %s692_s14, %s692_s14 }
  0x9a   : > { %p4826_p0 = scmp.ne.s32.totalorder %s692_s14, %s4825_s0  ;;  %p4834_p9 = scmp.lt.s32.totalorder %s4825_s0, %s4825_s0 }
  0x9c   : > { %p4828_p2 = pnand %p4826_p0, %p5728_p8  ;;  %p4835_p5 = por %p4834_p9, %p4833_p7 }
  0x9e   : > { %p4829_p4 = pneg %p4828_p2 }
  0xa0   : > { %p4836_p10 = pnand %p4835_p5, %p4829_p4 }
  0xa2   : > { %4839 = shalt.err (!%p4836_p10)
}
  0xa3   : > { %s6819_s10 = smov 64   ;;  %s6820_s13 = sld [smem:[#allocation73_spill]] }
  0xa4   : > { %4393 = dma.hbm_to_vmem [thread:$0]  (!%p5712_p6), %s6818_s11, 1024, %s692_s14, [#allocation21], %s6819_s10, %s6819_s10, %s6753_s20  }
  0xa9   : > { %s4840_s28 = scalar_lea.hbm %s6820_s13, 1024 }
  0xaa   : > { %p4841_p1 = scmp.ne.s32.totalorder %s6820_s13, %s4840_s28  ;;  %p4847_p12 = scmp.lt.u32.totalorder %s4840_s28, %s6820_s13 }
  0xac   : > { %p4843_p3 = pnand %p4841_p1, %p5728_p8 }
  0xae   : > { %p4844_p11 = pneg %p4843_p3 }
  0xb0   : > { %p4849_p13 = pnand %p4847_p12, %p4844_p11 }
  0xb2   : > { %4852 = shalt.err (!%p4849_p13)
}
  0xb3   : > { %s4853_s0 = scalar_lea.vmem %s716_s2, 1024  ;;  %p4861_p7 = scmp.lt.s32.totalorder %s716_s2, %s716_s2 }
  0xb4   : > { %p4854_p0 = scmp.ne.s32.totalorder %s716_s2, %s4853_s0  ;;  %p4862_p9 = scmp.lt.s32.totalorder %s4853_s0, %s4853_s0 }
  0xb6   : > { %p4856_p2 = pnand %p4854_p0, %p5728_p8  ;;  %p4863_p5 = por %p4862_p9, %p4861_p7 }
  0xb8   : > { %p4857_p4 = pneg %p4856_p2 }
  0xba   : > { %p4864_p10 = pnand %p4863_p5, %p4857_p4 }
  0xbc   : > { %4867 = shalt.err (!%p4864_p10)
}
  0xbd   : > { %4399 = dma.hbm_to_vmem [thread:$0]  (!%p5712_p6), %s6820_s13, 1024, %s716_s2, [#allocation24], %s6819_s10, %s6819_s10, %s6753_s20  }
  0xbe   : > { %s5517_s12 = smov [#allocation26]   ;;  %s5518_s6 = smov [#allocation29]  }
  0xbf   : > { %s740_s25 = sshll.u32 %s5517_s12, 4  ;;  %s761_s28 = sshll.u32 %s5518_s6, 4  ;;  %s741_s25 = int_to_ptr.vmem [resolvable:$true] %s740_s25  ;;  %s762_s28 = int_to_ptr.vmem [resolvable:$true] %s761_s28 }
  0xc0   : > { %s6821_s15 = sld [smem:[#allocation75_spill]] }
  0xc6   : > { %s4868_s29 = scalar_lea.hbm %s6821_s15, 16 }
  0xc7   : > { %p4869_p1 = scmp.ne.s32.totalorder %s6821_s15, %s4868_s29  ;;  %p4875_p12 = scmp.lt.u32.totalorder %s4868_s29, %s6821_s15 }
  0xc9   : > { %p4871_p3 = pnand %p4869_p1, %p5728_p8 }
  0xcb   : > { %p4872_p11 = pneg %p4871_p3 }
  0xcd   : > { %p4877_p13 = pnand %p4875_p12, %p4872_p11 }
  0xcf   : > { %4880 = shalt.err (!%p4877_p13)
}
  0xd0   : > { %s4881_s2 = scalar_lea.vmem %s741_s25, 16  ;;  %s4888_s23 = scalar_lea.vmem %s741_s25, 32 }
  0xd1   : > { %p4882_p0 = scmp.ne.s32.totalorder %s741_s25, %s4881_s2  ;;  %p4889_p7 = scmp.lt.s32.totalorder %s741_s25, %s741_s25 }
  0xd2   : > { %p4890_p9 = scmp.lt.s32.totalorder %s4888_s23, %s4881_s2 }
  0xd3   : > { %p4884_p2 = pnand %p4882_p0, %p5728_p8 }
  0xd4   : > { %p4891_p5 = por %p4890_p9, %p4889_p7 }
  0xd5   : > { %p4885_p4 = pneg %p4884_p2 }
  0xd7   : > { %p4892_p10 = pnand %p4891_p5, %p4885_p4 }
  0xd9   : > { %4895 = shalt.err (!%p4892_p10)
}
  0xda   : > { %4405 = dma.hbm_to_vmem [thread:$0]  (!%p5712_p6), %s6821_s15, 16, %s741_s25, [#allocation27]  }
  0xdb   : > { %s6822_s17 = sld [smem:[#allocation77_spill]] }
  0xe1   : > { %s4896_s27 = scalar_lea.hbm %s6822_s17, 2048 }
  0xe2   : > { %p4897_p1 = scmp.ne.s32.totalorder %s6822_s17, %s4896_s27  ;;  %p4903_p12 = scmp.lt.u32.totalorder %s4896_s27, %s6822_s17 }
  0xe4   : > { %p4899_p3 = pnand %p4897_p1, %p5728_p8 }
  0xe6   : > { %p4900_p11 = pneg %p4899_p3 }
  0xe8   : > { %p4905_p13 = pnand %p4903_p12, %p4900_p11 }
  0xea   : > { %4908 = shalt.err (!%p4905_p13)
}
  0xeb   : > { %s4909_s2 = scalar_lea.vmem %s762_s28, 2048  ;;  %p4917_p7 = scmp.lt.s32.totalorder %s762_s28, %s762_s28 }
  0xec   : > { %p4910_p0 = scmp.ne.s32.totalorder %s762_s28, %s4909_s2  ;;  %p4918_p9 = scmp.lt.s32.totalorder %s4909_s2, %s4909_s2 }
  0xee   : > { %p4912_p2 = pnand %p4910_p0, %p5728_p8  ;;  %p4919_p5 = por %p4918_p9, %p4917_p7 }
  0xf0   : > { %p4913_p4 = pneg %p4912_p2 }
  0xf2   : > { %p4920_p10 = pnand %p4919_p5, %p4913_p4 }
  0xf4   : > { %4923 = shalt.err (!%p4920_p10)
}
  0xf5   : > { %s5519_s25 = smov 128   ;;  %s5520_s23 = smov 8  }
  0xf6   : > { %4411 = dma.hbm_to_vmem [thread:$0]  (!%p5712_p6), %s6822_s17, 2048, %s762_s28, [#allocation30], %s5519_s25, %s5519_s25, %s5520_s23  }
  0xf7   : > { %s5521_s3 = smov [#allocation32]   ;;  %s5522_s27 = smov [#allocation35]  }
  0xf8   : > { %s785_s18 = sshll.u32 %s5521_s3, 4  ;;  %s810_s29 = sshll.u32 %s5522_s27, 4  ;;  %s786_s18 = int_to_ptr.vmem [resolvable:$true] %s785_s18  ;;  %s811_s29 = int_to_ptr.vmem [resolvable:$true] %s810_s29 }
  0xf9   : > { %s6823_s19 = sld [smem:[#allocation79_spill]] }
  0xff   : > { %s4924_s14 = scalar_lea.hbm %s6823_s19, 2048 }
 0x100   : > { %p4925_p1 = scmp.ne.s32.totalorder %s6823_s19, %s4924_s14  ;;  %p4931_p12 = scmp.lt.u32.totalorder %s4924_s14, %s6823_s19 }
 0x102   : > { %p4927_p3 = pnand %p4925_p1, %p5728_p8 }
 0x104   : > { %p4928_p11 = pneg %p4927_p3 }
 0x106   : > { %p4933_p13 = pnand %p4931_p12, %p4928_p11 }
 0x108   : > { %4936 = shalt.err (!%p4933_p13)
}
 0x109   : > { %s4937_s28 = scalar_lea.vmem %s786_s18, 2048  ;;  %p4945_p7 = scmp.lt.s32.totalorder %s786_s18, %s786_s18 }
 0x10a   : > { %p4938_p0 = scmp.ne.s32.totalorder %s786_s18, %s4937_s28  ;;  %p4946_p9 = scmp.lt.s32.totalorder %s4937_s28, %s4937_s28 }
 0x10c   : > { %p4940_p2 = pnand %p4938_p0, %p5728_p8  ;;  %p4947_p5 = por %p4946_p9, %p4945_p7 }
 0x10e   : > { %p4941_p4 = pneg %p4940_p2 }
 0x110   : > { %p4948_p10 = pnand %p4947_p5, %p4941_p4 }
 0x112   : > { %4951 = shalt.err (!%p4948_p10)
}
 0x113   : > { %s6824_s20 = smov 4   ;;  %s6825_s21 = sld [smem:[#allocation81_spill]] }
 0x114   : > { %4417 = dma.hbm_to_vmem [thread:$0]  (!%p5712_p6), %s6823_s19, 2048, %s786_s18, [#allocation33], %s6819_s10, %s6819_s10, %s6824_s20  }
 0x119   : > { %s4952_s12 = scalar_lea.hbm %s6825_s21, 16 }
 0x11a   : > { %p4953_p1 = scmp.ne.s32.totalorder %s6825_s21, %s4952_s12  ;;  %p4959_p12 = scmp.lt.u32.totalorder %s4952_s12, %s6825_s21 }
 0x11c   : > { %p4955_p3 = pnand %p4953_p1, %p5728_p8 }
 0x11e   : > { %p4956_p11 = pneg %p4955_p3 }
 0x120   : > { %p4961_p13 = pnand %p4959_p12, %p4956_p11 }
 0x122   : > { %4964 = shalt.err (!%p4961_p13)
}
 0x123   : > { %s4965_s0 = scalar_lea.vmem %s811_s29, 16  ;;  %s4972_s18 = scalar_lea.vmem %s811_s29, 32 }
 0x124   : > { %p4966_p0 = scmp.ne.s32.totalorder %s811_s29, %s4965_s0  ;;  %p4973_p7 = scmp.lt.s32.totalorder %s811_s29, %s811_s29 }
 0x125   : > { %p4974_p9 = scmp.lt.s32.totalorder %s4972_s18, %s4965_s0 }
 0x126   : > { %p4968_p2 = pnand %p4966_p0, %p5728_p8 }
 0x127   : > { %p4975_p5 = por %p4974_p9, %p4973_p7 }
 0x128   : > { %p4969_p4 = pneg %p4968_p2 }
 0x12a   : > { %p4976_p10 = pnand %p4975_p5, %p4969_p4 }
 0x12c   : > { %4979 = shalt.err (!%p4976_p10)
}
 0x12d   : > { %4423 = dma.hbm_to_vmem [thread:$0]  (!%p5712_p6), %s6825_s21, 16, %s811_s29, [#allocation36]  }
 0x12e   : > { %s3795_s28 = sadd.s32 4294967294, %s5508_s1   ;;  %s66_s9 = sadd.s32 1, %s5504_s5 }
 0x12f   : > { %s75_s11 = sadd.s32 1, %s5496_s24  ;;  %p68_p1 = scmp.ge.s32.totalorder %s66_s9, 2 }
 0x130   : > { %p82_p3 = scmp.ne.s32.totalorder %s5496_s24, %s5492_s30  ;;  %p83_p11 = scmp.eq.s32.totalorder %s5508_s1, 0 }
 0x131   : > { %p88_p12 = scmp.ne.s32.totalorder %s5492_s30, %s5488_s4  ;;  %s6893_s9 = smov (%p68_p1, %s66_s9), 0 }
 0x132   : > { %6826 = sst [smem:[#allocation57_spill]] %s6893_s9  ;;  %p84_p13 = por %p83_p11, %p82_p3 }
 0x133   : > { %p6827_p0 = scmp.eq.s32.totalorder %s5696_s26, 0  ;;  %s70_s29 = ssub.s32 %s5504_s5, %s6893_s9 }
 0x134   : > { %p596_p4 = scmp.eq.s32.totalorder %s5696_s26, 1  ;;  %p73_p7 = scmp.eq.s32.totalorder %s70_s29, 0 }
 0x135   : > { %p5926_p2 = por %p6827_p0, %p88_p12  ;;  %p602_p9 = scmp.eq.s32.totalorder %s3795_s28, 1 }
 0x136   : > { %p5933_p5 = por %p596_p4, %p82_p3  ;;  %p4465_p10 = scmp.lt.s32.totalorder %s5508_s1, 2 }
 0x137   : > { %s6828_s25 = scalar_select %p5926_p2, 1, 0 }
 0x138   : > { %s6829_s23 = scalar_select %p5933_p5, 1, 0 }
 0x139   : > { %s5939_s12 = scalar_select %p73_p7, %s5496_s24, %s75_s11  }
 0x13a   : > { %p5941_p1 = por %p602_p9, %p88_p12  ;;  %s5946_s3 = sand.u32 1, %s5496_s24  }
 0x13b   : > { %6830 = sst [smem:[#allocation58_spill]] %s5939_s12  ;;  %p5948_p11 = pnand %p4465_p10, %p84_p13 }
 0x13c   : > { %s6831_s6 = scalar_select %p5941_p1, 1, 0 }
 0x13d   : > { %s6833_s27 = scalar_select %p5948_p11, 1, 0 }
 0x13e   : > { %6832 = sst [smem:[#allocation59_spill]] %s6831_s6  ;;  %s6757_s8 = sand.u32 1, %s5508_s1  }
 0x13f   : > { %s5954_s0 = sshll.u32 %s5946_s3, 5  ;;  %s5957_s18 = sshll.u32 %s5504_s5, 9 }
 0x140   : > { %s859_s14 = scalar_lea.vmem [#allocation5], %s5954_s0  ;;  %s6834_s29 = sld [smem:[#allocation61_spill]] }
 0x141   : > { %s866_s2 = sshll.u32 %s859_s14, 4  ;;  %s5970_s15 = scalar_lea.sflag [#allocation6], %s6757_s8  ;;  %s5966_s2 = int_to_ptr.vmem [resolvable:$true] %s866_s2 }
 0x142   : > { %p5976_p12 = pneg %p5948_p11 }
 0x144   : > { %s6835_s19 = scalar_select %p5976_p12, 1, 0 }
 0x146   : > { %s5964_s13 = scalar_lea.hbm %s6834_s29, %s5957_s18  ;;  %s4985_s11 = scalar_lea.hbm %s6834_s29, 1024 }
 0x147   : > { %s4980_s17 = scalar_lea.hbm %s5964_s13, 512  ;;  %p4986_p4 = scmp.lt.u32.totalorder %s5964_s13, %s6834_s29 }
 0x148   : > { %p4981_p3 = scmp.ne.s32.totalorder %s5964_s13, %s4980_s17  ;;  %p4987_p7 = scmp.lt.u32.totalorder %s4985_s11, %s4980_s17 }
 0x149   : > { %p4989_p10 = scmp.lt.u32.totalorder %s4980_s17, %s5964_s13 }
 0x14a   : > { %p4983_p13 = pnand %p5976_p12, %p4981_p3  ;;  %p4988_p9 = por %p4987_p7, %p4986_p4 }
 0x14c   : > { %p4984_p0 = pneg %p4983_p13  ;;  %p4990_p1 = por %p4989_p10, %p4988_p9 }
 0x14e   : > { %p4991_p5 = pnand %p4990_p1, %p4984_p0 }
 0x150   : > { %4994 = shalt.err (!%p4991_p5)
}
 0x151   : > { %s4995_s8 = scalar_lea.vmem %s5966_s2, 512  ;;  %s5523_s14 = smov [#allocation5]  }
 0x152   : > { %p4996_p3 = scmp.ne.s32.totalorder %s5966_s2, %s4995_s8  ;;  %s5000_s28 = sshll.u32 %s5523_s14, 4  ;;  %s5001_s28 = int_to_ptr.vmem [resolvable:$false] %s5000_s28 }
 0x153   : > { %s5002_s21 = scalar_lea.vmem %s5001_s28, 1024  ;;  %p5003_p6 = scmp.lt.s32.totalorder %s5966_s2, %s5001_s28 }
 0x154   : > { %p4998_p13 = pnand %p4996_p3, %p5976_p12  ;;  %p5004_p8 = scmp.lt.s32.totalorder %s5002_s21, %s4995_s8 }
 0x156   : > { %p4999_p2 = pneg %p4998_p13  ;;  %p5005_p4 = por %p5004_p8, %p5003_p6 }
 0x158   : > { %p5006_p7 = pnand %p5005_p4, %p4999_p2 }
 0x15a   : > { %5009 = shalt.err (!%p5006_p7)
}
 0x15b   : > { %4433 = dma.hbm_to_vmem [thread:$0]  (!%p5948_p11), %s5964_s13, 512, %s5966_s2, %s5970_s15, %s6819_s10, %s6819_s10, %s6824_s20  }
 0x15c   : > { %s6836_s11 = sld [smem:[#allocation63_spill]]  ;;  %s901_s14 = scalar_lea.vmem [#allocation8], %s5954_s0 }
 0x15d   : > { %s908_s28 = sshll.u32 %s901_s14, 4  ;;  %s6837_s21 = sand.u32 1, %s5508_s1   ;;  %s6010_s28 = int_to_ptr.vmem [resolvable:$true] %s908_s28 }
 0x15e   : > { %s6014_s29 = scalar_lea.sflag [#allocation9], %s6837_s21 }
 0x162   : > { %s6007_s8 = scalar_lea.hbm %s6836_s11, %s5957_s18  ;;  %s5015_s17 = scalar_lea.hbm %s6836_s11, 1024 }
 0x163   : > { %s5010_s9 = scalar_lea.hbm %s6007_s8, 512  ;;  %p5016_p5 = scmp.lt.u32.totalorder %s6007_s8, %s6836_s11 }
 0x164   : > { %p5011_p6 = scmp.ne.s32.totalorder %s6007_s8, %s5010_s9  ;;  %p5017_p1 = scmp.lt.u32.totalorder %s5015_s17, %s5010_s9 }
 0x165   : > { %p5019_p9 = scmp.lt.u32.totalorder %s5010_s9, %s6007_s8 }
 0x166   : > { %p5013_p8 = pnand %p5011_p6, %p5976_p12  ;;  %p5018_p0 = por %p5017_p1, %p5016_p5 }
 0x168   : > { %p5014_p2 = pneg %p5013_p8  ;;  %p5020_p10 = por %p5019_p9, %p5018_p0 }
 0x16a   : > { %p5021_p3 = pnand %p5020_p10, %p5014_p2 }
 0x16c   : > { %5024 = shalt.err (!%p5021_p3)
}
 0x16d   : > { %s5025_s14 = scalar_lea.vmem %s6010_s28, 512  ;;  %s5524_s21 = smov [#allocation8]  }
 0x16e   : > { %p5026_p13 = scmp.ne.s32.totalorder %s6010_s28, %s5025_s14  ;;  %s5030_s13 = sshll.u32 %s5524_s21, 4  ;;  %s5031_s13 = int_to_ptr.vmem [resolvable:$false] %s5030_s13 }
 0x16f   : > { %s5032_s12 = scalar_lea.vmem %s5031_s13, 1024  ;;  %p5033_p6 = scmp.lt.s32.totalorder %s6010_s28, %s5031_s13 }
 0x170   : > { %p5028_p4 = pnand %p5026_p13, %p5976_p12  ;;  %p5034_p8 = scmp.lt.s32.totalorder %s5032_s12, %s5025_s14 }
 0x172   : > { %p5029_p7 = pneg %p5028_p4  ;;  %p5035_p5 = por %p5034_p8, %p5033_p6 }
 0x174   : > { %p5036_p1 = pnand %p5035_p5, %p5029_p7 }
 0x176   : > { %5039 = shalt.err (!%p5036_p1)
}
 0x177   : > { %4439 = dma.hbm_to_vmem [thread:$0]  (!%p5948_p11), %s6007_s8, 512, %s6010_s28, %s6014_s29, %s6819_s10, %s6819_s10, %s6824_s20  }
 0x178   : > { %s5525_s9 = smov [#allocation13]   ;;  %s5526_s17 = smov [#allocation16]  }
 0x179   : > { %s635_s2 = sshll.u32 %s5525_s9, 4  ;;  %s659_s22 = sshll.u32 %s5526_s17, 4  ;;  %s636_s2 = int_to_ptr.vmem [resolvable:$true] %s635_s2  ;;  %s660_s22 = int_to_ptr.vmem [resolvable:$true] %s659_s22 }
 0x17a   : > { %s6838_s13 = sld [smem:[#allocation66_spill]]  ;;  %p6839_p0 = scmp.ne.s32.totalorder %s6815_s16, 0 }
 0x180   : > { %s5040_s12 = scalar_lea.hbm %s6838_s13, 16 }
 0x181   : > { %p5041_p2 = scmp.ne.s32.totalorder %s6838_s13, %s5040_s12  ;;  %p5047_p3 = scmp.lt.u32.totalorder %s5040_s12, %s6838_s13 }
 0x183   : > { %p5043_p9 = pnand %p5041_p2, %p6839_p0 }
 0x185   : > { %p5044_p10 = pneg %p5043_p9 }
 0x187   : > { %p5049_p13 = pnand %p5047_p3, %p5044_p10 }
 0x189   : > { %5052 = shalt.err (!%p5049_p13)
}
 0x18a   : > { %s5053_s8 = scalar_lea.vmem %s636_s2, 16  ;;  %s5060_s28 = scalar_lea.vmem %s636_s2, 32 }
 0x18b   : > { %p5054_p4 = scmp.ne.s32.totalorder %s636_s2, %s5053_s8  ;;  %p5061_p8 = scmp.lt.s32.totalorder %s636_s2, %s636_s2 }
 0x18c   : > { %p5062_p5 = scmp.lt.s32.totalorder %s5060_s28, %s5053_s8 }
 0x18d   : > { %p5056_p7 = pnand %p5054_p4, %p6839_p0 }
 0x18e   : > { %p5063_p1 = por %p5062_p5, %p5061_p8 }
 0x18f   : > { %p5057_p6 = pneg %p5056_p7 }
 0x191   : > { %p5064_p11 = pnand %p5063_p1, %p5057_p6 }
 0x193   : > { %5067 = shalt.err (!%p5064_p11)
}
 0x194   : > { %p6840_p2 = scmp.ne.s32.totalorder %s6812_s7, 0  ;;  %s6841_s9 = sld [smem:[#allocation68_spill]] }
 0x196   : > { %4378 = dma.hbm_to_vmem [thread:$0]  (!%p6840_p2), %s6838_s13, 16, %s636_s2, [#allocation12]  }
 0x19a   : > { %s5068_s17 = scalar_lea.hbm %s6841_s9, 16 }
 0x19b   : > { %p5069_p9 = scmp.ne.s32.totalorder %s6841_s9, %s5068_s17  ;;  %p5075_p11 = scmp.lt.u32.totalorder %s5068_s17, %s6841_s9 }
 0x19d   : > { %p5071_p10 = pnand %p5069_p9, %p6839_p0 }
 0x19f   : > { %p5072_p3 = pneg %p5071_p10 }
 0x1a1   : > { %p5077_p13 = pnand %p5075_p11, %p5072_p3 }
 0x1a3   : > { %5080 = shalt.err (!%p5077_p13)
}
 0x1a4   : > { %s5081_s28 = scalar_lea.vmem %s660_s22, 16  ;;  %s5088_s2 = scalar_lea.vmem %s660_s22, 32 }
 0x1a5   : > { %p5082_p4 = scmp.ne.s32.totalorder %s660_s22, %s5081_s28  ;;  %p5089_p8 = scmp.lt.s32.totalorder %s660_s22, %s660_s22 }
 0x1a6   : > { %p5090_p5 = scmp.lt.s32.totalorder %s5088_s2, %s5081_s28 }
 0x1a7   : > { %p5084_p7 = pnand %p5082_p4, %p6839_p0 }
 0x1a8   : > { %p5091_p1 = por %p5090_p5, %p5089_p8 }
 0x1a9   : > { %p5085_p6 = pneg %p5084_p7 }
 0x1ab   : > { %p5092_p12 = pnand %p5091_p1, %p5085_p6 }
 0x1ad   : > { %5095 = shalt.err (!%p5092_p12)
}
 0x1ae   : > { %4384 = dma.hbm_to_vmem [thread:$0]  (!%p6840_p2), %s6841_s9, 16, %s660_s22, [#allocation15]  }
 0x1af   : > { %s5527_s1 = smov [#allocation19]   ;;  %s5528_s17 = smov [#allocation22]  }
 0x1b0   : > { %s681_s6 = sshll.u32 %s5527_s1, 4  ;;  %s705_s21 = sshll.u32 %s5528_s17, 4  ;;  %s682_s6 = int_to_ptr.vmem [resolvable:$true] %s681_s6  ;;  %s706_s21 = int_to_ptr.vmem [resolvable:$true] %s705_s21 }
 0x1b1   : > { %s6842_s8 = sld [smem:[#allocation70_spill]] }
 0x1b7   : > { %s5096_s13 = scalar_lea.hbm %s6842_s8, 16 }
 0x1b8   : > { %p5097_p12 = scmp.ne.s32.totalorder %s6842_s8, %s5096_s13  ;;  %p5103_p3 = scmp.lt.u32.totalorder %s5096_s13, %s6842_s8 }
 0x1ba   : > { %p5099_p9 = pnand %p5097_p12, %p6839_p0 }
 0x1bc   : > { %p5100_p10 = pneg %p5099_p9 }
 0x1be   : > { %p5105_p11 = pnand %p5103_p3, %p5100_p10 }
 0x1c0   : > { %5108 = shalt.err (!%p5105_p11)
}
 0x1c1   : > { %s5109_s22 = scalar_lea.vmem %s682_s6, 16  ;;  %s5116_s11 = scalar_lea.vmem %s682_s6, 32 }
 0x1c2   : > { %p5110_p13 = scmp.ne.s32.totalorder %s682_s6, %s5109_s22  ;;  %p5117_p6 = scmp.lt.s32.totalorder %s682_s6, %s682_s6 }
 0x1c3   : > { %p5118_p8 = scmp.lt.s32.totalorder %s5116_s11, %s5109_s22 }
 0x1c4   : > { %p5112_p4 = pnand %p5110_p13, %p6839_p0 }
 0x1c5   : > { %p5119_p5 = por %p5118_p8, %p5117_p6 }
 0x1c6   : > { %p5113_p7 = pneg %p5112_p4 }
 0x1c8   : > { %p5120_p1 = pnand %p5119_p5, %p5113_p7 }
 0x1ca   : > { %5123 = shalt.err (!%p5120_p1)
}
 0x1cb   : > { %4390 = dma.hbm_to_vmem [thread:$0]  (!%p6840_p2), %s6842_s8, 16, %s682_s6, [#allocation18]  }
 0x1cc   : > { %s6843_s14 = sld [smem:[#allocation72_spill]] }
 0x1d2   : > { %s5124_s12 = scalar_lea.hbm %s6843_s14, 16 }
 0x1d3   : > { %p5125_p12 = scmp.ne.s32.totalorder %s6843_s14, %s5124_s12  ;;  %p5131_p3 = scmp.lt.u32.totalorder %s5124_s12, %s6843_s14 }
 0x1d5   : > { %p5127_p9 = pnand %p5125_p12, %p6839_p0 }
 0x1d7   : > { %p5128_p10 = pneg %p5127_p9 }
 0x1d9   : > { %p5133_p11 = pnand %p5131_p3, %p5128_p10 }
 0x1db   : > { %5136 = shalt.err (!%p5133_p11)
}
 0x1dc   : > { %s5137_s11 = scalar_lea.vmem %s706_s21, 16  ;;  %s5144_s6 = scalar_lea.vmem %s706_s21, 32 }
 0x1dd   : > { %p5138_p13 = scmp.ne.s32.totalorder %s706_s21, %s5137_s11  ;;  %p5145_p6 = scmp.lt.s32.totalorder %s706_s21, %s706_s21 }
 0x1de   : > { %p5146_p8 = scmp.lt.s32.totalorder %s5144_s6, %s5137_s11 }
 0x1df   : > { %p5140_p4 = pnand %p5138_p13, %p6839_p0 }
 0x1e0   : > { %p5147_p5 = por %p5146_p8, %p5145_p6 }
 0x1e1   : > { %p5141_p7 = pneg %p5140_p4 }
 0x1e3   : > { %p5148_p1 = pnand %p5147_p5, %p5141_p7 }
 0x1e5   : > { %5151 = shalt.err (!%p5148_p1)
}
 0x1e6   : > { %4396 = dma.hbm_to_vmem [thread:$0]  (!%p6840_p2), %s6843_s14, 16, %s706_s21, [#allocation21]  }
 0x1e7   : > { %s5529_s4 = smov [#allocation25]   ;;  %s5530_s12 = smov [#allocation28]  }
 0x1e8   : > { %s729_s13 = sshll.u32 %s5529_s4, 4  ;;  %s751_s28 = sshll.u32 %s5530_s12, 4  ;;  %s730_s13 = int_to_ptr.vmem [resolvable:$true] %s729_s13  ;;  %s752_s28 = int_to_ptr.vmem [resolvable:$true] %s751_s28 }
 0x1e9   : > { %s6844_s22 = sld [smem:[#allocation74_spill]] }
 0x1ef   : > { %s5152_s8 = scalar_lea.hbm %s6844_s22, 16 }
 0x1f0   : > { %p5153_p12 = scmp.ne.s32.totalorder %s6844_s22, %s5152_s8  ;;  %p5159_p3 = scmp.lt.u32.totalorder %s5152_s8, %s6844_s22 }
 0x1f2   : > { %p5155_p9 = pnand %p5153_p12, %p6839_p0 }
 0x1f4   : > { %p5156_p10 = pneg %p5155_p9 }
 0x1f6   : > { %p5161_p11 = pnand %p5159_p3, %p5156_p10 }
 0x1f8   : > { %5164 = shalt.err (!%p5161_p11)
}
 0x1f9   : > { %s5165_s21 = scalar_lea.vmem %s730_s13, 16  ;;  %s5172_s17 = scalar_lea.vmem %s730_s13, 32 }
 0x1fa   : > { %p5166_p13 = scmp.ne.s32.totalorder %s730_s13, %s5165_s21  ;;  %p5173_p6 = scmp.lt.s32.totalorder %s730_s13, %s730_s13 }
 0x1fb   : > { %p5174_p8 = scmp.lt.s32.totalorder %s5172_s17, %s5165_s21 }
 0x1fc   : > { %p5168_p4 = pnand %p5166_p13, %p6839_p0 }
 0x1fd   : > { %p5175_p5 = por %p5174_p8, %p5173_p6 }
 0x1fe   : > { %p5169_p7 = pneg %p5168_p4 }
 0x200   : > { %p5176_p1 = pnand %p5175_p5, %p5169_p7 }
 0x202   : > { %5179 = shalt.err (!%p5176_p1)
}
 0x203   : > { %4402 = dma.hbm_to_vmem [thread:$0]  (!%p6840_p2), %s6844_s22, 16, %s730_s13, [#allocation24]  }
 0x204   : > { %s6845_s2 = sld [smem:[#allocation76_spill]] }
 0x20a   : > { %s5180_s24 = scalar_lea.hbm %s6845_s2, 16 }
 0x20b   : > { %p5181_p12 = scmp.ne.s32.totalorder %s6845_s2, %s5180_s24  ;;  %p5187_p3 = scmp.lt.u32.totalorder %s5180_s24, %s6845_s2 }
 0x20d   : > { %p5183_p9 = pnand %p5181_p12, %p6839_p0 }
 0x20f   : > { %p5184_p10 = pneg %p5183_p9 }
 0x211   : > { %p5189_p11 = pnand %p5187_p3, %p5184_p10 }
 0x213   : > { %5192 = shalt.err (!%p5189_p11)
}
 0x214   : > { %s5193_s17 = scalar_lea.vmem %s752_s28, 16  ;;  %s5200_s13 = scalar_lea.vmem %s752_s28, 32 }
 0x215   : > { %p5194_p13 = scmp.ne.s32.totalorder %s752_s28, %s5193_s17  ;;  %p5201_p6 = scmp.lt.s32.totalorder %s752_s28, %s752_s28 }
 0x216   : > { %p5202_p8 = scmp.lt.s32.totalorder %s5200_s13, %s5193_s17 }
 0x217   : > { %p5196_p4 = pnand %p5194_p13, %p6839_p0 }
 0x218   : > { %p5203_p5 = por %p5202_p8, %p5201_p6 }
 0x219   : > { %p5197_p7 = pneg %p5196_p4 }
 0x21b   : > { %p5204_p1 = pnand %p5203_p5, %p5197_p7 }
 0x21d   : > { %5207 = shalt.err (!%p5204_p1)
}
 0x21e   : > { %4408 = dma.hbm_to_vmem [thread:$0]  (!%p6840_p2), %s6845_s2, 16, %s752_s28, [#allocation27]  }
 0x21f   : > { %s5531_s9 = smov [#allocation31]   ;;  %s5532_s24 = smov [#allocation34]  }
 0x220   : > { %s775_s8 = sshll.u32 %s5531_s9, 4  ;;  %s799_s11 = sshll.u32 %s5532_s24, 4  ;;  %s776_s8 = int_to_ptr.vmem [resolvable:$true] %s775_s8  ;;  %s800_s11 = int_to_ptr.vmem [resolvable:$true] %s799_s11 }
 0x221   : > { %s6846_s21 = sld [smem:[#allocation78_spill]] }
 0x227   : > { %s5208_s14 = scalar_lea.hbm %s6846_s21, 32 }
 0x228   : > { %p5209_p12 = scmp.ne.s32.totalorder %s6846_s21, %s5208_s14  ;;  %p5215_p3 = scmp.lt.u32.totalorder %s5208_s14, %s6846_s21 }
 0x22a   : > { %p5211_p9 = pnand %p5209_p12, %p6839_p0 }
 0x22c   : > { %p5212_p10 = pneg %p5211_p9 }
 0x22e   : > { %p5217_p11 = pnand %p5215_p3, %p5212_p10 }
 0x230   : > { %5220 = shalt.err (!%p5217_p11)
}
 0x231   : > { %s5221_s28 = scalar_lea.vmem %s776_s8, 32  ;;  %p5229_p6 = scmp.lt.s32.totalorder %s776_s8, %s776_s8 }
 0x232   : > { %p5222_p13 = scmp.ne.s32.totalorder %s776_s8, %s5221_s28  ;;  %p5230_p8 = scmp.lt.s32.totalorder %s5221_s28, %s5221_s28 }
 0x234   : > { %p5224_p4 = pnand %p5222_p13, %p6839_p0  ;;  %p5231_p5 = por %p5230_p8, %p5229_p6 }
 0x236   : > { %p5225_p7 = pneg %p5224_p4 }
 0x238   : > { %p5232_p1 = pnand %p5231_p5, %p5225_p7 }
 0x23a   : > { %5235 = shalt.err (!%p5232_p1)
}
 0x23b   : > { %4414 = dma.hbm_to_vmem [thread:$0]  (!%p6840_p2), %s6846_s21, 32, %s776_s8, [#allocation30]  }
 0x23c   : > { %s6847_s24 = sld [smem:[#allocation80_spill]] }
 0x242   : > { %s6848_s6 = smov %s6847_s24  ;;  %s5236_s1 = scalar_lea.hbm %s6847_s24, 16 }
 0x243   : > { %p5237_p12 = scmp.ne.s32.totalorder %s6848_s6, %s5236_s1  ;;  %p5243_p3 = scmp.lt.u32.totalorder %s5236_s1, %s6848_s6 }
 0x245   : > { %p5239_p9 = pnand %p5237_p12, %p6839_p0 }
 0x247   : > { %p5240_p10 = pneg %p5239_p9 }
 0x249   : > { %p5245_p11 = pnand %p5243_p3, %p5240_p10 }
 0x24b   : > { %5248 = shalt.err (!%p5245_p11)
}
 0x24c   : > { %s5249_s12 = scalar_lea.vmem %s800_s11, 16  ;;  %s5256_s8 = scalar_lea.vmem %s800_s11, 32 }
 0x24d   : > { %p5250_p13 = scmp.ne.s32.totalorder %s800_s11, %s5249_s12  ;;  %p5257_p6 = scmp.lt.s32.totalorder %s800_s11, %s800_s11 }
 0x24e   : > { %p5258_p8 = scmp.lt.s32.totalorder %s5256_s8, %s5249_s12 }
 0x24f   : > { %p5252_p4 = pnand %p5250_p13, %p6839_p0 }
 0x250   : > { %p5259_p5 = por %p5258_p8, %p5257_p6 }
 0x251   : > { %p5253_p7 = pneg %p5252_p4 }
 0x253   : > { %p5260_p1 = pnand %p5259_p5, %p5253_p7 }
 0x255   : > { %5263 = shalt.err (!%p5260_p1)
}
 0x256   : > { %4420 = dma.hbm_to_vmem [thread:$0]  (!%p6840_p2), %s6848_s6, 16, %s800_s11, [#allocation33]  }
 0x257   : > { %s5533_s22 = smov [#allocation37]   ;;  %s3816_s1 = sshll.u32 %s5946_s3, 3 }
 0x258   : > { %s821_s24 = sshll.u32 %s5533_s22, 4  ;;  %s6849_s4 = sld [smem:[#allocation82_spill]]  ;;  %s822_s24 = int_to_ptr.vmem [resolvable:$true] %s821_s24 }
 0x25e   : > { %s6850_s28 = smov %s6849_s4  ;;  %s5264_s2 = scalar_lea.hbm %s6849_s4, 16 }
 0x25f   : > { %p5265_p12 = scmp.ne.s32.totalorder %s6850_s28, %s5264_s2  ;;  %p5271_p3 = scmp.lt.u32.totalorder %s5264_s2, %s6850_s28 }
 0x261   : > { %p5267_p9 = pnand %p5265_p12, %p6839_p0 }
 0x263   : > { %p5268_p10 = pneg %p5267_p9 }
 0x265   : > { %p5273_p11 = pnand %p5271_p3, %p5268_p10 }
 0x267   : > { %5276 = shalt.err (!%p5273_p11)
}
 0x268   : > { %s5277_s11 = scalar_lea.vmem %s822_s24, 16  ;;  %s5284_s14 = scalar_lea.vmem %s822_s24, 32 }
 0x269   : > { %p5278_p13 = scmp.ne.s32.totalorder %s822_s24, %s5277_s11  ;;  %p5285_p6 = scmp.lt.s32.totalorder %s822_s24, %s822_s24 }
 0x26a   : > { %p5286_p8 = scmp.lt.s32.totalorder %s5284_s14, %s5277_s11 }
 0x26b   : > { %p5280_p4 = pnand %p5278_p13, %p6839_p0 }
 0x26c   : > { %p5287_p5 = por %p5286_p8, %p5285_p6 }
 0x26d   : > { %p5281_p7 = pneg %p5280_p4 }
 0x26f   : > { %p5288_p1 = pnand %p5287_p5, %p5281_p7 }
 0x271   : > { %5291 = shalt.err (!%p5288_p1)
}
 0x272   : > { %4426 = dma.hbm_to_vmem [thread:$0]  (!%p6840_p2), %s6850_s28, 16, %s822_s24, [#allocation36]  }
 0x273   : > { %s3979_s2 = sshll.u32 %s5504_s5, 7  ;;  %s6851_s13 = sld [smem:[#allocation60_spill]] }
 0x274   : > { %s836_s12 = scalar_lea.vmem [#allocation2], %s3816_s1  ;;  %s833_s7 = scalar_lea.sflag [#allocation3], %s5946_s3 }
 0x275   : > { %s845_s8 = sshll.u32 %s836_s12, 4  ;;  %p6852_p12 = scmp.ne.s32.totalorder %s6835_s19, 0  ;;  %s6210_s8 = int_to_ptr.vmem [resolvable:$true] %s845_s8 }
 0x279   : > { %s6208_s4 = scalar_lea.hbm %s6851_s13, %s3979_s2  ;;  %s5297_s14 = scalar_lea.hbm %s6851_s13, 256 }
 0x27a   : > { %s5292_s9 = scalar_lea.hbm %s6208_s4, 128  ;;  %p5298_p10 = scmp.lt.u32.totalorder %s6208_s4, %s6851_s13 }
 0x27b   : > { %p5293_p0 = scmp.ne.s32.totalorder %s6208_s4, %s5292_s9  ;;  %p5299_p3 = scmp.lt.u32.totalorder %s5297_s14, %s5292_s9 }
 0x27c   : > { %p5301_p13 = scmp.lt.u32.totalorder %s5292_s9, %s6208_s4 }
 0x27d   : > { %p5295_p9 = pnand %p5293_p0, %p6852_p12  ;;  %p5300_p11 = por %p5299_p3, %p5298_p10 }
 0x27f   : > { %p5296_p2 = pneg %p5295_p9  ;;  %p5302_p4 = por %p5301_p13, %p5300_p11 }
 0x281   : > { %p5303_p7 = pnand %p5302_p4, %p5296_p2 }
 0x283   : > { %5306 = shalt.err (!%p5303_p7)
}
 0x284   : > { %s5307_s1 = scalar_lea.vmem %s6210_s8, 128  ;;  %s5534_s2 = smov [#allocation2]  }
 0x285   : > { %p5308_p6 = scmp.ne.s32.totalorder %s6210_s8, %s5307_s1  ;;  %s5312_s21 = sshll.u32 %s5534_s2, 4  ;;  %s5313_s21 = int_to_ptr.vmem [resolvable:$false] %s5312_s21 }
 0x286   : > { %s5314_s16 = scalar_lea.vmem %s5313_s21, 256  ;;  %p5315_p1 = scmp.lt.s32.totalorder %s6210_s8, %s5313_s21 }
 0x287   : > { %p5310_p8 = pnand %p5308_p6, %p6852_p12  ;;  %p5316_p0 = scmp.lt.s32.totalorder %s5314_s16, %s5307_s1 }
 0x289   : > { %p5311_p5 = pneg %p5310_p8  ;;  %p5317_p9 = por %p5316_p0, %p5315_p1 }
 0x28b   : > { %p5318_p10 = pnand %p5317_p9, %p5311_p5 }
 0x28d   : > { %5321 = shalt.err (!%p5318_p10)
}
 0x28e   : > { %p6853_p2 = scmp.ne.s32.totalorder %s6833_s27, 0  ;;  %s6854_s24 = sld [smem:[#allocation62_spill]] }
 0x28f   : > { %s880_s22 = scalar_lea.vmem [#allocation7], %s5954_s0 }
 0x290   : > { %4430 = dma.hbm_to_vmem [thread:$0]  (!%p6853_p2), %s6208_s4, 128, %s6210_s8, %s833_s7, %s6819_s10, %s6819_s10, %s6824_s20  }
 0x291   : > { %s887_s17 = sshll.u32 %s880_s22, 4  ;;  %s6246_s17 = int_to_ptr.vmem [resolvable:$true] %s887_s17 }
 0x294   : > { %s6855_s11 = smov %s6854_s24  ;;  %s6243_s14 = scalar_lea.hbm %s6854_s24, %s5957_s18 }
 0x295   : > { %s5322_s3 = scalar_lea.hbm %s6243_s14, 512  ;;  %s5327_s8 = scalar_lea.hbm %s6855_s11, 1024 }
 0x296   : > { %p5323_p3 = scmp.ne.s32.totalorder %s6243_s14, %s5322_s3  ;;  %p5328_p4 = scmp.lt.u32.totalorder %s6243_s14, %s6855_s11 }
 0x297   : > { %p5329_p7 = scmp.lt.u32.totalorder %s5327_s8, %s5322_s3  ;;  %p5331_p8 = scmp.lt.u32.totalorder %s5322_s3, %s6243_s14 }
 0x298   : > { %p5325_p11 = pnand %p5323_p3, %p6852_p12 }
 0x299   : > { %p5330_p6 = por %p5329_p7, %p5328_p4 }
 0x29a   : > { %p5326_p13 = pneg %p5325_p11 }
 0x29b   : > { %p5332_p5 = por %p5331_p8, %p5330_p6 }
 0x29d   : > { %p5333_p1 = pnand %p5332_p5, %p5326_p13 }
 0x29f   : > { %5336 = shalt.err (!%p5333_p1)
}
 0x2a0   : > { %s5337_s21 = scalar_lea.vmem %s6246_s17, 512  ;;  %s5535_s16 = smov [#allocation7]  }
 0x2a1   : > { %p5338_p0 = scmp.ne.s32.totalorder %s6246_s17, %s5337_s21  ;;  %s5342_s12 = sshll.u32 %s5535_s16, 4  ;;  %s5343_s12 = int_to_ptr.vmem [resolvable:$false] %s5342_s12 }
 0x2a2   : > { %s5344_s9 = scalar_lea.vmem %s5343_s12, 1024  ;;  %p5345_p3 = scmp.lt.s32.totalorder %s6246_s17, %s5343_s12 }
 0x2a3   : > { %p5340_p9 = pnand %p5338_p0, %p6852_p12  ;;  %p5346_p11 = scmp.lt.s32.totalorder %s5344_s9, %s5337_s21 }
 0x2a5   : > { %p5341_p10 = pneg %p5340_p9  ;;  %p5347_p4 = por %p5346_p11, %p5345_p3 }
 0x2a7   : > { %p5348_p7 = pnand %p5347_p4, %p5341_p10 }
 0x2a9   : > { %5351 = shalt.err (!%p5348_p7)
}
 0x2aa   : > { %4436 = dma.hbm_to_vmem [thread:$0]  (!%p6853_p2), %s6243_s14, 512, %s6246_s17, %s5970_s15, %s6819_s10, %s6819_s10, %s6824_s20  }
 0x2ab   : > { %s6856_s3 = sld [smem:[#allocation64_spill]]  ;;  %s922_s4 = scalar_lea.vmem [#allocation10], %s5954_s0 }
 0x2ac   : > { %s929_s8 = sshll.u32 %s922_s4, 4  ;;  %s6280_s8 = int_to_ptr.vmem [resolvable:$true] %s929_s8 }
 0x2b1   : > { %s6277_s1 = scalar_lea.hbm %s6856_s3, %s5957_s18  ;;  %s5357_s14 = scalar_lea.hbm %s6856_s3, 1024 }
 0x2b2   : > { %s5352_s7 = scalar_lea.hbm %s6277_s1, 512  ;;  %p5358_p5 = scmp.lt.u32.totalorder %s6277_s1, %s6856_s3 }
 0x2b3   : > { %p5353_p13 = scmp.ne.s32.totalorder %s6277_s1, %s5352_s7  ;;  %p5359_p1 = scmp.lt.u32.totalorder %s5357_s14, %s5352_s7 }
 0x2b4   : > { %p5361_p9 = scmp.lt.u32.totalorder %s5352_s7, %s6277_s1 }
 0x2b5   : > { %p5355_p6 = pnand %p5353_p13, %p6852_p12  ;;  %p5360_p0 = por %p5359_p1, %p5358_p5 }
 0x2b7   : > { %p5356_p8 = pneg %p5355_p6  ;;  %p5362_p10 = por %p5361_p9, %p5360_p0 }
 0x2b9   : > { %p5363_p3 = pnand %p5362_p10, %p5356_p8 }
 0x2bb   : > { %5366 = shalt.err (!%p5363_p3)
}
 0x2bc   : > { %s5367_s0 = scalar_lea.vmem %s6280_s8, 512  ;;  %s5536_s21 = smov [#allocation10]  }
 0x2bd   : > { %p5368_p11 = scmp.ne.s32.totalorder %s6280_s8, %s5367_s0  ;;  %s5372_s16 = sshll.u32 %s5536_s21, 4  ;;  %s5373_s16 = int_to_ptr.vmem [resolvable:$false] %s5372_s16 }
 0x2be   : > { %s5374_s12 = scalar_lea.vmem %s5373_s16, 1024  ;;  %p5375_p13 = scmp.lt.s32.totalorder %s6280_s8, %s5373_s16 }
 0x2bf   : > { %p5370_p4 = pnand %p5368_p11, %p6852_p12  ;;  %p5376_p6 = scmp.lt.s32.totalorder %s5374_s12, %s5367_s0 }
 0x2c1   : > { %p5371_p7 = pneg %p5370_p4  ;;  %p5377_p5 = por %p5376_p6, %p5375_p13 }
 0x2c3   : > { %p5378_p1 = pnand %p5377_p5, %p5371_p7 }
 0x2c5   : > { %5381 = shalt.err (!%p5378_p1)
}
 0x2c6   : > { %4442 = dma.hbm_to_vmem [thread:$0]  (!%p6853_p2), %s6277_s1, 512, %s6280_s8, %s6014_s29, %s6819_s10, %s6819_s10, %s6824_s20  }
 0x2c7   : > { %s6857_s19 = sld [smem:[#allocation56_spill]] }
 0x2cd   : > { %p6858_p12 = scmp.ne.s32.totalorder %s6857_s19, 0 }
 0x2ce   : > { %s6310_s9 = sand.u32 (!%p6858_p12), 1, %s5492_s30   ;;  %p6859_p8 = scmp.ne.s32.totalorder (!%p6858_p12), %s6828_s25, 0 }
 0x2cf   : > { %941 = sbr.rel (%p6858_p12) target bundleno = 8250 (0x203a), region = 112  ;;  %s3832_s24 = sshll.u32 (!%p6858_p12), %s6310_s9, 3 }
 0x2d0   : > { %s944_s22 = scalar_lea.sflag (!%p6858_p12), [#allocation3], %s6310_s9  ;;  %s6316_s27 = scalar_lea.vmem (!%p6858_p12), [#allocation2], %s3832_s24 }
 0x2d6   : > { %5435 = dma.done.wait (%p6859_p8), %s944_s22, 128  }
 0x2d7   : > { %5437 = vsyncadd (%p6859_p8), %s944_s22, 4294967168  ;;  %s952_s10 = sand.u32 1, %s5696_s26   ;;  %s3833_s20 = sshll.u32 %s6310_s9, 5 }
 0x2d8   : > { %s953_s29 = scalar_lea.sflag [#allocation6], %s952_s10  ;;  %s6324_s1 = scalar_lea.vmem [#allocation5], %s3833_s20 }
 0x2d9   : > { %5439 = dma.done.wait (%p6859_p8), %s953_s29, 1024  }
 0x2da   : > { %5441 = vsyncadd (%p6859_p8), %s953_s29, 4294966272  ;;  %s6330_s4 = scalar_lea.vmem [#allocation7], %s3833_s20  ;;  %s971_s8 = scalar_lea.sflag [#allocation9], %s952_s10 }
 0x2db   : > { %s6332_s7 = scalar_lea.vmem [#allocation8], %s3833_s20 }
 0x2dc   : > { %5443 = dma.done.wait (%p6859_p8), %s971_s8, 1024  }
 0x2dd   : > { %5445 = vsyncadd (%p6859_p8), %s971_s8, 4294966272  ;;  %s6338_s2 = scalar_lea.vmem [#allocation10], %s3833_s20  ;;  %p6860_p2 = scmp.eq.s32.totalorder %s5696_s26, 0 }
 0x2df   : > { %5447 = dma.done.wait (%p6860_p2), [#allocation12], 1040   ;;  %p6861_p0 = pmov %p6860_p2 }
 0x2e1   : > { %5449 = vsyncadd (%p6861_p0), [#allocation12], 4294966256  ;;  %p6862_p9 = pmov %p6861_p0 }
 0x2e2   : > { %p6863_p10 = pmov %p6861_p0 }
 0x2e3   : > { %5451 = dma.done.wait (%p6862_p9), [#allocation15], 1040  }
 0x2e4   : > { %5453 = vsyncadd (%p6863_p10), [#allocation15], 4294966256  ;;  %p6864_p3 = pmov %p6861_p0 }
 0x2e5   : > { %p6865_p11 = pmov %p6861_p0 }
 0x2e6   : > { %5455 = dma.done.wait (%p6864_p3), [#allocation18], 32  }
 0x2e7   : > { %5457 = vsyncadd (%p6865_p11), [#allocation18], 4294967264  ;;  %p6866_p4 = pmov %p6861_p0 }
 0x2e8   : > { %p6867_p7 = pmov %p6861_p0 }
 0x2e9   : > { %5459 = dma.done.wait (%p6866_p4), [#allocation21], 1040  }
 0x2ea   : > { %5461 = vsyncadd (%p6867_p7), [#allocation21], 4294966256  ;;  %p6868_p13 = pmov %p6861_p0 }
 0x2eb   : > { %p6869_p6 = pmov %p6861_p0 }
 0x2ec   : > { %5463 = dma.done.wait (%p6868_p13), [#allocation24], 1040  }
 0x2ed   : > { %5465 = vsyncadd (%p6869_p6), [#allocation24], 4294966256  ;;  %p6870_p5 = pmov %p6861_p0 }
 0x2ee   : > { %p6871_p1 = pmov %p6861_p0 }
 0x2ef   : > { %5467 = dma.done.wait (%p6870_p5), [#allocation27], 32  }
 0x2f0   : > { %5469 = vsyncadd (%p6871_p1), [#allocation27], 4294967264  ;;  %p6872_p12 = pmov %p6861_p0 }
 0x2f1   : > { %p6873_p8 = pmov %p6861_p0 }
 0x2f2   : > { %5471 = dma.done.wait (%p6872_p12), [#allocation30], 2080  }
 0x2f3   : > { %5473 = vsyncadd (%p6873_p8), [#allocation30], 4294965216  ;;  %p6874_p2 = pmov %p6861_p0 }
 0x2f5   : > { %5475 = dma.done.wait (%p6874_p2), [#allocation33], 2064  }
 0x2f6   : > { %5477 = vsyncadd (%p6861_p0), [#allocation33], 4294965232  ;;  %p6875_p9 = pmov %p6861_p0 }
 0x2f7   : > { %p6876_p10 = pmov %p6861_p0 }
 0x2f8   : > { %5479 = dma.done.wait (%p6875_p9), [#allocation36], 32  }
 0x2f9   : > { %5481 = vsyncadd (%p6876_p10), [#allocation36], 4294967264  ;;  %v5537_v0 = vmov 0.0   ;;  %vm5538_vm0 = vmmov 0   ;;  %v4562_v1 = vld [vmem:[#allocation11] sm:$0xff]   ;;  %v4563_v2 = vld [vmem:[#allocation11 + $0x8] sm:$0xff]   ;;  %v1178_v22 = vlaneseq }
 0x2fa   : > { %4088 = vmatprep.subr.bf16.mxu0 %v5537_v0  ;;  %4104 = vmatprep.mubr.msk.bf16.mxu0 %vm5538_vm0, %v5537_v0  ;;  %v4564_v3 = vld [vmem:[#allocation11 + $0x10] sm:$0xff]   ;;  %v4565_v4 = vld [vmem:[#allocation11 + $0x18] sm:$0xff]   ;;  %v4566_v5 = vld [vmem:[#allocation11 + $0x20] sm:$0xff]   ;;  %vm1333_vm1 = vcmask 261120   ;;  %vm1383_vm3 = vcmask 130048   ;;  %s5539_s26 = smov 96  }
 0x2fb   : > { %4108 = vmatprep.subr.bf16.mxu1 %v5537_v0  ;;  %4110 = vmatprep.mubr.msk.bf16.mxu1 %vm5538_vm0, %v5537_v0  ;;  %v4567_v6 = vld [vmem:[#allocation11 + $0x28] sm:$0xff]   ;;  %v4568_v7 = vld [vmem:[#allocation11 + $0x30] sm:$0xff]   ;;  %v4569_v8 = vld [vmem:[#allocation11 + $0x38] sm:$0xff]   ;;  %v6405_v23 = vshrl.u32 %v1178_v22, 7  ;;  %v6407_v24 = vand.u32 127, %v1178_v22  ;;  %s5540_s25 = smov 64  }
 0x2fc   : > { %4089 = vmatpush3.bf16.msra.mxu0 %v4562_v1  ;;  %v6389_v9 = vld [vmem:[%s6316_s27] sm:$0xff]   ;;  %v4571_v10 = vld [vmem:[%s6324_s1] sm:$0xff]   ;;  %v4573_v48 = vld [vmem:[%s6324_s1 + $0x8] sm:$0xff]   ;;  %s5541_s15 = smov 32   ;;  %s6877_s14 = sld [smem:[#allocation54_spill]] }
 0x2fd   : > { %4090 = vmatprep.subr.bf16.mxu0 %v5537_v0  ;;  %v1338_v11 = vsel %vm1333_vm1, %v4571_v10, 0  ;;  %v3856_v12 = vld [vmem:[#allocation13] ss:$0 sm:$0xff]  ;;  %v6410_v25 = vadd.s32 8, %v6405_v23  ;;  %vm1186_vm2 = vcmp.le.s32.totalorder %v6407_v24, %v6405_v23  ;;  %v1470_v53 = vsel %vm1333_vm1, %v4573_v48, 0  ;;  %s1137_s18 = scalar_lea.vmem [#allocation38], %s3832_s24 }
 0x2fe   : > { %4109 = vmatpush3.bf16.xpose.msra.mxu1 %v1338_v11  ;;  %v4572_v44 = vld [vmem:[%s6330_s4] sm:$0xff]   ;;  %s3450_s0 = sshll.u32 %s1137_s18, 4  ;;  %s6878_s12 = sld [smem:[#allocation83_spill]]  ;;  %s6655_s0 = int_to_ptr.vmem [resolvable:$true] %s3450_s0 }
 0x2ff   : > { %4114 = vmatprep.subr.bf16.mxu1 %v5537_v0  ;;  %vm1187_vm4 = vcmp.le.s32.totalorder %v6407_v24, %v6410_v25  ;;  %s3435_s22 = scalar_lea.sflag [#allocation4], %s6310_s9  ;;  %s5382_s27 = scalar_lea.vmem %s6655_s0, 128 }
 0x300   : > { %4091 = vmatpush3.bf16.msra.mxu0 %v4563_v2  ;;  %p5383_p3 = scmp.ne.s32.totalorder %s6655_s0, %s5382_s27  ;;  %p6879_p11 = scmp.ne.s32.totalorder %s6829_s23, 0 }
 0x301   : > { %4092 = vmatprep.subr.bf16.mxu0 %v5537_v0  ;;  %s5543_s24 = smov [#allocation38]  }
 0x302   : > { %s3986_s17 = sshll.u32 %s6877_s14, 7  ;;  %p5384_p4 = pnand %p5383_p3, %p6879_p11 }
 0x303   : > { %s5386_s10 = sshll.u32 %s5543_s24, 4  ;;  %s5387_s10 = int_to_ptr.vmem [resolvable:$false] %s5386_s10 }
 0x304   : > { %4093 = vmatpush3.bf16.msra.mxu0 %v4564_v3  ;;  %s6653_s19 = scalar_lea.hbm %s6878_s12, %s3986_s17  ;;  %p5385_p7 = pneg %p5384_p4 }
 0x305   : > { %4094 = vmatprep.subr.bf16.mxu0 %v5537_v0  ;;  %s5388_s20 = scalar_lea.vmem %s5387_s10, 256  ;;  %p5389_p13 = scmp.lt.s32.totalorder %s6655_s0, %s5387_s10 }
 0x306   : > { %p5390_p6 = scmp.lt.s32.totalorder %s5388_s20, %s5382_s27 }
 0x308   : > { %4095 = vmatpush3.bf16.msra.mxu0 %v4565_v4  ;;  %p5391_p5 = por %p5390_p6, %p5389_p13 }
 0x309   : > { %4096 = vmatprep.subr.bf16.mxu0 %v5537_v0 }
 0x30a   : > { %p5392_p1 = pnand %p5391_p5, %p5385_p7 }
 0x30c   : > { %4097 = vmatpush3.bf16.msra.mxu0 %v4566_v5 }
 0x30d   : > { %4098 = vmatprep.subr.bf16.mxu0 %v5537_v0 }
 0x310   : > { %4099 = vmatpush3.bf16.msra.mxu0 %v4567_v6 }
 0x311   : > { %4100 = vmatprep.subr.bf16.mxu0 %v5537_v0 }
 0x314   : > { %4101 = vmatpush3.bf16.msra.mxu0 %v4568_v7 }
 0x315   : > { %4102 = vmatprep.subr.bf16.mxu0 %v5537_v0 }
 0x318   : > { %4103 = vmatpush3.bf16.msra.mxu0 %v4569_v8 }
 0x319   : > { %4132 = vmatprep.subr.bf16.mxu0 %v5537_v0 }
 0x31b   : > { %4105 = vmatmul.mubr.bf16.vlgmr.msra.gmra.mrb[0].mxu0 %v6389_v9 }
 0x31c   : > { %4136 = vmatprep.mubr.msk.bf16.mxu0 %vm5538_vm0, %v5537_v0 }
 0x3ee   : > { %v1318_v13 = vpop.f32.mrb[0].mxu0 }
 0x3ef   : > { %v1319_v14 = vadd.f32 %v3856_v12, %v1318_v13  ;;  %v4106_v15 = vpop.f32.mrb[1].mxu0 }
 0x3f0   : > { %v1321_v16 = vpop.f32.mrb[2].mxu0 }
 0x3f1   : > { %v1322_v17 = vadd.f32 %v3856_v12, %v1321_v16  ;;  %v4107_v18 = vpop.f32.mrb[3].mxu0  ;;  %v1325_v19 = vmul.f32 0.17677669, %v1319_v14  ;;  %v4574_v16 = vld [vmem:[%s6330_s4 + $0x8] sm:$0xff]  }
 0x3f2   : > { %v4578_v18 = vld [vmem:[#allocation14 + $0x18] sm:$0xff]  }
 0x3f3   : > { %v1326_v20 = vmul.f32 0.17677669, %v1322_v17  ;;  %v4577_v17 = vld [vmem:[#allocation14 + $0x10] sm:$0xff]  }
 0x3f4   : > { %4133 = vmatpush3.bf16.msra.mxu0 %v4577_v17  ;;  %v4583_v17 = vld [vmem:[#allocation14 + $0x28] sm:$0xff]  }
 0x3f5   : > { %v6399_v21 = vpack.c.bf16 %v1326_v20, %v1325_v19  ;;  %4134 = vmatprep.subr.bf16.mxu0 %v5537_v0 }
 0x3f7   : > { %4111 = vmatmul.mubr.msk.bf16.vlgmr.msra.gmra.mrb[0].mxu1 %vm1333_vm1, %v6399_v21 }
 0x3f8   : > { %4116 = vmatprep.mubr.msk.bf16.mxu1 %vm5538_vm0, %v5537_v0  ;;  %4115 = vmatpush3.bf16.msra.mxu1 %v4572_v44 }
 0x3f9   : > { %4120 = vmatprep.subr.bf16.mxu1 %v5537_v0  ;;  %4135 = vmatpush3.bf16.msra.mxu0 %v4578_v18 }
 0x3fa   : > { %4148 = vmatprep.subr.bf16.mxu0 %v5537_v0 }
 0x4ca   : > { %v1374_v26 = vpop.f32.mrb[0].mxu1 }
 0x4cb   : > { %v1381_v27 = vsel %vm1186_vm2, %v1374_v26, -1e+09  ;;  %v4112_v28 = vpop.f32.mrb[1].mxu1 }
 0x4cc   : > { %v1377_v29 = vpop.f32.mrb[2].mxu1  ;;  %v1384_v30 = vsel %vm1383_vm3, %v1381_v27, -inf }
 0x4cd   : > { %v1382_v31 = vsel %vm1187_vm4, %v1377_v29, -1e+09  ;;  %1385 = vmax.xlane.f32.xlu0 %v1384_v30  ;;  %v4113_v32 = vpop.f32.mrb[3].mxu1  ;;  %v4575_v29 = vld [vmem:[#allocation14] sm:$0xff]  }
 0x4ce   : > { %v1387_v33 = vsel %vm1383_vm3, %v1382_v31, -inf  ;;  %v4579_v32 = vld [vmem:[%s6324_s1 + $0x10] sm:$0xff]  }
 0x4d1   : > { %1388 = vmax.xlane.f32.xlu0 %v1387_v33 }
 0x4e7   : > { %1459 = vrot.lane.b32.xlu0 %v6399_v21, %s5539_s26 }
 0x55a   : > { %v1386_v34 = vpop.xlane.xlu0 %1385 }
 0x55b   : > { %v1390_v35 = vsub.f32 %v1381_v27, %v1386_v34 }
 0x55d   : > { %v1392_v36 = vmul.f32 1.442695, %v1390_v35 }
 0x55e   : > { %v1389_v37 = vpop.xlane.xlu0 %1388 }
 0x55f   : > { %4652 = vpow2.f32 %v1392_v36  ;;  %v1391_v38 = vsub.f32 %v1382_v31, %v1389_v37  ;;  %v4576_v31 = vld [vmem:[#allocation14 + $0x8] sm:$0xff]  }
 0x561   : > { %v1394_v39 = vmul.f32 1.442695, %v1391_v38  ;;  %v1712_v38 = vsel %vm1333_vm1, %v4579_v32, 0 }
 0x562   : > { %v1460_v54 = vpop.permute.xlu0 %1459 }
 0x563   : > { %4654 = vpow2.f32 %v1394_v39 }
 0x569   : > { %v4653_v40 = vpop.eup %4652 }
 0x56a   : > { %v1396_v41 = vsel %vm1383_vm3, %v4653_v40, 0.0 }
 0x56b   : > { %1397 = vadd.xlane.f32.xlu1 %v1396_v41 }
 0x56d   : > { %v4655_v42 = vpop.eup %4654 }
 0x56e   : > { %v1399_v43 = vsel %vm1383_vm3, %v4655_v42, 0.0 }
 0x56f   : > { %1400 = vadd.xlane.f32.xlu1 %v1399_v43 }
 0x5f8   : > { %v1398_v45 = vpop.xlane.xlu1 %1397 }
 0x5f9   : > { %4656 = vrcp.f32 %v1398_v45 }
 0x5fc   : > { %v1401_v46 = vpop.xlane.xlu1 %1400 }
 0x5fd   : > { %4658 = vrcp.f32 %v1401_v46 }
 0x603   : > { %v4657_v47 = vpop.eup %4656 }
 0x604   : > { %v1404_v50 = vmul.f32 %v4657_v47, %v4653_v40 }
 0x607   : > { %v4659_v49 = vpop.eup %4658 }
 0x608   : > { %v1405_v51 = vmul.f32 %v4659_v49, %v4655_v42 }
 0x60a   : > { %v1406_v52 = vpack.c.bf16 %v1405_v51, %v1404_v50 }
 0x60c   : > { %4117 = vmatmul.mubr.msk.bf16.vlgmr.msra.gmra.mrb[4].mxu1 %vm1383_vm3, %v1406_v52 }
 0x60d   : > { %4121 = vmatpush3.bf16.xpose.msra.mxu1 %v1470_v53  ;;  %4122 = vmatprep.mubr.msk.bf16.mxu1 %vm5538_vm0, %v5537_v0 }
 0x60e   : > { %4126 = vmatprep.subr.bf16.mxu1 %v5537_v0 }
 0x614   : > { %4123 = vmatmul.mubr.msk.bf16.vlgmr.msra.gmra.mrb[8].mxu1 %vm1333_vm1, %v1460_v54 }
 0x615   : > { %4128 = vmatprep.mubr.msk.bf16.mxu1 %vm5538_vm0, %v5537_v0  ;;  %4127 = vmatpush3.bf16.msra.mxu1 %v4574_v16 }
 0x616   : > { %4140 = vmatprep.subr.bf16.mxu1 %v5537_v0 }
 0x6df   : > { %v1450_v55 = vpop.f32.mrb[4].mxu1 }
 0x6e0   : > { %v4118_v56 = vpop.f32.mrb[5].mxu1 }
 0x6e1   : > { %v1453_v57 = vpop.f32.mrb[6].mxu1 }
 0x6e2   : > { %v1457_v58 = vpack.c.bf16 %v1453_v57, %v1450_v55  ;;  %v4119_v59 = vpop.f32.mrb[7].mxu1 }
 0x6e7   : > { %v1506_v60 = vpop.f32.mrb[8].mxu1 }
 0x6e8   : > { %v1513_v61 = vsel %vm1186_vm2, %v1506_v60, -1e+09  ;;  %v4124_v62 = vpop.f32.mrb[9].mxu1 }
 0x6e9   : > { %v1509_v63 = vpop.f32.mrb[10].mxu1  ;;  %v1515_v1 = vsel %vm1383_vm3, %v1513_v61, -inf }
 0x6ea   : > { %v1514_v2 = vsel %vm1187_vm4, %v1509_v63, -1e+09  ;;  %1516 = vmax.xlane.f32.xlu1 %v1515_v1  ;;  %v4125_v3 = vpop.f32.mrb[11].mxu1 }
 0x6eb   : > { %v1518_v4 = vsel %vm1383_vm3, %v1514_v2, -inf }
 0x6ee   : > { %1519 = vmax.xlane.f32.xlu1 %v1518_v4 }
 0x777   : > { %v1517_v5 = vpop.xlane.xlu1 %1516 }
 0x778   : > { %v1521_v6 = vsub.f32 %v1513_v61, %v1517_v5  ;;  %v4580_v5 = vld [vmem:[%s6330_s4 + $0x10] sm:$0xff]  }
 0x77a   : > { %v1523_v7 = vmul.f32 1.442695, %v1521_v6  ;;  %v4582_v6 = vld [vmem:[#allocation14 + $0x20] sm:$0xff]  }
 0x77b   : > { %v1520_v8 = vpop.xlane.xlu1 %1519 }
 0x77c   : > { %4660 = vpow2.f32 %v1523_v7  ;;  %v1522_v10 = vsub.f32 %v1514_v2, %v1520_v8 }
 0x77e   : > { %v1525_v11 = vmul.f32 1.442695, %v1522_v10 }
 0x780   : > { %4662 = vpow2.f32 %v1525_v11  ;;  %v4581_v11 = vld [vmem:[%s6324_s1 + $0x18] sm:$0xff]  }
 0x781   : > { %v1900_v16 = vsel %vm1333_vm1, %v4581_v11, 0  ;;  %v1144_v11 = vunpack.c.h.bf16 %v6389_v9 }
 0x786   : > { %v4661_v12 = vpop.eup %4660 }
 0x787   : > { %v1527_v13 = vsel %vm1383_vm3, %v4661_v12, 0.0 }
 0x788   : > { %1528 = vadd.xlane.f32.xlu1 %v1527_v13 }
 0x78a   : > { %v4663_v14 = vpop.eup %4662 }
 0x78b   : > { %v1530_v15 = vsel %vm1383_vm3, %v4663_v14, 0.0 }
 0x78c   : > { %1531 = vadd.xlane.f32.xlu1 %v1530_v15 }
 0x79d   : > { %1701 = vrot.lane.b32.xlu1 %v6399_v21, %s5540_s25 }
 0x815   : > { %v1529_v19 = vpop.xlane.xlu1 %1528 }
 0x816   : > { %4664 = vrcp.f32 %v1529_v19 }
 0x819   : > { %v1532_v20 = vpop.xlane.xlu1 %1531 }
 0x81a   : > { %4666 = vrcp.f32 %v1532_v20 }
 0x81d   : > { %v1702_v43 = vpop.permute.xlu1 %1701 }
 0x820   : > { %v4665_v22 = vpop.eup %4664 }
 0x821   : > { %v1535_v27 = vmul.f32 %v4665_v22, %v4661_v12 }
 0x824   : > { %v4667_v26 = vpop.eup %4666 }
 0x825   : > { %v1536_v28 = vmul.f32 %v4667_v26, %v4663_v14 }
 0x827   : > { %v1537_v30 = vpack.c.bf16 %v1536_v28, %v1535_v27 }
 0x829   : > { %4129 = vmatmul.mubr.msk.bf16.vlgmr.msra.gmra.mrb[12].mxu1 %vm1383_vm3, %v1537_v30 }
 0x82a   : > { %4141 = vmatpush3.bf16.msra.mxu1 %v4575_v29  ;;  %4144 = vmatprep.mubr.msk.bf16.mxu1 %vm5538_vm0, %v5537_v0 }
 0x82b   : > { %4142 = vmatprep.subr.bf16.mxu1 %v5537_v0 }
 0x82e   : > { %4143 = vmatpush3.bf16.msra.mxu1 %v4576_v31 }
 0x82f   : > { %4154 = vmatprep.subr.bf16.mxu1 %v5537_v0 }
 0x831   : > { %4145 = vmatmul.mubr.msk.bf16.vlgmr.msra.gmra.mrb[16].mxu1 %vm1333_vm1, %v1457_v58 }
 0x832   : > { %4156 = vmatprep.mubr.msk.bf16.mxu1 %vm5538_vm0, %v5537_v0  ;;  %4155 = vmatpush3.bf16.msra.mxu1 %v4580_v5  ;;  %v1143_v5 = vunpack.c.l.bf16 %v6389_v9  ;;  %v4588_v9 = vld [vmem:[#allocation20 + $0x8] sm:$0xff]  }
 0x833   : > { %4168 = vmatprep.subr.bf16.mxu1 %v5537_v0 }
 0x8fc   : > { %v1581_v33 = vpop.f32.mrb[12].mxu1 }
 0x8fd   : > { %v4130_v34 = vpop.f32.mrb[13].mxu1 }
 0x8fe   : > { %v1584_v35 = vpop.f32.mrb[14].mxu1 }
 0x8ff   : > { %v1588_v36 = vpack.c.bf16 %v1584_v35, %v1581_v33  ;;  %v4131_v37 = vpop.f32.mrb[15].mxu1 }
 0x901   : > { %4137 = vmatmul.mubr.msk.bf16.vlgmr.msra.gmra.mrb[4].mxu0 %vm1333_vm1, %v1588_v36 }
 0x902   : > { %4149 = vmatpush3.bf16.xpose.msra.mxu0 %v1712_v38  ;;  %4150 = vmatprep.mubr.msk.bf16.mxu0 %vm5538_vm0, %v5537_v0 }
 0x903   : > { %4160 = vmatprep.subr.bf16.mxu0 %v5537_v0 }
 0x904   : > { %v1694_v39 = vpop.f32.mrb[16].mxu1 }
 0x905   : > { %v4146_v40 = vpop.f32.mrb[17].mxu1 }
 0x906   : > { %v1697_v41 = vpop.f32.mrb[18].mxu1 }
 0x907   : > { %v4147_v42 = vpop.f32.mrb[19].mxu1 }
 0x909   : > { %4151 = vmatmul.mubr.msk.bf16.vlgmr.msra.gmra.mrb[8].mxu0 %vm1333_vm1, %v1702_v43  ;;  %v4584_v43 = vld [vmem:[%s6330_s4 + $0x18] sm:$0xff]  }
 0x90a   : > { %4164 = vmatprep.mubr.msk.bf16.mxu0 %vm5538_vm0, %v5537_v0  ;;  %4161 = vmatpush3.bf16.msra.mxu0 %v4582_v6 }
 0x90b   : > { %4162 = vmatprep.subr.bf16.mxu0 %v5537_v0 }
 0x90e   : > { %4163 = vmatpush3.bf16.msra.mxu0 %v4583_v17 }
 0x90f   : > { %4174 = vmatprep.subr.bf16.mxu0 %v5537_v0 }
 0x9d4   : > { %v1638_v44 = vpop.f32.mrb[4].mxu0 }
 0x9d5   : > { %v6472_v45 = vadd.f32 %v1694_v39, %v1638_v44  ;;  %v4138_v46 = vpop.f32.mrb[5].mxu0  ;;  %v4585_v44 = vld [vmem:[#allocation14 + $0x30] sm:$0xff]  }
 0x9d6   : > { %v1641_v47 = vpop.f32.mrb[6].mxu0 }
 0x9d7   : > { %v6474_v48 = vadd.f32 %v1697_v41, %v1641_v47  ;;  %v4139_v49 = vpop.f32.mrb[7].mxu0 }
 0x9dc   : > { %v1748_v50 = vpop.f32.mrb[8].mxu0 }
 0x9dd   : > { %v1755_v51 = vsel %vm1186_vm2, %v1748_v50, -1e+09  ;;  %v4152_v52 = vpop.f32.mrb[9].mxu0 }
 0x9de   : > { %v1751_v53 = vpop.f32.mrb[10].mxu0  ;;  %v1757_v54 = vsel %vm1383_vm3, %v1755_v51, -inf }
 0x9df   : > { %v1756_v55 = vsel %vm1187_vm4, %v1751_v53, -1e+09  ;;  %1758 = vmax.xlane.f32.xlu0 %v1757_v54  ;;  %v4153_v56 = vpop.f32.mrb[11].mxu0 }
 0x9e0   : > { %v1760_v57 = vsel %vm1383_vm3, %v1756_v55, -inf }
 0x9e1   : > { %1761 = vmax.xlane.f32.xlu1 %v1760_v57 }
 0xa6c   : > { %v1759_v58 = vpop.xlane.xlu0 %1758 }
 0xa6d   : > { %v1763_v59 = vsub.f32 %v1755_v51, %v1759_v58 }
 0xa6e   : > { %v1762_v60 = vpop.xlane.xlu1 %1761 }
 0xa6f   : > { %v1765_v61 = vmul.f32 1.442695, %v1763_v59  ;;  %v1764_v62 = vsub.f32 %v1756_v55, %v1762_v60 }
 0xa71   : > { %4668 = vpow2.f32 %v1765_v61  ;;  %v1767_v63 = vmul.f32 1.442695, %v1764_v62 }
 0xa73   : > { %4670 = vpow2.f32 %v1767_v63 }
 0xa7b   : > { %v4669_v1 = vpop.eup %4668 }
 0xa7c   : > { %v1769_v2 = vsel %vm1383_vm3, %v4669_v1, 0.0 }
 0xa7d   : > { %v4671_v3 = vpop.eup %4670  ;;  %1770 = vadd.xlane.f32.xlu0 %v1769_v2 }
 0xa7e   : > { %v1772_v4 = vsel %vm1383_vm3, %v4671_v3, 0.0 }
 0xa81   : > { %1773 = vadd.xlane.f32.xlu0 %v1772_v4 }
 0xa97   : > { %1889 = vrot.lane.b32.xlu0 %v6399_v21, %s5541_s15 }
 0xb0a   : > { %v1771_v7 = vpop.xlane.xlu0 %1770 }
 0xb0b   : > { %4672 = vrcp.f32 %v1771_v7 }
 0xb0e   : > { %v1774_v8 = vpop.xlane.xlu0 %1773 }
 0xb0f   : > { %4674 = vrcp.f32 %v1774_v8 }
 0xb12   : > { %v1890_v21 = vpop.permute.xlu0 %1889 }
 0xb15   : > { %v4673_v10 = vpop.eup %4672 }
 0xb16   : > { %v1777_v13 = vmul.f32 %v4673_v10, %v4669_v1  ;;  %v3894_v1 = vld [vmem:[#allocation16] ss:$0 sm:$0xff] }
 0xb19   : > { %v4675_v12 = vpop.eup %4674 }
 0xb1a   : > { %v1778_v14 = vmul.f32 %v4675_v12, %v4671_v3 }
 0xb1c   : > { %v1779_v15 = vpack.c.bf16 %v1778_v14, %v1777_v13 }
 0xb1e   : > { %4157 = vmatmul.mubr.msk.bf16.vlgmr.msra.gmra.mrb[20].mxu1 %vm1383_vm3, %v1779_v15  ;;  %v4587_v15 = vld [vmem:[#allocation20] sm:$0xff]  }
 0xb1f   : > { %4169 = vmatpush3.bf16.xpose.msra.mxu1 %v1900_v16  ;;  %4170 = vmatprep.mubr.msk.bf16.mxu1 %vm5538_vm0, %v5537_v0 }
 0xb20   : > { %4180 = vmatprep.subr.bf16.mxu1 %v5537_v0 }
 0xb26   : > { %4171 = vmatmul.mubr.msk.bf16.vlgmr.msra.gmra.mrb[24].mxu1 %vm1333_vm1, %v1890_v21 }
 0xb27   : > { %4184 = vmatprep.mubr.msk.bf16.mxu1 %vm5538_vm0, %v5537_v0  ;;  %4181 = vmatpush3.bf16.msra.mxu1 %v4585_v44 }
 0xb28   : > { %4182 = vmatprep.subr.bf16.mxu1 %v5537_v0 }
 0xbf1   : > { %v1823_v18 = vpop.f32.mrb[20].mxu1 }
 0xbf2   : > { %v4158_v19 = vpop.f32.mrb[21].mxu1 }
 0xbf3   : > { %v1826_v20 = vpop.f32.mrb[22].mxu1 }
 0xbf4   : > { %v1830_v22 = vpack.c.bf16 %v1826_v20, %v1823_v18  ;;  %v4159_v26 = vpop.f32.mrb[23].mxu1 }
 0xbf6   : > { %4165 = vmatmul.mubr.msk.bf16.vlgmr.msra.gmra.mrb[12].mxu0 %vm1333_vm1, %v1830_v22 }
 0xbf7   : > { %4176 = vmatprep.mubr.msk.bf16.mxu0 %vm5538_vm0, %v5537_v0  ;;  %4175 = vmatpush3.bf16.msra.mxu0 %v4584_v43  ;;  %v3896_v43 = vld [vmem:[#allocation19] ss:$0 sm:$0xff] }
 0xbf8   : > { %4188 = vmatprep.subr.bf16.mxu0 %v5537_v0 }
 0xbf9   : > { %v1936_v27 = vpop.f32.mrb[24].mxu1 }
 0xbfa   : > { %v1943_v28 = vsel %vm1186_vm2, %v1936_v27, -1e+09  ;;  %v4172_v29 = vpop.f32.mrb[25].mxu1  ;;  %v4589_v27 = vld [vmem:[#allocation20 + $0x10] sm:$0xff]  }
 0xbfb   : > { %v1939_v30 = vpop.f32.mrb[26].mxu1  ;;  %v1945_v31 = vsel %vm1383_vm3, %v1943_v28, -inf  ;;  %v4591_v29 = vld [vmem:[#allocation20 + $0x20] sm:$0xff]  }
 0xbfc   : > { %v1944_v32 = vsel %vm1187_vm4, %v1939_v30, -1e+09  ;;  %1946 = vmax.xlane.f32.xlu1 %v1945_v31  ;;  %v4173_v33 = vpop.f32.mrb[27].mxu1  ;;  %v4592_v30 = vld [vmem:[#allocation20 + $0x28] sm:$0xff]   ;;  %v4593_v31 = vld [vmem:[#allocation20 + $0x30] sm:$0xff]  }
 0xbfd   : > { %v1948_v34 = vsel %vm1383_vm3, %v1944_v32, -inf }
 0xc00   : > { %1949 = vmax.xlane.f32.xlu1 %v1948_v34 }
 0xc89   : > { %v1947_v35 = vpop.xlane.xlu1 %1946 }
 0xc8a   : > { %v1951_v36 = vsub.f32 %v1943_v28, %v1947_v35  ;;  %v4590_v28 = vld [vmem:[#allocation20 + $0x18] sm:$0xff]  }
 0xc8c   : > { %v1953_v37 = vmul.f32 1.442695, %v1951_v36 }
 0xc8d   : > { %v1950_v38 = vpop.xlane.xlu1 %1949 }
 0xc8e   : > { %4676 = vpow2.f32 %v1953_v37  ;;  %v1952_v39 = vsub.f32 %v1944_v32, %v1950_v38  ;;  %v4594_v32 = vld [vmem:[#allocation20 + $0x38] sm:$0xff]  }
 0xc90   : > { %v1955_v40 = vmul.f32 1.442695, %v1952_v39 }
 0xc92   : > { %4678 = vpow2.f32 %v1955_v40 }
 0xc98   : > { %v4677_v41 = vpop.eup %4676 }
 0xc99   : > { %v1957_v42 = vsel %vm1383_vm3, %v4677_v41, 0.0 }
 0xc9a   : > { %1958 = vadd.xlane.f32.xlu1 %v1957_v42 }
 0xc9c   : > { %v4679_v24 = vpop.eup %4678 }
 0xc9d   : > { %v1960_v25 = vsel %vm1383_vm3, %v4679_v24, 0.0 }
 0xc9e   : > { %1961 = vadd.xlane.f32.xlu1 %v1960_v25 }
 0xcc9   : > { %v1880_v46 = vpop.f32.mrb[12].mxu0 }
 0xcca   : > { %v1887_v47 = vadd.f32 %v1880_v46, %v6472_v45  ;;  %v4166_v49 = vpop.f32.mrb[13].mxu0  ;;  %v4586_v45 = vld [vmem:[#allocation14 + $0x38] sm:$0xff]  }
 0xccb   : > { %v1883_v50 = vpop.f32.mrb[14].mxu0  ;;  %4183 = vmatpush3.bf16.msra.mxu1 %v4586_v45 }
 0xccc   : > { %v1888_v51 = vadd.f32 %v1883_v50, %v6474_v48  ;;  %v4167_v52 = vpop.f32.mrb[15].mxu0  ;;  %4208 = vmatprep.subr.bf16.mxu1 %v5537_v0  ;;  %v4595_v50 = vld [vmem:[%s6332_s7] sm:$0xff]  }
 0xccd   : > { %v3897_v52 = vld [vmem:[#allocation22] ss:$0 sm:$0xff] }
 0xd27   : > { %v1959_v53 = vpop.xlane.xlu1 %1958 }
 0xd28   : > { %4680 = vrcp.f32 %v1959_v53 }
 0xd2b   : > { %v1962_v54 = vpop.xlane.xlu1 %1961 }
 0xd2c   : > { %4682 = vrcp.f32 %v1962_v54 }
 0xd32   : > { %v4681_v55 = vpop.eup %4680 }
 0xd33   : > { %v1965_v57 = vmul.f32 %v4681_v55, %v4677_v41  ;;  %v3895_v41 = vld [vmem:[#allocation17] ss:$0 sm:$0xff] }
 0xd36   : > { %v4683_v56 = vpop.eup %4682 }
 0xd37   : > { %v1966_v58 = vmul.f32 %v4683_v56, %v4679_v24 }
 0xd39   : > { %v1967_v59 = vpack.c.bf16 %v1966_v58, %v1965_v57 }
 0xd3b   : > { %4177 = vmatmul.mubr.msk.bf16.vlgmr.msra.gmra.mrb[16].mxu0 %vm1383_vm3, %v1967_v59 }
 0xd3c   : > { %4204 = vmatprep.mubr.msk.bf16.mxu0 %vm5538_vm0, %v5537_v0  ;;  %4189 = vmatpush3.bf16.msra.mxu0 %v4587_v15 }
 0xd3d   : > { %4190 = vmatprep.subr.bf16.mxu0 %v5537_v0 }
 0xd40   : > { %4191 = vmatpush3.bf16.msra.mxu0 %v4588_v9 }
 0xd41   : > { %4192 = vmatprep.subr.bf16.mxu0 %v5537_v0 }
 0xd44   : > { %4193 = vmatpush3.bf16.msra.mxu0 %v4589_v27 }
 0xd45   : > { %4194 = vmatprep.subr.bf16.mxu0 %v5537_v0 }
 0xd48   : > { %4195 = vmatpush3.bf16.msra.mxu0 %v4590_v28 }
 0xd49   : > { %4196 = vmatprep.subr.bf16.mxu0 %v5537_v0 }
 0xd4c   : > { %4197 = vmatpush3.bf16.msra.mxu0 %v4591_v29 }
 0xd4d   : > { %4198 = vmatprep.subr.bf16.mxu0 %v5537_v0 }
 0xd50   : > { %4199 = vmatpush3.bf16.msra.mxu0 %v4592_v30 }
 0xd51   : > { %4200 = vmatprep.subr.bf16.mxu0 %v5537_v0 }
 0xd54   : > { %4201 = vmatpush3.bf16.msra.mxu0 %v4593_v31 }
 0xd55   : > { %4202 = vmatprep.subr.bf16.mxu0 %v5537_v0 }
 0xd58   : > { %4203 = vmatpush3.bf16.msra.mxu0 %v4594_v32 }
 0xd59   : > { %4232 = vmatprep.subr.bf16.mxu0 %v5537_v0 }
 0xe0e   : > { %v2011_v48 = vpop.f32.mrb[16].mxu0 }
 0xe0f   : > { %v4178_v60 = vpop.f32.mrb[17].mxu0 }
 0xe10   : > { %v2014_v61 = vpop.f32.mrb[18].mxu0 }
 0xe11   : > { %v2018_v62 = vpack.c.bf16 %v2014_v61, %v2011_v48  ;;  %v4179_v63 = vpop.f32.mrb[19].mxu0 }
 0xe13   : > { %4185 = vmatmul.mubr.msk.bf16.vlgmr.msra.gmra.mrb[28].mxu1 %vm1333_vm1, %v2018_v62 }
 0xe14   : > { %4210 = vmatprep.mubr.msk.bf16.mxu1 %vm5538_vm0, %v5537_v0 }
 0xee6   : > { %v2068_v2 = vpop.f32.mrb[28].mxu1 }
 0xee7   : > { %v2075_v3 = vadd.f32 %v2068_v2, %v1887_v47  ;;  %v4186_v4 = vpop.f32.mrb[29].mxu1 }
 0xee8   : > { %v2071_v6 = vpop.f32.mrb[30].mxu1 }
 0xee9   : > { %v2083_v7 = vadd.f32 %v3894_v1, %v2075_v3  ;;  %v2076_v8 = vadd.f32 %v2071_v6, %v1888_v51  ;;  %v4187_v10 = vpop.f32.mrb[31].mxu1  ;;  %v2270_v51 = vsel %vm1333_vm1, %v4595_v50, 0  ;;  %v4598_v50 = vld [vmem:[%s6338_s2 + $0x8] sm:$0xff]  }
 0xeea   : > { %4209 = vmatpush3.bf16.xpose.msra.mxu1 %v2270_v51  ;;  %v4601_v51 = vld [vmem:[#allocation23 + $0x10] sm:$0xff]  }
 0xeeb   : > { %v2084_v12 = vadd.f32 %v3894_v1, %v2076_v8  ;;  %v2085_v13 = vadd.f32 %v2083_v7, %v1143_v5  ;;  %4214 = vmatprep.subr.bf16.mxu1 %v5537_v0 }
 0xeed   : > { %2087 = vadd.xlane.f32.xlu0 %v2085_v13  ;;  %v2086_v14 = vadd.f32 %v2084_v12, %v1144_v11 }
 0xeef   : > { %2089 = vadd.xlane.f32.xlu1 %v2086_v14 }
 0xf7a   : > { %v2088_v16 = vpop.xlane.xlu0 %2087 }
 0xf7b   : > { %v2092_v21 = vmul.f32 0.0078125, %v2088_v16 }
 0xf7c   : > { %v2090_v17 = vpop.xlane.xlu1 %2089 }
 0xf7d   : > { %v2094_v18 = vsub.f32 %v2085_v13, %v2092_v21  ;;  %v2093_v19 = vmul.f32 0.0078125, %v2090_v17  ;;  %v4597_v17 = vld [vmem:[%s6332_s7 + $0x8] sm:$0xff]  }
 0xf7f   : > { %v2095_v20 = vsub.f32 %v2086_v14, %v2093_v19  ;;  %v2096_v22 = vmul.f32 %v2094_v18, %v2094_v18  ;;  %v4596_v14 = vld [vmem:[%s6338_s2] sm:$0xff]  }
 0xf81   : > { %2098 = vadd.xlane.f32.xlu1 %v2096_v22  ;;  %v2097_v26 = vmul.f32 %v2095_v20, %v2095_v20 }
 0xf85   : > { %2100 = vadd.xlane.f32.xlu1 %v2097_v26  ;;  %v2399_v26 = vsel %vm1333_vm1, %v4597_v17, 0 }
0x100e   : > { %v2099_v33 = vpop.xlane.xlu1 %2098 }
0x100f   : > { %v2102_v34 = vmul.f32 0.0078125, %v2099_v33 }
0x1011   : > { %v2104_v35 = vadd.f32 1e-05, %v2102_v34 }
0x1012   : > { %v2101_v36 = vpop.xlane.xlu1 %2100 }
0x1013   : > { %4684 = vrsqrt.f32 %v2104_v35  ;;  %v2103_v37 = vmul.f32 0.0078125, %v2101_v36 }
0x1015   : > { %v2105_v38 = vadd.f32 1e-05, %v2103_v37 }
0x1017   : > { %4686 = vrsqrt.f32 %v2105_v38 }
0x101d   : > { %v4685_v39 = vpop.eup %4684 }
0x101e   : > { %v2108_v40 = vmul.f32 %v4685_v39, %v2094_v18 }
0x1020   : > { %v2116_v25 = vmul.f32 %v3895_v41, %v2108_v40 }
0x1021   : > { %v4687_v42 = vpop.eup %4686 }
0x1022   : > { %v2109_v24 = vmul.f32 %v4687_v42, %v2095_v20  ;;  %v6536_v46 = vadd.f32 %v3896_v43, %v2116_v25 }
0x1024   : > { %v2117_v44 = vmul.f32 %v3895_v41, %v2109_v24 }
0x1026   : > { %v6538_v47 = vadd.f32 %v3896_v43, %v2117_v44 }
0x1028   : > { %v2126_v49 = vpack.c.bf16 %v6538_v47, %v6536_v46 }
0x102a   : > { %4205 = vmatmul.mubr.bf16.vlgmr.msra.gmra.mrb[20].mxu0 %v2126_v49 }
0x102b   : > { %4236 = vmatprep.mubr.msk.bf16.mxu0 %vm5538_vm0, %v5537_v0  ;;  %4233 = vmatpush3.bf16.msra.mxu0 %v4601_v51 }
0x102c   : > { %4234 = vmatprep.subr.bf16.mxu0 %v5537_v0 }
0x10fd   : > { %v2251_v53 = vpop.f32.mrb[20].mxu0 }
0x10fe   : > { %v2252_v54 = vadd.f32 %v3897_v52, %v2251_v53  ;;  %v4206_v55 = vpop.f32.mrb[21].mxu0 }
0x10ff   : > { %v2254_v56 = vpop.f32.mrb[22].mxu0 }
0x1100   : > { %v2255_v57 = vadd.f32 %v3897_v52, %v2254_v56  ;;  %v4207_v58 = vpop.f32.mrb[23].mxu0  ;;  %v2258_v59 = vmul.f32 0.17677669, %v2252_v54  ;;  %v4602_v52 = vld [vmem:[#allocation23 + $0x18] sm:$0xff]  }
0x1101   : > { %4235 = vmatpush3.bf16.msra.mxu0 %v4602_v52 }
0x1102   : > { %v2259_v45 = vmul.f32 0.17677669, %v2255_v57  ;;  %4248 = vmatprep.subr.bf16.mxu0 %v5537_v0 }
0x1104   : > { %v6547_v48 = vpack.c.bf16 %v2259_v45, %v2258_v59  ;;  %v4599_v59 = vld [vmem:[#allocation23] sm:$0xff]  }
0x1106   : > { %4211 = vmatmul.mubr.msk.bf16.vlgmr.msra.gmra.mrb[32].mxu1 %vm1333_vm1, %v6547_v48 }
0x1107   : > { %4216 = vmatprep.mubr.msk.bf16.mxu1 %vm5538_vm0, %v5537_v0  ;;  %4215 = vmatpush3.bf16.msra.mxu1 %v4596_v14 }
0x1108   : > { %4220 = vmatprep.subr.bf16.mxu1 %v5537_v0 }
0x11d9   : > { %v2306_v60 = vpop.f32.mrb[32].mxu1 }
0x11da   : > { %v4212_v61 = vpop.f32.mrb[33].mxu1  ;;  %v2313_v62 = vsel %vm1383_vm3, %v2306_v60, -inf }
0x11db   : > { %2314 = vmax.xlane.f32.xlu1 %v2313_v62  ;;  %v2309_v63 = vpop.f32.mrb[34].mxu1  ;;  %v4603_v61 = vld [vmem:[%s6332_s7 + $0x10] sm:$0xff]  }
0x11dc   : > { %v4213_v1 = vpop.f32.mrb[35].mxu1  ;;  %v2316_v2 = vsel %vm1383_vm3, %v2309_v63, -inf }
0x11df   : > { %2317 = vmax.xlane.f32.xlu1 %v2316_v2 }
0x1268   : > { %v2315_v3 = vpop.xlane.xlu1 %2314 }
0x1269   : > { %v2319_v4 = vsub.f32 %v2306_v60, %v2315_v3  ;;  %v4600_v60 = vld [vmem:[#allocation23 + $0x8] sm:$0xff]  }
0x126b   : > { %v2321_v5 = vmul.f32 1.442695, %v2319_v4  ;;  %v2639_v4 = vsel %vm1333_vm1, %v4603_v61, 0 }
0x126c   : > { %v2318_v6 = vpop.xlane.xlu1 %2317 }
0x126d   : > { %4688 = vpow2.f32 %v2321_v5  ;;  %v2320_v7 = vsub.f32 %v2309_v63, %v2318_v6 }
0x126f   : > { %v2323_v8 = vmul.f32 1.442695, %v2320_v7 }
0x1271   : > { %4690 = vpow2.f32 %v2323_v8 }
0x1277   : > { %v4689_v10 = vpop.eup %4688 }
0x1278   : > { %v2325_v11 = vsel %vm1383_vm3, %v4689_v10, 0.0 }
0x1279   : > { %2326 = vadd.xlane.f32.xlu1 %v2325_v11 }
0x127b   : > { %v4691_v12 = vpop.eup %4690 }
0x127c   : > { %v2328_v13 = vsel %vm1383_vm3, %v4691_v12, 0.0 }
0x127d   : > { %2329 = vadd.xlane.f32.xlu1 %v2328_v13 }
0x128e   : > { %2388 = vrot.lane.b32.xlu1 %v6547_v48, %s5539_s26 }
0x1306   : > { %v2327_v15 = vpop.xlane.xlu1 %2326 }
0x1307   : > { %4692 = vrcp.f32 %v2327_v15 }
0x130a   : > { %v2330_v16 = vpop.xlane.xlu1 %2329 }
0x130b   : > { %4694 = vrcp.f32 %v2330_v16 }
0x130e   : > { %v2389_v9 = vpop.permute.xlu1 %2388 }
0x1311   : > { %v4693_v21 = vpop.eup %4692 }
0x1312   : > { %v2333_v19 = vmul.f32 %v4693_v21, %v4689_v10 }
0x1315   : > { %v4695_v18 = vpop.eup %4694 }
0x1316   : > { %v2334_v20 = vmul.f32 %v4695_v18, %v4691_v12 }
0x1318   : > { %v2335_v22 = vpack.c.bf16 %v2334_v20, %v2333_v19 }
0x131a   : > { %4217 = vmatmul.mubr.msk.bf16.vlgmr.msra.gmra.mrb[36].mxu1 %vm1383_vm3, %v2335_v22 }
0x131b   : > { %4221 = vmatpush3.bf16.xpose.msra.mxu1 %v2399_v26  ;;  %4222 = vmatprep.mubr.msk.bf16.mxu1 %vm5538_vm0, %v5537_v0 }
0x131c   : > { %4226 = vmatprep.subr.bf16.mxu1 %v5537_v0 }
0x1322   : > { %4223 = vmatmul.mubr.msk.bf16.vlgmr.msra.gmra.mrb[40].mxu1 %vm1333_vm1, %v2389_v9 }
0x1323   : > { %4228 = vmatprep.mubr.msk.bf16.mxu1 %vm5538_vm0, %v5537_v0  ;;  %4227 = vmatpush3.bf16.msra.mxu1 %v4598_v50 }
0x1324   : > { %4240 = vmatprep.subr.bf16.mxu1 %v5537_v0 }
0x13ed   : > { %v2379_v27 = vpop.f32.mrb[36].mxu1 }
0x13ee   : > { %v4218_v28 = vpop.f32.mrb[37].mxu1 }
0x13ef   : > { %v2382_v29 = vpop.f32.mrb[38].mxu1 }
0x13f0   : > { %v2386_v30 = vpack.c.bf16 %v2382_v29, %v2379_v27  ;;  %v4219_v31 = vpop.f32.mrb[39].mxu1 }
0x13f5   : > { %v2435_v32 = vpop.f32.mrb[40].mxu1 }
0x13f6   : > { %v4224_v33 = vpop.f32.mrb[41].mxu1  ;;  %v2442_v34 = vsel %vm1383_vm3, %v2435_v32, -inf }
0x13f7   : > { %2443 = vmax.xlane.f32.xlu0 %v2442_v34  ;;  %v2438_v35 = vpop.f32.mrb[42].mxu1 }
0x13f8   : > { %v4225_v36 = vpop.f32.mrb[43].mxu1  ;;  %v2445_v37 = vsel %vm1383_vm3, %v2438_v35, -inf }
0x13f9   : > { %v4606_v36 = vld [vmem:[#allocation23 + $0x20] sm:$0xff]  }
0x13fb   : > { %2446 = vmax.xlane.f32.xlu0 %v2445_v37 }
0x1484   : > { %v2444_v38 = vpop.xlane.xlu0 %2443 }
0x1485   : > { %v2448_v39 = vsub.f32 %v2435_v32, %v2444_v38 }
0x1487   : > { %v2450_v40 = vmul.f32 1.442695, %v2448_v39 }
0x1488   : > { %v2447_v41 = vpop.xlane.xlu0 %2446 }
0x1489   : > { %4696 = vpow2.f32 %v2450_v40  ;;  %v2449_v42 = vsub.f32 %v2438_v35, %v2447_v41  ;;  %v4604_v35 = vld [vmem:[%s6338_s2 + $0x10] sm:$0xff]   ;;  %v4605_v40 = vld [vmem:[%s6332_s7 + $0x18] sm:$0xff]  }
0x148b   : > { %v2452_v24 = vmul.f32 1.442695, %v2449_v42 }
0x148d   : > { %4698 = vpow2.f32 %v2452_v24 }
0x1493   : > { %v4697_v25 = vpop.eup %4696 }
0x1494   : > { %v2454_v43 = vsel %vm1383_vm3, %v4697_v25, 0.0 }
0x1495   : > { %2455 = vadd.xlane.f32.xlu0 %v2454_v43 }
0x1497   : > { %v4699_v44 = vpop.eup %4698 }
0x1498   : > { %v2457_v49 = vsel %vm1383_vm3, %v4699_v44, 0.0 }
0x1499   : > { %2458 = vadd.xlane.f32.xlu0 %v2457_v49 }
0x14af   : > { %2628 = vrot.lane.b32.xlu0 %v6547_v48, %s5540_s25 }
0x1522   : > { %v2456_v53 = vpop.xlane.xlu0 %2455 }
0x1523   : > { %4700 = vrcp.f32 %v2456_v53 }
0x1526   : > { %v2459_v54 = vpop.xlane.xlu0 %2458 }
0x1527   : > { %4702 = vrcp.f32 %v2459_v54 }
0x152a   : > { %v2629_v10 = vpop.permute.xlu0 %2628 }
0x152d   : > { %v4701_v55 = vpop.eup %4700 }
0x152e   : > { %v2462_v57 = vmul.f32 %v4701_v55, %v4697_v25 }
0x1531   : > { %v4703_v56 = vpop.eup %4702 }
0x1532   : > { %v2463_v58 = vmul.f32 %v4703_v56, %v4699_v44  ;;  %v4607_v44 = vld [vmem:[#allocation23 + $0x28] sm:$0xff]  }
0x1534   : > { %v2464_v45 = vpack.c.bf16 %v2463_v58, %v2462_v57 }
0x1536   : > { %4229 = vmatmul.mubr.msk.bf16.vlgmr.msra.gmra.mrb[44].mxu1 %vm1383_vm3, %v2464_v45 }
0x1537   : > { %4241 = vmatpush3.bf16.msra.mxu1 %v4599_v59  ;;  %4244 = vmatprep.mubr.msk.bf16.mxu1 %vm5538_vm0, %v5537_v0 }
0x1538   : > { %4242 = vmatprep.subr.bf16.mxu1 %v5537_v0 }
0x153b   : > { %4243 = vmatpush3.bf16.msra.mxu1 %v4600_v60 }
0x153c   : > { %4254 = vmatprep.subr.bf16.mxu1 %v5537_v0 }
0x153e   : > { %4245 = vmatmul.mubr.msk.bf16.vlgmr.msra.gmra.mrb[48].mxu1 %vm1333_vm1, %v2386_v30 }
0x153f   : > { %4256 = vmatprep.mubr.msk.bf16.mxu1 %vm5538_vm0, %v5537_v0  ;;  %4255 = vmatpush3.bf16.msra.mxu1 %v4604_v35 }
0x1540   : > { %4268 = vmatprep.subr.bf16.mxu1 %v5537_v0 }
0x1609   : > { %v2508_v62 = vpop.f32.mrb[44].mxu1 }
0x160a   : > { %v4230_v63 = vpop.f32.mrb[45].mxu1 }
0x160b   : > { %v2511_v1 = vpop.f32.mrb[46].mxu1 }
0x160c   : > { %v2515_v2 = vpack.c.bf16 %v2511_v1, %v2508_v62  ;;  %v4231_v3 = vpop.f32.mrb[47].mxu1 }
0x160e   : > { %4237 = vmatmul.mubr.msk.bf16.vlgmr.msra.gmra.mrb[24].mxu0 %vm1333_vm1, %v2515_v2 }
0x160f   : > { %4249 = vmatpush3.bf16.xpose.msra.mxu0 %v2639_v4  ;;  %4250 = vmatprep.mubr.msk.bf16.mxu0 %vm5538_vm0, %v5537_v0 }
0x1610   : > { %4260 = vmatprep.subr.bf16.mxu0 %v5537_v0 }
0x1611   : > { %v2621_v5 = vpop.f32.mrb[48].mxu1 }
0x1612   : > { %v4246_v6 = vpop.f32.mrb[49].mxu1 }
0x1613   : > { %v2624_v7 = vpop.f32.mrb[50].mxu1  ;;  %v4608_v6 = vld [vmem:[%s6338_s2 + $0x18] sm:$0xff]  }
0x1614   : > { %v4247_v8 = vpop.f32.mrb[51].mxu1 }
0x1616   : > { %4251 = vmatmul.mubr.msk.bf16.vlgmr.msra.gmra.mrb[28].mxu0 %vm1333_vm1, %v2629_v10 }
0x1617   : > { %4264 = vmatprep.mubr.msk.bf16.mxu0 %vm5538_vm0, %v5537_v0  ;;  %4261 = vmatpush3.bf16.msra.mxu0 %v4606_v36 }
0x1618   : > { %4262 = vmatprep.subr.bf16.mxu0 %v5537_v0 }
0x161b   : > { %4263 = vmatpush3.bf16.msra.mxu0 %v4607_v44 }
0x161c   : > { %4274 = vmatprep.subr.bf16.mxu0 %v5537_v0 }
0x16e1   : > { %v2565_v11 = vpop.f32.mrb[24].mxu0 }
0x16e2   : > { %v6597_v12 = vadd.f32 %v2621_v5, %v2565_v11  ;;  %v4238_v13 = vpop.f32.mrb[25].mxu0 }
0x16e3   : > { %v2568_v14 = vpop.f32.mrb[26].mxu0 }
0x16e4   : > { %v6599_v15 = vadd.f32 %v2624_v7, %v2568_v14  ;;  %v4239_v16 = vpop.f32.mrb[27].mxu0  ;;  %v4609_v7 = vld [vmem:[#allocation23 + $0x30] sm:$0xff]  }
0x16e9   : > { %v2675_v21 = vpop.f32.mrb[28].mxu0 }
0x16ea   : > { %v4252_v17 = vpop.f32.mrb[29].mxu0  ;;  %v2682_v18 = vsel %vm1383_vm3, %v2675_v21, -inf }
0x16eb   : > { %2683 = vmax.xlane.f32.xlu1 %v2682_v18  ;;  %v2678_v19 = vpop.f32.mrb[30].mxu0 }
0x16ec   : > { %v4253_v20 = vpop.f32.mrb[31].mxu0  ;;  %v2685_v22 = vsel %vm1383_vm3, %v2678_v19, -inf }
0x16ed   : > { %2686 = vmax.xlane.f32.xlu0 %v2685_v22 }
0x1778   : > { %v2684_v26 = vpop.xlane.xlu1 %2683 }
0x1779   : > { %v2688_v9 = vsub.f32 %v2675_v21, %v2684_v26 }
0x177a   : > { %v2687_v27 = vpop.xlane.xlu0 %2686 }
0x177b   : > { %v2690_v28 = vmul.f32 1.442695, %v2688_v9  ;;  %v2689_v29 = vsub.f32 %v2678_v19, %v2687_v27 }
0x177d   : > { %4704 = vpow2.f32 %v2690_v28  ;;  %v2692_v30 = vmul.f32 1.442695, %v2689_v29 }
0x177f   : > { %4706 = vpow2.f32 %v2692_v30 }
0x1787   : > { %v4705_v31 = vpop.eup %4704 }
0x1788   : > { %v2694_v32 = vsel %vm1383_vm3, %v4705_v31, 0.0 }
0x1789   : > { %v4707_v33 = vpop.eup %4706  ;;  %2695 = vadd.xlane.f32.xlu1 %v2694_v32 }
0x178a   : > { %v2697_v34 = vsel %vm1383_vm3, %v4707_v33, 0.0 }
0x178d   : > { %2698 = vadd.xlane.f32.xlu1 %v2697_v34 }
0x179e   : > { %2814 = vrot.lane.b32.xlu1 %v6547_v48, %s5541_s15  ;;  %v2825_v48 = vsel %vm1333_vm1, %v4605_v40, 0  ;;  %v4611_v40 = vld [vmem:[#allocation29] ss:$8 sps:$4 sm:$0xff]  }
0x1816   : > { %v2696_v37 = vpop.xlane.xlu1 %2695 }
0x1817   : > { %4708 = vrcp.f32 %v2696_v37 }
0x181a   : > { %v2699_v38 = vpop.xlane.xlu1 %2698 }
0x181b   : > { %4710 = vrcp.f32 %v2699_v38 }
0x181e   : > { %v2815_v43 = vpop.permute.xlu1 %2814 }
0x1821   : > { %v4709_v39 = vpop.eup %4708 }
0x1822   : > { %v2702_v42 = vmul.f32 %v4709_v39, %v4705_v31 }
0x1825   : > { %v4711_v41 = vpop.eup %4710 }
0x1826   : > { %v2703_v24 = vmul.f32 %v4711_v41, %v4707_v33  ;;  %v4613_v41 = vld [vmem:[#allocation29 + $0x4] ss:$8 sps:$4 sm:$0xff]  }
0x1828   : > { %v2704_v25 = vpack.c.bf16 %v2703_v24, %v2702_v42  ;;  %v4616_v42 = vld [vmem:[#allocation29 + $0x14] ss:$8 sps:$4 sm:$0xff]   ;;  %v4614_v24 = vld [vmem:[#allocation29 + $0x10] ss:$8 sps:$4 sm:$0xff]  }
0x182a   : > { %4257 = vmatmul.mubr.msk.bf16.vlgmr.msra.gmra.mrb[52].mxu1 %vm1383_vm3, %v2704_v25 }
0x182b   : > { %4269 = vmatpush3.bf16.xpose.msra.mxu1 %v2825_v48  ;;  %4270 = vmatprep.mubr.msk.bf16.mxu1 %vm5538_vm0, %v5537_v0 }
0x182c   : > { %4280 = vmatprep.subr.bf16.mxu1 %v5537_v0 }
0x1832   : > { %4271 = vmatmul.mubr.msk.bf16.vlgmr.msra.gmra.mrb[56].mxu1 %vm1333_vm1, %v2815_v43 }
0x1833   : > { %4284 = vmatprep.mubr.msk.bf16.mxu1 %vm5538_vm0, %v5537_v0  ;;  %4281 = vmatpush3.bf16.msra.mxu1 %v4609_v7  ;;  %v4642_v7 = vld [vmem:[#allocation32 + $0x18] sm:$0xff]  }
0x1834   : > { %4282 = vmatprep.subr.bf16.mxu1 %v5537_v0 }
0x18fd   : > { %v2748_v49 = vpop.f32.mrb[52].mxu1 }
0x18fe   : > { %v4258_v50 = vpop.f32.mrb[53].mxu1 }
0x18ff   : > { %v2751_v51 = vpop.f32.mrb[54].mxu1 }
0x1900   : > { %v2755_v52 = vpack.c.bf16 %v2751_v51, %v2748_v49  ;;  %v4259_v53 = vpop.f32.mrb[55].mxu1  ;;  %v4619_v51 = vld [vmem:[#allocation29 + $0x24] ss:$8 sps:$4 sm:$0xff]  }
0x1901   : > { %v4622_v53 = vld [vmem:[#allocation29 + $0x34] ss:$8 sps:$4 sm:$0xff]  }
0x1902   : > { %4265 = vmatmul.mubr.msk.bf16.vlgmr.msra.gmra.mrb[32].mxu0 %vm1333_vm1, %v2755_v52  ;;  %v4617_v52 = vld [vmem:[#allocation29 + $0x20] ss:$8 sps:$4 sm:$0xff]  }
0x1903   : > { %4276 = vmatprep.mubr.msk.bf16.mxu0 %vm5538_vm0, %v5537_v0  ;;  %4275 = vmatpush3.bf16.msra.mxu0 %v4608_v6  ;;  %v4610_v0 = vld [vmem:[#allocation23 + $0x38] sm:$0xff]   ;;  %v4641_v6 = vld [vmem:[#allocation32 + $0x58] sm:$0xff]  }
0x1904   : > { %4283 = vmatpush3.bf16.msra.mxu1 %v4610_v0  ;;  %3192 = vmatprep.subr.bf16.mxu0 %v4613_v41 }
0x1905   : > { %v2861_v54 = vpop.f32.mrb[56].mxu1 }
0x1906   : > { %v4272_v55 = vpop.f32.mrb[57].mxu1  ;;  %v2868_v56 = vsel %vm1383_vm3, %v2861_v54, -inf }
0x1907   : > { %2869 = vmax.xlane.f32.xlu0 %v2868_v56  ;;  %v2864_v57 = vpop.f32.mrb[58].mxu1  ;;  %v4625_v55 = vld [vmem:[#allocation29 + $0x44] ss:$8 sps:$4 sm:$0xff]   ;;  %v4623_v56 = vld [vmem:[#allocation29 + $0x40] ss:$8 sps:$4 sm:$0xff]  }
0x1908   : > { %v4273_v58 = vpop.f32.mrb[59].mxu1  ;;  %v2871_v59 = vsel %vm1383_vm3, %v2864_v57, -inf }
0x1909   : > { %v4626_v58 = vld [vmem:[#allocation29 + $0x50] ss:$8 sps:$4 sm:$0xff]  }
0x190b   : > { %2872 = vmax.xlane.f32.xlu0 %v2871_v59  ;;  %v4631_v59 = vld [vmem:[#allocation29 + $0x64] ss:$8 sps:$4 sm:$0xff]  }
0x1994   : > { %v2870_v45 = vpop.xlane.xlu0 %2869 }
0x1995   : > { %v2874_v60 = vsub.f32 %v2861_v54, %v2870_v45  ;;  %v4620_v54 = vld [vmem:[#allocation29 + $0x30] ss:$8 sps:$4 sm:$0xff]   ;;  %v4629_v45 = vld [vmem:[#allocation29 + $0x60] ss:$8 sps:$4 sm:$0xff]  }
0x1997   : > { %v2876_v61 = vmul.f32 1.442695, %v2874_v60  ;;  %v4634_v60 = vld [vmem:[#allocation29 + $0x74] ss:$8 sps:$4 sm:$0xff]  }
0x1998   : > { %v2873_v62 = vpop.xlane.xlu0 %2872 }
0x1999   : > { %4712 = vpow2.f32 %v2876_v61  ;;  %v2875_v63 = vsub.f32 %v2864_v57, %v2873_v62  ;;  %v4628_v57 = vld [vmem:[#allocation29 + $0x54] ss:$8 sps:$4 sm:$0xff]   ;;  %v4632_v61 = vld [vmem:[#allocation29 + $0x70] ss:$8 sps:$4 sm:$0xff]   ;;  %v5542_v62 = vmov 0  }
0x199b   : > { %v2878_v1 = vmul.f32 1.442695, %v2875_v63  ;;  %v4635_v63 = vld [vmem:[#allocation32 + $0x40] sm:$0xff]  }
0x199c   : > { %4066 = vmatprep.subr.bf16.mxu1 %v4635_v63 }
0x199d   : > { %4714 = vpow2.f32 %v2878_v1  ;;  %v4636_v1 = vld [vmem:[#allocation32] sm:$0xff]  }
0x19a3   : > { %v4713_v2 = vpop.eup %4712 }
0x19a4   : > { %v2880_v3 = vsel %vm1383_vm3, %v4713_v2, 0.0 }
0x19a5   : > { %2881 = vadd.xlane.f32.xlu0 %v2880_v3  ;;  %v4638_v3 = vld [vmem:[#allocation32 + $0x8] sm:$0xff]  }
0x19a7   : > { %v4715_v4 = vpop.eup %4714 }
0x19a8   : > { %v2883_v5 = vsel %vm1383_vm3, %v4715_v4, 0.0 }
0x19a9   : > { %2884 = vadd.xlane.f32.xlu1 %v2883_v5  ;;  %v4640_v5 = vld [vmem:[#allocation32 + $0x10] sm:$0xff]  }
0x19d5   : > { %v2805_v8 = vpop.f32.mrb[32].mxu0 }
0x19d6   : > { %v2812_v10 = vadd.f32 %v2805_v8, %v6597_v12  ;;  %v4266_v11 = vpop.f32.mrb[33].mxu0  ;;  %v4643_v8 = vld [vmem:[#allocation32 + $0x60] sm:$0xff]  }
0x19d7   : > { %v2808_v13 = vpop.f32.mrb[34].mxu0  ;;  %v4645_v11 = vld [vmem:[#allocation32 + $0x68] sm:$0xff]  }
0x19d8   : > { %v2813_v14 = vadd.f32 %v2808_v13, %v6599_v15  ;;  %v4267_v16 = vpop.f32.mrb[35].mxu0  ;;  %v3934_v15 = vld [vmem:[#allocation25] ss:$0 sm:$0xff] }
0x1a32   : > { %v2882_v21 = vpop.xlane.xlu0 %2881 }
0x1a33   : > { %4716 = vrcp.f32 %v2882_v21 }
0x1a36   : > { %v2885_v17 = vpop.xlane.xlu1 %2884 }
0x1a37   : > { %4718 = vrcp.f32 %v2885_v17 }
0x1a3d   : > { %v4717_v18 = vpop.eup %4716 }
0x1a3e   : > { %v2888_v20 = vmul.f32 %v4717_v18, %v4713_v2  ;;  %v4637_v2 = vld [vmem:[#allocation32 + $0x48] sm:$0xff]  }
0x1a41   : > { %v4719_v19 = vpop.eup %4718 }
0x1a42   : > { %v2889_v22 = vmul.f32 %v4719_v19, %v4715_v4  ;;  %v4639_v4 = vld [vmem:[#allocation32 + $0x50] sm:$0xff]  }
0x1a44   : > { %v2890_v26 = vpack.c.bf16 %v2889_v22, %v2888_v20  ;;  %v3935_v22 = vld [vmem:[#allocation26] ss:$0 sm:$0xff] }
0x1a46   : > { %4277 = vmatmul.mubr.msk.bf16.vlgmr.msra.gmra.mrb[36].mxu0 %vm1383_vm3, %v2890_v26 }
0x1a47   : > { %3193 = vmatpush1.bf16.msra.mxu0 %v4611_v40  ;;  %3224 = vmatprep.mubr.bf16.mxu0 %v5542_v62 }
0x1a48   : > { %3194 = vmatprep.subr.bf16.mxu0 %v4616_v42 }
0x1a4b   : > { %3195 = vmatpush1.bf16.msra.mxu0 %v4614_v24 }
0x1a4c   : > { %3196 = vmatprep.subr.bf16.mxu0 %v4619_v51 }
0x1a4f   : > { %3197 = vmatpush1.bf16.msra.mxu0 %v4617_v52 }
0x1a50   : > { %3198 = vmatprep.subr.bf16.mxu0 %v4622_v53 }
0x1a53   : > { %3199 = vmatpush1.bf16.msra.mxu0 %v4620_v54 }
0x1a54   : > { %3200 = vmatprep.subr.bf16.mxu0 %v4625_v55 }
0x1a57   : > { %3201 = vmatpush1.bf16.msra.mxu0 %v4623_v56 }
0x1a58   : > { %3202 = vmatprep.subr.bf16.mxu0 %v4628_v57 }
0x1a5b   : > { %3203 = vmatpush1.bf16.msra.mxu0 %v4626_v58 }
0x1a5c   : > { %3204 = vmatprep.subr.bf16.mxu0 %v4631_v59 }
0x1a5f   : > { %3205 = vmatpush1.bf16.msra.mxu0 %v4629_v45 }
0x1a60   : > { %3206 = vmatprep.subr.bf16.mxu0 %v4634_v60 }
0x1a63   : > { %3207 = vmatpush1.bf16.msra.mxu0 %v4632_v61 }
0x1b19   : > { %v2934_v9 = vpop.f32.mrb[36].mxu0 }
0x1b1a   : > { %v4278_v12 = vpop.f32.mrb[37].mxu0 }
0x1b1b   : > { %v2937_v27 = vpop.f32.mrb[38].mxu0  ;;  %v3936_v12 = vld [vmem:[#allocation28] ss:$0 sm:$0xff] }
0x1b1c   : > { %v2941_v28 = vpack.c.bf16 %v2937_v27, %v2934_v9  ;;  %v4279_v29 = vpop.f32.mrb[39].mxu0 }
0x1b1e   : > { %4285 = vmatmul.mubr.msk.bf16.vlgmr.msra.gmra.mrb[60].mxu1 %vm1333_vm1, %v2941_v28 }
0x1b1f   : > { %4067 = vmatpush3.bf16.msra.mxu1 %v4636_v1 }
0x1b20   : > { %4068 = vmatprep.subr.bf16.mxu1 %v4637_v2 }
0x1b23   : > { %4069 = vmatpush3.bf16.msra.mxu1 %v4638_v3 }
0x1b24   : > { %4070 = vmatprep.subr.bf16.mxu1 %v4639_v4 }
0x1b27   : > { %4071 = vmatpush3.bf16.msra.mxu1 %v4640_v5 }
0x1b28   : > { %4072 = vmatprep.subr.bf16.mxu1 %v4641_v6 }
0x1b2b   : > { %4073 = vmatpush3.bf16.msra.mxu1 %v4642_v7 }
0x1b2c   : > { %4074 = vmatprep.subr.bf16.mxu1 %v4643_v8 }
0x1bf1   : > { %v2991_v30 = vpop.f32.mrb[60].mxu1 }
0x1bf2   : > { %v2998_v31 = vadd.f32 %v2991_v30, %v2812_v10  ;;  %v4286_v32 = vpop.f32.mrb[61].mxu1  ;;  %v4644_v10 = vld [vmem:[#allocation32 + $0x20] sm:$0xff]   ;;  %v4646_v30 = vld [vmem:[#allocation32 + $0x28] sm:$0xff]  }
0x1bf3   : > { %v2994_v33 = vpop.f32.mrb[62].mxu1  ;;  %4075 = vmatpush3.bf16.msra.mxu1 %v4644_v10  ;;  %v4648_v32 = vld [vmem:[#allocation32 + $0x30] sm:$0xff]  }
0x1bf4   : > { %v3006_v34 = vadd.f32 %v3934_v15, %v2998_v31  ;;  %v2999_v35 = vadd.f32 %v2994_v33, %v2813_v14  ;;  %v4287_v36 = vpop.f32.mrb[63].mxu1  ;;  %4076 = vmatprep.subr.bf16.mxu1 %v4645_v11  ;;  %v4647_v31 = vld [vmem:[#allocation32 + $0x70] sm:$0xff]   ;;  %v4649_v33 = vld [vmem:[#allocation32 + $0x78] sm:$0xff]  }
0x1bf5   : > { %v3064_v36 = vld [vmem:[#allocation31] sm:$0x3] }
0x1bf6   : > { %v3007_v37 = vadd.f32 %v3934_v15, %v2999_v35  ;;  %v3008_v38 = vadd.f32 %v3006_v34, %v6536_v46  ;;  %v4650_v34 = vld [vmem:[#allocation32 + $0x38] sm:$0xff]   ;;  %v3104_v35 = vsub.s32 0, %v6405_v23 }
0x1bf7   : > { %4077 = vmatpush3.bf16.msra.mxu1 %v4646_v30 }
0x1bf8   : > { %3010 = vadd.xlane.f32.xlu0 %v3008_v38  ;;  %v3009_v39 = vadd.f32 %v3007_v37, %v6538_v47  ;;  %4078 = vmatprep.subr.bf16.mxu1 %v4647_v31  ;;  %v3108_v37 = vsub.s32 1, %v6405_v23  ;;  %v3953_v23 = vld [vmem:[#allocation34] ss:$0 sm:$0xff] }
0x1bfb   : > { %4079 = vmatpush3.bf16.msra.mxu1 %v4648_v32 }
0x1bfc   : > { %3012 = vadd.xlane.f32.xlu0 %v3009_v39  ;;  %4080 = vmatprep.subr.bf16.mxu1 %v4649_v33 }
0x1bff   : > { %4081 = vmatpush3.bf16.msra.mxu1 %v4650_v34 }
0x1c85   : > { %v3011_v25 = vpop.xlane.xlu0 %3010 }
0x1c86   : > { %v3014_v48 = vmul.f32 0.0078125, %v3011_v25 }
0x1c88   : > { %v6635_v43 = vsub.f32 %v3008_v38, %v3014_v48  ;;  %v3105_v38 = vrot.slane %v3064_v36, %v3104_v35 }
0x1c89   : > { %v3013_v44 = vpop.xlane.xlu0 %3012 }
0x1c8a   : > { %v3015_v49 = vmul.f32 0.0078125, %v3013_v44  ;;  %v3018_v46 = vmul.f32 %v6635_v43, %v6635_v43 }
0x1c8c   : > { %v6639_v50 = vsub.f32 %v3009_v39, %v3015_v49  ;;  %3020 = vadd.xlane.f32.xlu0 %v3018_v46  ;;  %v3109_v39 = vrot.slane %v3064_v36, %v3108_v37 }
0x1c8e   : > { %v3019_v47 = vmul.f32 %v6639_v50, %v6639_v50 }
0x1c90   : > { %3022 = vadd.xlane.f32.xlu0 %v3019_v47 }
0x1d19   : > { %v3021_v13 = vpop.xlane.xlu0 %3020 }
0x1d1a   : > { %v3024_v14 = vmul.f32 0.0078125, %v3021_v13 }
0x1d1c   : > { %v3026_v16 = vadd.f32 1e-05, %v3024_v14 }
0x1d1d   : > { %v3023_v21 = vpop.xlane.xlu0 %3022 }
0x1d1e   : > { %4720 = vrsqrt.f32 %v3026_v16  ;;  %v3025_v17 = vmul.f32 0.0078125, %v3023_v21 }
0x1d20   : > { %v3027_v18 = vadd.f32 1e-05, %v3025_v17  ;;  %v3970_v17 = vld [vmem:[#allocation35] ss:$0 sm:$0xff] }
0x1d22   : > { %4722 = vrsqrt.f32 %v3027_v18 }
0x1d28   : > { %v4721_v19 = vpop.eup %4720 }
0x1d29   : > { %v3030_v20 = vmul.f32 %v4721_v19, %v6635_v43 }
0x1d2b   : > { %v3038_v9 = vmul.f32 %v3935_v22, %v3030_v20 }
0x1d2c   : > { %v4723_v26 = vpop.eup %4722 }
0x1d2d   : > { %v3031_v0 = vmul.f32 %v4723_v26, %v6639_v50  ;;  %v3046_v28 = vadd.f32 %v3936_v12, %v3038_v9 }
0x1d2f   : > { %v3039_v27 = vmul.f32 %v3935_v22, %v3031_v0  ;;  %v3971_v22 = vld [vmem:[#allocation37] ss:$0 sm:$0xff] }
0x1d31   : > { %v3047_v29 = vadd.f32 %v3936_v12, %v3039_v27 }
0x1d33   : > { %v3100_v15 = vpack.c.bf16 %v3047_v29, %v3046_v28 }
0x1d35   : > { %3225 = vmatmul.mubr.bf16.vlgmr.msra.gmra.mrb[40].mxu0 %v3100_v15 }
0x1e08   : > { %v3226_v40 = vpop.f32.mrb[40].mxu0 }
0x1e09   : > { %v3227_v41 = vadd.f32 %v3226_v40, %v3105_v38  ;;  %v3228_v42 = vpop.f32.mrb[41].mxu0 }
0x1e0a   : > { %v3229_v24 = vadd.f32 %v3228_v42, %v3109_v39  ;;  %v3230_v25 = vpop.f32.mrb[42].mxu0 }
0x1e0b   : > { %v3231_v48 = vadd.f32 %v3230_v25, %v3105_v38  ;;  %v3232_v43 = vpop.f32.mrb[43].mxu0  ;;  %v3235_v49 = vmax.f32 %v3227_v41, 0.0 }
0x1e0c   : > { %v3233_v44 = vadd.f32 %v3232_v43, %v3109_v39  ;;  %v3236_v50 = vmax.f32 %v3229_v24, 0.0 }
0x1e0d   : > { %v3237_v46 = vmax.f32 %v3231_v48, 0.0 }
0x1e0e   : > { %v3238_v47 = vmax.f32 %v3233_v44, 0.0 }
0x1e0f   : > { %v3239_v51 = vpack.c.bf16 %v3237_v46, %v3235_v49 }
0x1e10   : > { %v3240_v52 = vpack.c.bf16 %v3238_v47, %v3236_v50 }
0x1e12   : > { %3375 = vmatprep.mubr.bf16.mxu1 %v3240_v52 }
0x1e13   : > { %3376 = vmatmul.mubr.bf16.vlgmr.msra.gmra.mrb[64].mxu1 %v3239_v51 }
0x1ee6   : > { %v4082_v53 = vpop.f32.mrb[64].mxu1 }
0x1ee7   : > { %v4083_v54 = vpop.f32.mrb[65].mxu1 }
0x1ee8   : > { %v4084_v55 = vadd.f32 %v4083_v54, %v4082_v53  ;;  %v4085_v56 = vpop.f32.mrb[66].mxu1 }
0x1ee9   : > { %v4086_v57 = vpop.f32.mrb[67].mxu1 }
0x1eea   : > { %v3378_v58 = vadd.f32 %v4084_v55, %v3953_v23  ;;  %v4087_v59 = vadd.f32 %v4086_v57, %v4085_v56 }
0x1eec   : > { %v3381_v45 = vadd.f32 %v4087_v59, %v3953_v23  ;;  %v3384_v60 = vadd.f32 %v3378_v58, %v3046_v28 }
0x1eee   : > { %3386 = vadd.xlane.f32.xlu0 %v3384_v60  ;;  %v3385_v61 = vadd.f32 %v3381_v45, %v3047_v29 }
0x1ef2   : > { %3388 = vadd.xlane.f32.xlu0 %v3385_v61 }
0x1f7b   : > { %v3387_v62 = vpop.xlane.xlu0 %3386 }
0x1f7c   : > { %v3390_v63 = vmul.f32 0.0078125, %v3387_v62 }
0x1f7e   : > { %v3392_v1 = vsub.f32 %v3384_v60, %v3390_v63 }
0x1f7f   : > { %v3389_v2 = vpop.xlane.xlu0 %3388 }
0x1f80   : > { %v3391_v3 = vmul.f32 0.0078125, %v3389_v2  ;;  %v3394_v4 = vmul.f32 %v3392_v1, %v3392_v1 }
0x1f82   : > { %v3393_v5 = vsub.f32 %v3385_v61, %v3391_v3  ;;  %3396 = vadd.xlane.f32.xlu0 %v3394_v4 }
0x1f84   : > { %v3395_v6 = vmul.f32 %v3393_v5, %v3393_v5 }
0x1f86   : > { %3398 = vadd.xlane.f32.xlu0 %v3395_v6 }
0x200f   : > { %v3397_v7 = vpop.xlane.xlu0 %3396 }
0x2010   : > { %v3400_v8 = vmul.f32 0.0078125, %v3397_v7 }
0x2012   : > { %v3402_v10 = vadd.f32 1e-05, %v3400_v8 }
0x2013   : > { %v3399_v11 = vpop.xlane.xlu0 %3398 }
0x2014   : > { %4724 = vrsqrt.f32 %v3402_v10  ;;  %v3401_v13 = vmul.f32 0.0078125, %v3399_v11 }
0x2016   : > { %v3403_v14 = vadd.f32 1e-05, %v3401_v13 }
0x2018   : > { %4726 = vrsqrt.f32 %v3403_v14 }
0x201e   : > { %v4725_v16 = vpop.eup %4724 }
0x201f   : > { %v3406_v21 = vmul.f32 %v4725_v16, %v3392_v1 }
0x2021   : > { %v3414_v19 = vmul.f32 %v3970_v17, %v3406_v21 }
0x2022   : > { %v4727_v18 = vpop.eup %4726 }
0x2023   : > { %v3407_v20 = vmul.f32 %v4727_v18, %v3393_v5  ;;  %v3422_v0 = vadd.f32 %v3971_v22, %v3414_v19 }
0x2025   : > { %v3415_v26 = vmul.f32 %v3970_v17, %v3407_v20 }
0x2027   : > { %v3423_v9 = vadd.f32 %v3971_v22, %v3415_v26 }
0x2029   : > { %v3990_v12 = vpack.c.bf16 %v3423_v9, %v3422_v0 }
0x202b   : > { %3991 = vst [vmem:[%s1137_s18] sm:$0xff] %v3990_v12  }
0x202c   : > { %5395 = shalt.err (!%p5392_p1)
}
0x202d   : > { %s5396_s29 = scalar_lea.hbm %s6653_s19, 128  ;;  %s5400_s8 = scalar_lea.hbm %s6878_s12, 256 }
0x202e   : > { %p5397_p12 = scmp.ne.s32.totalorder %s6653_s19, %s5396_s29  ;;  %p5401_p0 = scmp.lt.u32.totalorder %s6653_s19, %s6878_s12 }
0x202f   : > { %p5402_p9 = scmp.lt.u32.totalorder %s5400_s8, %s5396_s29  ;;  %p5404_p3 = scmp.lt.u32.totalorder %s5396_s29, %s6653_s19 }
0x2030   : > { %p5398_p8 = pnand %p5397_p12, %p6879_p11 }
0x2031   : > { %p5403_p10 = por %p5402_p9, %p5401_p0 }
0x2032   : > { %p5399_p2 = pneg %p5398_p8 }
0x2033   : > { %p5405_p4 = por %p5404_p3, %p5403_p10 }
0x2035   : > { %p5406_p7 = pnand %p5405_p4, %p5399_p2 }
0x2037   : > { %5409 = shalt.err (!%p5406_p7)
}
0x2038   : > { %s5544_s26 = smov 4  }
0x2039   : > { %4370 = dma.vmem_to_hbm [thread:$0]  (%p6879_p11), %s6655_s0, 128, %s6653_s19, %s3435_s22, %s5540_s25, %s5540_s25, %s5544_s26  }
0x203a PF: > { %s6880_s15 = sld [smem:[#allocation52_spill]]  ;;  %s6881_s14 = sld [smem:[#allocation59_spill]] }
0x203b   : > { %s6882_s17 = sld [smem:[#allocation55_spill]] }
0x2040   : > { %s3465_s18 = sand.u32 1, %s6880_s15   ;;  %p6883_p13 = scmp.ne.s32.totalorder %s6881_s14, 0 }
0x2041   : > { %p6884_p6 = scmp.ge.s32.totalorder %s6882_s17, 2  ;;  %s3466_s21 = scalar_lea.sflag [#allocation4], %s3465_s18 }
0x2043   : > { %p4444_p5 = pnand %p6884_p6, %p6883_p13 }
0x2045   : > { %5483 = dma.done.wait (!%p4444_p5), %s3466_s21, 128  }
0x2046   : > { %5485 = vsyncadd (!%p4444_p5), %s3466_s21, 4294967168  ;;  %s54_s1 = sadd.s32 1, %s6882_s17   ;;  %s6885_s23 = sld [smem:[#allocation53_spill]] }
0x2047   : > { %p51_p1 = scmp.ge.s32.totalorder %s54_s1, 4   ;;  %s6886_s24 = sld [smem:[#allocation58_spill]] }
0x2048   : > { %s6887_s9 = sld [smem:[#allocation57_spill]]  ;;  %s6888_s4 = smov %s5492_s30 }
0x2049   : > { %s6890_s25 = smov %s5504_s5  ;;  %53 = sbr.rel (!%p51_p1) target bundleno = 44 (0x2c), region = 277 }
0x204c   : > { %s6889_s30 = smov %s6885_s23 }
0x204e   : > { %s6891_s5 = smov %s6887_s9 }
0x2050   :  { %3471 = vsyncpa [#allocation3], 1 }
0x2051   :  { %3473 = vsyncpa [#allocation3 + $0x1], 1 }
0x2052   :  { %3474 = vsyncpa [#allocation6], 1 }
0x2053   :  { %3476 = vsyncpa [#allocation6 + $0x1], 1 }
0x2054   :  { %3477 = vsyncpa [#allocation9], 1 }
0x2055   :  { %3479 = vsyncpa [#allocation9 + $0x1], 1 }
0x2056   :  { %3480 = vsyncpa [#allocation12], 1 }
0x2057   :  { %3481 = vsyncpa [#allocation15], 1 }
0x2058   :  { %3482 = vsyncpa [#allocation18], 1 }
0x2059   :  { %3483 = vsyncpa [#allocation21], 1 }
0x205a   :  { %3484 = vsyncpa [#allocation24], 1 }
0x205b   :  { %3485 = vsyncpa [#allocation27], 1 }
0x205c   :  { %3486 = vsyncpa [#allocation30], 1 }
0x205d   :  { %3487 = vsyncpa [#allocation33], 1 }
0x205e   :  { %3488 = vsyncpa [#allocation36], 1 }
0x205f   :  { %3489 = vsyncpa [#allocation4], 1 }
0x2060   :  { %3491 = vsyncpa [#allocation4 + $0x1], 1 }

</bundles_post_ra>
